<compile_context>
chip_gen: v7x
topology: tpu7x:2x2x1
jax: 0.10.0
libtpu: 0.0.40
codegen_flags: <defaults>
</compile_context>

<pallas_src>
import jax
import jax.numpy as jnp
from jax.experimental import pallas as pl
from jax.experimental.pallas import tpu as pltpu


def _conv1x1_matmul_kernel(x_ref, w_ref, o_ref):
    # x_ref: (tm, K) bf16   activation rows
    # w_ref: (K, tn) bf16   pre-transposed weight block (natural MXU layout)
    # o_ref: (tm, tn) out dtype
    # Single reduction step (tk == K): no accumulator scratch, no pl.when
    # init/finalize gates -- just one MXU contraction and a lane-dense store.
    o_ref[...] = jnp.dot(
        x_ref[...], w_ref[...], preferred_element_type=jnp.float32
    ).astype(o_ref.dtype)


def _pallas_conv1x1_matmul(x2d, w_t2d, *, tm, tn, out_dtype):
    """y = x2d @ w_t2d ; x2d: [M, K] bf16, w_t2d: [K, N] bf16 -> [M, N]."""
    M, K = x2d.shape
    K2, N = w_t2d.shape
    assert K == K2
    assert M % tm == 0 and N % tn == 0

    cost = pl.CostEstimate(
        flops=2 * M * K * N,
        transcendentals=0,
        bytes_accessed=(M * K + K * N) * 2 + M * N * jnp.dtype(out_dtype).itemsize,
    )

    return pl.pallas_call(
        _conv1x1_matmul_kernel,
        out_shape=jax.ShapeDtypeStruct((M, N), out_dtype),
        grid_spec=pltpu.PrefetchScalarGridSpec(
            num_scalar_prefetch=0,
            # Weight/output-channel axis (j) OUTERMOST: W's block index changes
            # only at the outer-axis boundary, so each W block is fetched from
            # HBM exactly once even when there are many M blocks.
            grid=(N // tn, M // tm),
            in_specs=[
                pl.BlockSpec((tm, K), lambda j, i: (i, 0)),  # activations
                pl.BlockSpec((K, tn), lambda j, i: (0, j)),  # weight: outer axis only
            ],
            out_specs=pl.BlockSpec((tm, tn), lambda j, i: (i, j)),
        ),
        compiler_params=pltpu.CompilerParams(
            dimension_semantics=("parallel", "parallel"),
            # ~11 MiB live (2 MiB X + 8 MiB W + 1 MiB out, double-buffered);
            # set the budget explicitly so v5e's 16 MiB default scoped limit
            # never forces a smaller tiling. 32 MiB is in-scope on v5e/v6e/v7x.
            vmem_limit_bytes=32 * 1024 * 1024,
        ),
        cost_estimate=cost,
    )(x2d, w_t2d)


def conv1x1_nobias(x_nchw, w_t_bf16, out_dtype=jnp.float32):
    """1x1 conv, no bias.

    x_nchw:   [N, C_in, H, W] (any float dtype; cast to bf16 for the kernel)
    w_t_bf16: [C_in, C_out] bf16  (weight pre-transposed once at init)
    returns:  [N, C_out, H, W] out_dtype
    """
    n, c_in, h, w = x_nchw.shape
    c_in2, c_out = w_t_bf16.shape
    assert c_in == c_in2

    # Flatten spatial+batch to rows (NHWC-flattened) so C_out lands on the
    # lane (last) dim of the output block -> lane-dense, unmasked stores.
    # TODO(synk): for large spatial inputs, keep NHWC as the interchange
    # format end-to-end to avoid these two wrapper-side layout passes
    # (negligible at the shipped tiny shape).
    x2d = jnp.transpose(x_nchw, (0, 2, 3, 1)).reshape(n * h * w, c_in)
    x2d = x2d.astype(jnp.bfloat16)

    # Robust M tiling: cap tm and zero-pad M so big spatial inputs still fit.
    m = n * h * w
    m_pad8 = -(-m // 8) * 8
    tm = min(256, m_pad8)
    m_padded = -(-m // tm) * tm
    if m_padded != m:
        x2d = jnp.pad(x2d, ((0, m_padded - m), (0, 0)))

    # Two output-channel blocks when possible (one per v7x TensorCore, fewer
    # grid steps on v6e/v5e); ragged or small C_out falls back to one full
    # block (block_shape == full dim is always legal).
    if c_out >= 512 and c_out % 256 == 0:
        tn = c_out // 2
    else:
        tn = c_out
    assert c_out % tn == 0

    y2d = _pallas_conv1x1_matmul(x2d, w_t_bf16, tm=tm, tn=tn, out_dtype=out_dtype)
    y2d = y2d[:m]
    return jnp.transpose(y2d.reshape(n, h, w, c_out), (0, 3, 1, 2))


conv1x1_nobias_jit = jax.jit(conv1x1_nobias, static_argnames=("out_dtype",))


class TransformerPallas:
    """Mirror of the PyTorch `transformer` module."""

    def __init__(self, key):
        k1, k2 = jax.random.split(key)
        # conv1: Conv2d(2048, 2048, 1, bias=False), xavier_normal_
        # fan_in = fan_out = 2048 -> std = sqrt(2 / (2048 + 2048))
        std1 = (2.0 / (2048 + 2048)) ** 0.5
        w1 = std1 * jax.random.normal(k1, (2048, 2048), jnp.float32)  # [C_out, C_in]
        # Pre-transpose ONCE at init to [C_in, C_out] and store in bf16: the
        # kernel then consumes the MXU-native (K, tn) layout with no per-step
        # weight transpose, and the dominant HBM weight stream is halved.
        # (fp8/int8 weight quantization is a further opt-in, not applied here.)
        self.conv1_w_t = jnp.transpose(w1).astype(jnp.bfloat16)
        # conv2: Conv2d(64, 64, 1, bias=False) — defined but unused in forward.
        std2 = (2.0 / (64 + 64)) ** 0.5
        w2 = std2 * jax.random.normal(k2, (64, 64), jnp.float32)
        self.conv2_w_t = jnp.transpose(w2).astype(jnp.bfloat16)

    def forward(self, inputs):
        results = []
        results.append(conv1x1_nobias_jit(inputs, self.conv1_w_t))
        return results


if __name__ == "__main__":
    key = jax.random.PRNGKey(0)
    kp, kx = jax.random.split(key)

    model = TransformerPallas(kp)

    # Small spatial shape; channel count (2048) is dictated by the module.
    N, C, H, W = 2, 2048, 4, 4
    x = jax.random.normal(kx, (N, C, H, W), jnp.float32)

    out = model.forward(x)
    y = jax.block_until_ready(out[0])
    assert y.shape == (N, 2048, H, W), y.shape
    assert y.dtype == jnp.float32, y.dtype

    # Reference check: plain-JAX einsum on the same bf16-quantized operands
    # (kernel accumulates in f32), so only accumulation-order noise remains.
    w_t_ref = model.conv1_w_t.astype(jnp.float32)            # [C_in, C_out]
    x_ref = x.astype(jnp.bfloat16).astype(jnp.float32)
    y_ref = jnp.einsum("nchw,co->nohw", x_ref, w_t_ref)
    assert jnp.allclose(y, y_ref, atol=2e-2, rtol=2e-2), float(
        jnp.max(jnp.abs(y - y_ref))
    )

    print("KERNEL_OK")
</pallas_src>

<mosaic_0001>
module attributes {stable_mosaic.version = 11 : i64} {
  func.func @_conv1x1_matmul_kernel(%arg0: i32, %arg1: i32, %arg2: memref<32x2048xbf16, #tpu.memory_space<vmem>>, %arg3: memref<2048x1024xbf16, #tpu.memory_space<vmem>>, %arg4: memref<32x1024xf32, #tpu.memory_space<vmem>>) attributes {dimension_semantics = [#tpu.dimension_semantics<parallel>, #tpu.dimension_semantics<parallel>], iteration_bounds = array<i64: 2, 1>, scalar_prefetch = 0 : i64, scratch_operands = 0 : i64, tpu.core_type = #tpu.core_type<tc>, window_params = [{transform_indices = @transform_0, window_bounds = array<i64: 32, 2048>}, {transform_indices = @transform_1, window_bounds = array<i64: 2048, 1024>}, {transform_indices = @transform_2, window_bounds = array<i64: 32, 1024>}]} {
    %c0 = arith.constant 0 : index
    %c0_0 = arith.constant 0 : index
    %0 = vector.load %arg2[%c0, %c0_0] : memref<32x2048xbf16, #tpu.memory_space<vmem>>, vector<32x2048xbf16>
    %c0_1 = arith.constant 0 : index
    %c0_2 = arith.constant 0 : index
    %1 = vector.load %arg3[%c0_1, %c0_2] : memref<2048x1024xbf16, #tpu.memory_space<vmem>>, vector<2048x1024xbf16>
    %cst = arith.constant dense<0.000000e+00> : vector<32x1024xf32>
    %2 = tpu.matmul %0, %1, %cst {dimension_numbers = #tpu.dot_dimension_numbers<[1], [0], [0], [1], [0, 0, 1, 1], [], []>} : vector<32x2048xbf16>, vector<2048x1024xbf16>, vector<32x1024xf32> -> vector<32x1024xf32>
    %c0_3 = arith.constant 0 : index
    %c0_4 = arith.constant 0 : index
    %3 = vector.load %arg4[%c0_3, %c0_4] : memref<32x1024xf32, #tpu.memory_space<vmem>>, vector<32x1024xf32>
    tpu.vector_store %arg4[%c0_3, %c0_4], %2 {strides = array<i32>} : memref<32x1024xf32, #tpu.memory_space<vmem>>, vector<32x1024xf32>,
    return
  }
  func.func @transform_0(%arg0: i32, %arg1: i32) -> (i32, i32) {
    %c0_i32 = arith.constant 0 : i32
    %c0_i32_0 = arith.constant 0 : i32
    return %arg1, %c0_i32 : i32, i32
  }
  func.func @transform_1(%arg0: i32, %arg1: i32) -> (i32, i32) {
    %c0_i32 = arith.constant 0 : i32
    %c0_i32_0 = arith.constant 0 : i32
    return %c0_i32, %arg0 : i32, i32
  }
  func.func @transform_2(%arg0: i32, %arg1: i32) -> (i32, i32) {
    %c0_i32 = arith.constant 0 : i32
    return %arg1, %arg0 : i32, i32
  }
}

</mosaic_0001>

<bundles_post_ra>
// kernel: conv1x1_nobias.1
= control target key start
LH: loop header
LB: loop body
LE: loop exit
PB: predicated region body
PF: predicated region fallthrough
CT: control target
= control target key end

     0   :  { %7 = vsyncpa [#allocation3], 0  ;;  %s11515_s0 = inlined_call_operand.vmem [shape: bf16[32,2048], index: 0, kind: input, shape index: {}]   ;;  %s11516_s1 = inlined_call_operand.hbm [shape: bf16[2048,2048], index: 1, kind: input, shape index: {}]   ;;  %s11517_s2 = inlined_call_operand.vmem [shape: f32[32,2048], index: 2, kind: output, shape index: {}]  }
   0x1   :  { %9 = vsyncpa [#allocation3 + $0x1], 0  ;;  %s9901_s9 = smov 0   ;;  %s9903_s10 = smov 0  }
   0x2   :  { %s9905_s11 = smov 0   ;;  %s9907_s12 = smov 0  }
   0x3   :  { %s9909_s13 = smov 0   ;;  %s9911_s14 = smov 0  }
   0x4 LB: > { %s8444_s15 = sadd.s32 4294967295, %s9880_s14   ;;  %s27_s16 = sadd.s32 1, %s9876_s13  ;;  %s9880_s14 = sphi %s9911_s14, %s15_s14   ;;  %s9876_s13 = sphi %s9909_s13, %s11528_s13   ;;  %s9872_s12 = sphi %s9907_s12, %s11527_s12   ;;  %s9868_s11 = sphi %s9905_s11, %s11526_s11   ;;  %s9864_s10 = sphi %s9903_s10, %s11525_s10   ;;  %s9860_s9 = sphi %s9901_s9, %s11524_s9  }
   0x5   : > { %p29_p0 = scmp.ge.s32.totalorder %s27_s16, 2  ;;  %s60_s17 = sadd.s32 1, %s9868_s11 }
   0x6   : > { %p67_p1 = scmp.ne.s32.totalorder %s9868_s11, %s9864_s10  ;;  %p68_p2 = scmp.eq.s32.totalorder %s9880_s14, 0 }
   0x7   : > { %s11530_s16 = smov (%p29_p0, %s27_s16), 0  ;;  %p73_p4 = scmp.ne.s32.totalorder %s9864_s10, %s9860_s9 }
   0x8   : > { %p9937_p3 = por %p68_p2, %p67_p1  ;;  %s57_s19 = ssub.s32 %s9876_s13, %s11530_s16 }
   0x9   : > { %p74_p5 = scmp.eq.s32.totalorder %s8444_s15, 0  ;;  %p58_p6 = scmp.eq.s32.totalorder %s57_s19, 0 }
   0xa   : > { %p99_p7 = scmp.eq.s32.totalorder %s8444_s15, 1  ;;  %p9748_p10 = scmp.lt.s32.totalorder %s9880_s14, 2 }
   0xb   : > { %p9944_p8 = por %p74_p5, %p73_p4  ;;  %s135_s23 = sand.u32 1, %s9868_s11  }
   0xc   : > { %s9949_s21 = scalar_select %p58_p6, %s9868_s11, %s60_s17  }
   0xd   : > { %p9951_p9 = por %p99_p7, %p67_p1  ;;  %s9516_s24 = sshll.u32 %s9876_s13, 9 }
   0xe   : > { %s8449_s25 = sshll.u32 %s135_s23, 13  ;;  %s9961_s28 = scalar_lea.hbm %s11516_s1, %s9516_s24 }
   0xf   : > { %s11520_s22 = scalar_select %p9951_p9, 1, 0 }
  0x10   : > { %s139_s29 = scalar_lea.vmem [#allocation2], %s8449_s25  ;;  %p9965_p11 = pnand %p9748_p10, %p9937_p3 }
  0x11   : > { %s146_s30 = sshll.u32 %s139_s29, 4  ;;  %s9972_s4 = scalar_lea.sflag [#allocation3], %s135_s23  ;;  %s9969_s30 = int_to_ptr.vmem [resolvable:$true] %s146_s30 }
  0x12   : > { %s9800_s5 = scalar_lea.hbm %s9961_s28, 131072  ;;  %p9802_p0 = pneg %p9965_p11 }
  0x13   : > { %p9801_p13 = scmp.ne.s32.totalorder %s9961_s28, %s9800_s5  ;;  %s9805_s8 = scalar_lea.hbm %s11516_s1, 262144 }
  0x14   : > { %p9806_p3 = scmp.lt.u32.totalorder %s9961_s28, %s11516_s1  ;;  %p9807_p4 = scmp.lt.u32.totalorder %s9805_s8, %s9800_s5 }
  0x15   : > { %p9803_p1 = pnand %p9802_p0, %p9801_p13  ;;  %p9809_p6 = scmp.lt.u32.totalorder %s9800_s5, %s9961_s28 }
  0x16   : > { %p9808_p5 = por %p9807_p4, %p9806_p3 }
  0x17   : > { %p9804_p2 = pneg %p9803_p1 }
  0x18   : > { %p9810_p7 = por %p9809_p6, %p9808_p5 }
  0x1a   : > { %p9811_p10 = pnand %p9810_p7, %p9804_p2 }
  0x1c   : > { %9814 = shalt.err (!%p9811_p10)
}
  0x1d   : > { %s9815_s17 = scalar_lea.vmem %s9969_s30, 131072  ;;  %s9882_s18 = smov [#allocation2]  }
  0x1e   : > { %p9816_p13 = scmp.ne.s32.totalorder %s9969_s30, %s9815_s17  ;;  %s9820_s19 = sshll.u32 %s9882_s18, 4  ;;  %s9821_s19 = int_to_ptr.vmem [resolvable:$false] %s9820_s19 }
  0x1f   : > { %s9822_s23 = scalar_lea.vmem %s9821_s19, 262144  ;;  %p9823_p9 = scmp.lt.s32.totalorder %s9969_s30, %s9821_s19 }
  0x20   : > { %p9818_p1 = pnand %p9816_p13, %p9802_p0  ;;  %p9824_p3 = scmp.lt.s32.totalorder %s9822_s23, %s9815_s17 }
  0x22   : > { %p9819_p12 = pneg %p9818_p1  ;;  %p9825_p4 = por %p9824_p3, %p9823_p9 }
  0x24   : > { %p9826_p5 = pnand %p9825_p4, %p9819_p12 }
  0x26   : > { %9829 = shalt.err (!%p9826_p5)
}
  0x27   : > { %s9883_s24 = smov 1024   ;;  %s9884_s25 = smov 512  }
  0x28   : > { %s9885_s26 = smov 32   ;;  %p154_p0 = scmp.lt.s32.totalorder %s9880_s14, 3 }
  0x29   : > { %9747 = dma.hbm_to_vmem [thread:$0]  (!%p9965_p11), %s9961_s28, 131072, %s9969_s30, %s9972_s4, %s9883_s24, %s9884_s25, %s9885_s26  }
  0x2a   : > { %p11522_p2 = scmp.ge.s32.totalorder %s9880_s14, 1 }
  0x2c   : > { %p155_p6 = pnand %p11522_p2, %p154_p0 }
  0x2d   : > { %s10004_s27 = sand.u32 (!%p155_p6), 1, %s9864_s10  }
  0x2e   : > { %158 = sbr.rel (%p155_p6) target bundleno = 1314 (0x522), region = 28  ;;  %s8453_s29 = sshll.u32 (!%p155_p6), %s10004_s27, 13 }
  0x2f   : > { %s161_s5 = scalar_lea.sflag (!%p155_p6), [#allocation3], %s10004_s27  ;;  %s10008_s6 = scalar_lea.vmem (!%p155_p6), [#allocation2], %s8453_s29 }
  0x35   : > { %9855 = dma.done.wait (%p9944_p8), %s161_s5, 131072  }
  0x36   : > { %9857 = vsyncadd (%p9944_p8), %s161_s5, 4294836224  ;;  %v232_v0 = vld [vmem:[%s10008_s6] sm:$0xff]  ;;  %v233_v2 = vld [vmem:[%s10008_s6 + $0x8] sm:$0xff]  ;;  %s8454_s18 = sshll.u32 %s10004_s27, 8  ;;  %p11523_p8 = scmp.ne.s32.totalorder %s11520_s22, 0 }
  0x37   : > { %v236_v1 = vld [vmem:[%s10008_s6 + $0x20] sm:$0xff]  ;;  %v237_v4 = vld [vmem:[%s10008_s6 + $0x28] sm:$0xff]  ;;  %s11063_s27 = scalar_lea.vmem [#allocation4], %s8454_s18 }
  0x38   : > { %v8488_v3 = vcombine.high %v232_v0, %v236_v1  ;;  %v8487_v5 = vcombine.low %v232_v0, %v236_v1  ;;  %v240_v6 = vld [vmem:[%s10008_s6 + $0x40] sm:$0xff]  ;;  %v8490_v8 = vcombine.high %v233_v2, %v237_v4  ;;  %v8489_v9 = vcombine.low %v233_v2, %v237_v4  ;;  %v241_v11 = vld [vmem:[%s10008_s6 + $0x48] sm:$0xff] }
  0x39   : > { %v244_v7 = vld [vmem:[%s10008_s6 + $0x60] sm:$0xff]  ;;  %v245_v12 = vld [vmem:[%s10008_s6 + $0x68] sm:$0xff] }
  0x3a   : > { %v8496_v10 = vcombine.high %v240_v6, %v244_v7  ;;  %v248_v13 = vld [vmem:[%s10008_s6 + $0x80] sm:$0xff]  ;;  %6536 = vmatprep.subr.bf16.mxu0 %v8488_v3  ;;  %v8498_v14 = vcombine.high %v241_v11, %v245_v12  ;;  %v249_v16 = vld [vmem:[%s10008_s6 + $0x88] sm:$0xff]  ;;  %6960 = vmatprep.subr.bf16.mxu1 %v8490_v8  ;;  %v8495_v18 = vcombine.low %v240_v6, %v244_v7 }
  0x3b   : > { %v252_v15 = vld [vmem:[%s10008_s6 + $0xa0] sm:$0xff]  ;;  %v253_v17 = vld [vmem:[%s10008_s6 + $0xa8] sm:$0xff]  ;;  %6537 = vmatpush1.bf16.msra.mxu0 %v8487_v5  ;;  %6961 = vmatpush1.bf16.msra.mxu1 %v8489_v9  ;;  %v8497_v19 = vcombine.low %v241_v11, %v245_v12 }
  0x3c   : > { %6538 = vmatprep.subr.bf16.mxu0 %v8496_v10  ;;  %v8504_v20 = vcombine.high %v248_v13, %v252_v15  ;;  %6962 = vmatprep.subr.bf16.mxu1 %v8498_v14  ;;  %v8506_v21 = vcombine.high %v249_v16, %v253_v17  ;;  %v256_v22 = vld [vmem:[%s10008_s6 + $0xc0] sm:$0xff]  ;;  %v257_v24 = vld [vmem:[%s10008_s6 + $0xc8] sm:$0xff]  ;;  %v8503_v26 = vcombine.low %v248_v13, %v252_v15 }
  0x3d   : > { %v260_v23 = vld [vmem:[%s10008_s6 + $0xe0] sm:$0xff]  ;;  %v261_v25 = vld [vmem:[%s10008_s6 + $0xe8] sm:$0xff]  ;;  %v8505_v27 = vcombine.low %v249_v16, %v253_v17 }
  0x3e   : > { %v8512_v28 = vcombine.high %v256_v22, %v260_v23  ;;  %v8514_v29 = vcombine.high %v257_v24, %v261_v25  ;;  %v264_v30 = vld [vmem:[%s10008_s6 + $0x100] sm:$0xff]  ;;  %v265_v32 = vld [vmem:[%s10008_s6 + $0x108] sm:$0xff]  ;;  %v8511_v34 = vcombine.low %v256_v22, %v260_v23  ;;  %v8513_v35 = vcombine.low %v257_v24, %v261_v25 }
  0x3f   : > { %6539 = vmatpush1.bf16.msra.mxu0 %v8495_v18  ;;  %6963 = vmatpush1.bf16.msra.mxu1 %v8497_v19  ;;  %v268_v31 = vld [vmem:[%s10008_s6 + $0x120] sm:$0xff]  ;;  %v269_v33 = vld [vmem:[%s10008_s6 + $0x128] sm:$0xff] }
  0x40   : > { %6540 = vmatprep.subr.bf16.mxu0 %v8504_v20  ;;  %6964 = vmatprep.subr.bf16.mxu1 %v8506_v21  ;;  %v8520_v36 = vcombine.high %v264_v30, %v268_v31  ;;  %v8522_v37 = vcombine.high %v265_v32, %v269_v33  ;;  %v272_v38 = vld [vmem:[%s10008_s6 + $0x140] sm:$0xff]  ;;  %v273_v40 = vld [vmem:[%s10008_s6 + $0x148] sm:$0xff]  ;;  %v8519_v42 = vcombine.low %v264_v30, %v268_v31 }
  0x41   : > { %v276_v39 = vld [vmem:[%s10008_s6 + $0x160] sm:$0xff]  ;;  %v277_v41 = vld [vmem:[%s10008_s6 + $0x168] sm:$0xff]  ;;  %v8521_v43 = vcombine.low %v265_v32, %v269_v33 }
  0x42   : > { %v8528_v44 = vcombine.high %v272_v38, %v276_v39  ;;  %v8530_v45 = vcombine.high %v273_v40, %v277_v41  ;;  %v280_v46 = vld [vmem:[%s10008_s6 + $0x180] sm:$0xff]  ;;  %v281_v48 = vld [vmem:[%s10008_s6 + $0x188] sm:$0xff]  ;;  %v8527_v50 = vcombine.low %v272_v38, %v276_v39  ;;  %v8529_v51 = vcombine.low %v273_v40, %v277_v41 }
  0x43   : > { %6541 = vmatpush1.bf16.msra.mxu0 %v8503_v26  ;;  %6965 = vmatpush1.bf16.msra.mxu1 %v8505_v27  ;;  %v284_v47 = vld [vmem:[%s10008_s6 + $0x1a0] sm:$0xff]  ;;  %v285_v49 = vld [vmem:[%s10008_s6 + $0x1a8] sm:$0xff] }
  0x44   : > { %6542 = vmatprep.subr.bf16.mxu0 %v8512_v28  ;;  %6966 = vmatprep.subr.bf16.mxu1 %v8514_v29  ;;  %v8536_v52 = vcombine.high %v280_v46, %v284_v47  ;;  %v10045_v53 = vld [vmem:[%s11515_s0] sm:$0xff]  ;;  %v8538_v55 = vcombine.high %v281_v48, %v285_v49  ;;  %v289_v59 = vld [vmem:[%s10008_s6 + $0x1c8] sm:$0xff]  ;;  %v8535_v61 = vcombine.low %v280_v46, %v284_v47 }
  0x45   : > { %v10050_v54 = vld [vmem:[%s11515_s0 + $0x40] sm:$0xff]  ;;  %v293_v60 = vld [vmem:[%s10008_s6 + $0x1e8] sm:$0xff]  ;;  %v8537_v62 = vcombine.low %v281_v48, %v285_v49 }
  0x46   : > { %v288_v56 = vld [vmem:[%s10008_s6 + $0x1c0] sm:$0xff]  ;;  %v10056_v58 = vcombine.high %v10045_v53, %v10050_v54  ;;  %v8546_v0 = vcombine.high %v289_v59, %v293_v60  ;;  %v297_v3 = vld [vmem:[%s10008_s6 + $0x208] sm:$0xff]  ;;  %v8545_v6 = vcombine.low %v289_v59, %v293_v60 }
  0x47   : > { %6543 = vmatpush1.bf16.msra.mxu0 %v8511_v34  ;;  %6967 = vmatpush1.bf16.msra.mxu1 %v8513_v35  ;;  %v292_v57 = vld [vmem:[%s10008_s6 + $0x1e0] sm:$0xff]  ;;  %v301_v4 = vld [vmem:[%s10008_s6 + $0x228] sm:$0xff] }
  0x48   : > { %6544 = vmatprep.subr.bf16.mxu0 %v8520_v36  ;;  %6968 = vmatprep.subr.bf16.mxu1 %v8522_v37  ;;  %v8544_v63 = vcombine.high %v288_v56, %v292_v57  ;;  %v296_v1 = vld [vmem:[%s10008_s6 + $0x200] sm:$0xff]  ;;  %v8543_v5 = vcombine.low %v288_v56, %v292_v57  ;;  %v8554_v8 = vcombine.high %v297_v3, %v301_v4  ;;  %v305_v11 = vld [vmem:[%s10008_s6 + $0x248] sm:$0xff] }
  0x49   : > { %6568 = vmatprep.mubr.bf16.mxu0 %v10056_v58  ;;  %v300_v2 = vld [vmem:[%s10008_s6 + $0x220] sm:$0xff]  ;;  %6992 = vmatprep.mubr.bf16.mxu1 %v10056_v58  ;;  %v309_v12 = vld [vmem:[%s10008_s6 + $0x268] sm:$0xff]  ;;  %v8553_v14 = vcombine.low %v297_v3, %v301_v4 }
  0x4a   : > { %v8552_v7 = vcombine.high %v296_v1, %v300_v2  ;;  %v304_v9 = vld [vmem:[%s10008_s6 + $0x240] sm:$0xff]  ;;  %v8551_v13 = vcombine.low %v296_v1, %v300_v2  ;;  %v8562_v16 = vcombine.high %v305_v11, %v309_v12  ;;  %v313_v19 = vld [vmem:[%s10008_s6 + $0x288] sm:$0xff]  ;;  %v8561_v22 = vcombine.low %v305_v11, %v309_v12 }
  0x4b   : > { %6545 = vmatpush1.bf16.msra.mxu0 %v8519_v42  ;;  %6969 = vmatpush1.bf16.msra.mxu1 %v8521_v43  ;;  %v308_v10 = vld [vmem:[%s10008_s6 + $0x260] sm:$0xff]  ;;  %v317_v20 = vld [vmem:[%s10008_s6 + $0x2a8] sm:$0xff] }
  0x4c   : > { %6546 = vmatprep.subr.bf16.mxu0 %v8528_v44  ;;  %6970 = vmatprep.subr.bf16.mxu1 %v8530_v45  ;;  %v8560_v15 = vcombine.high %v304_v9, %v308_v10  ;;  %v312_v17 = vld [vmem:[%s10008_s6 + $0x280] sm:$0xff]  ;;  %v8559_v21 = vcombine.low %v304_v9, %v308_v10  ;;  %v8570_v24 = vcombine.high %v313_v19, %v317_v20  ;;  %v321_v27 = vld [vmem:[%s10008_s6 + $0x2c8] sm:$0xff] }
  0x4d   : > { %v316_v18 = vld [vmem:[%s10008_s6 + $0x2a0] sm:$0xff]  ;;  %v325_v28 = vld [vmem:[%s10008_s6 + $0x2e8] sm:$0xff]  ;;  %v8569_v30 = vcombine.low %v313_v19, %v317_v20 }
  0x4e   : > { %v8568_v23 = vcombine.high %v312_v17, %v316_v18  ;;  %v320_v25 = vld [vmem:[%s10008_s6 + $0x2c0] sm:$0xff]  ;;  %v8567_v29 = vcombine.low %v312_v17, %v316_v18  ;;  %v8578_v32 = vcombine.high %v321_v27, %v325_v28  ;;  %v329_v35 = vld [vmem:[%s10008_s6 + $0x308] sm:$0xff]  ;;  %v8577_v38 = vcombine.low %v321_v27, %v325_v28 }
  0x4f   : > { %6547 = vmatpush1.bf16.msra.mxu0 %v8527_v50  ;;  %6971 = vmatpush1.bf16.msra.mxu1 %v8529_v51  ;;  %v324_v26 = vld [vmem:[%s10008_s6 + $0x2e0] sm:$0xff]  ;;  %v333_v36 = vld [vmem:[%s10008_s6 + $0x328] sm:$0xff] }
  0x50   : > { %6548 = vmatprep.subr.bf16.mxu0 %v8536_v52  ;;  %6972 = vmatprep.subr.bf16.mxu1 %v8538_v55  ;;  %v8576_v31 = vcombine.high %v320_v25, %v324_v26  ;;  %v328_v33 = vld [vmem:[%s10008_s6 + $0x300] sm:$0xff]  ;;  %v8575_v37 = vcombine.low %v320_v25, %v324_v26  ;;  %v8586_v40 = vcombine.high %v329_v35, %v333_v36  ;;  %v337_v43 = vld [vmem:[%s10008_s6 + $0x348] sm:$0xff] }
  0x51   : > { %v332_v34 = vld [vmem:[%s10008_s6 + $0x320] sm:$0xff]  ;;  %v341_v44 = vld [vmem:[%s10008_s6 + $0x368] sm:$0xff]  ;;  %v8585_v46 = vcombine.low %v329_v35, %v333_v36 }
  0x52   : > { %v8584_v39 = vcombine.high %v328_v33, %v332_v34  ;;  %v336_v41 = vld [vmem:[%s10008_s6 + $0x340] sm:$0xff]  ;;  %v8583_v45 = vcombine.low %v328_v33, %v332_v34  ;;  %v8594_v48 = vcombine.high %v337_v43, %v341_v44  ;;  %v345_v51 = vld [vmem:[%s10008_s6 + $0x388] sm:$0xff]  ;;  %v8593_v56 = vcombine.low %v337_v43, %v341_v44 }
  0x53   : > { %6549 = vmatpush1.bf16.msra.mxu0 %v8535_v61  ;;  %6973 = vmatpush1.bf16.msra.mxu1 %v8537_v62  ;;  %v340_v42 = vld [vmem:[%s10008_s6 + $0x360] sm:$0xff]  ;;  %v349_v52 = vld [vmem:[%s10008_s6 + $0x3a8] sm:$0xff] }
  0x54   : > { %6550 = vmatprep.subr.bf16.mxu0 %v8544_v63  ;;  %6974 = vmatprep.subr.bf16.mxu1 %v8546_v0  ;;  %v8592_v47 = vcombine.high %v336_v41, %v340_v42  ;;  %v344_v49 = vld [vmem:[%s10008_s6 + $0x380] sm:$0xff]  ;;  %v8591_v55 = vcombine.low %v336_v41, %v340_v42  ;;  %v8602_v59 = vcombine.high %v345_v51, %v349_v52  ;;  %v353_v62 = vld [vmem:[%s10008_s6 + $0x3c8] sm:$0xff] }
  0x55   : > { %v348_v50 = vld [vmem:[%s10008_s6 + $0x3a0] sm:$0xff]  ;;  %v357_v63 = vld [vmem:[%s10008_s6 + $0x3e8] sm:$0xff]  ;;  %v8601_v1 = vcombine.low %v345_v51, %v349_v52 }
  0x56   : > { %v8600_v57 = vcombine.high %v344_v49, %v348_v50  ;;  %v352_v60 = vld [vmem:[%s10008_s6 + $0x3c0] sm:$0xff]  ;;  %v8599_v0 = vcombine.low %v344_v49, %v348_v50  ;;  %v8610_v3 = vcombine.high %v353_v62, %v357_v63  ;;  %v8609_v9 = vcombine.low %v353_v62, %v357_v63  ;;  %v381_v25 = vld [vmem:[%s10008_s6 + $0x4a8] sm:$0xff] }
  0x57   : > { %6551 = vmatpush1.bf16.msra.mxu0 %v8543_v5  ;;  %6975 = vmatpush1.bf16.msra.mxu1 %v8545_v6  ;;  %v356_v61 = vld [vmem:[%s10008_s6 + $0x3e0] sm:$0xff]  ;;  %v361_v6 = vld [vmem:[%s10008_s6 + $0x408] sm:$0xff] }
  0x58   : > { %6552 = vmatprep.subr.bf16.mxu0 %v8552_v7  ;;  %6976 = vmatprep.subr.bf16.mxu1 %v8554_v8  ;;  %v8608_v2 = vcombine.high %v352_v60, %v356_v61  ;;  %v360_v4 = vld [vmem:[%s10008_s6 + $0x400] sm:$0xff]  ;;  %v365_v7 = vld [vmem:[%s10008_s6 + $0x428] sm:$0xff]  ;;  %v8607_v8 = vcombine.low %v352_v60, %v356_v61 }
  0x59   : > { %v364_v5 = vld [vmem:[%s10008_s6 + $0x420] sm:$0xff]  ;;  %v8618_v11 = vcombine.high %v361_v6, %v365_v7  ;;  %v8617_v20 = vcombine.low %v361_v6, %v365_v7  ;;  %v389_v33 = vld [vmem:[%s10008_s6 + $0x4e8] sm:$0xff] }
  0x5a   : > { %v8616_v10 = vcombine.high %v360_v4, %v364_v5  ;;  %v368_v12 = vld [vmem:[%s10008_s6 + $0x440] sm:$0xff]  ;;  %v8615_v19 = vcombine.low %v360_v4, %v364_v5  ;;  %v10131_v35 = vld [vmem:[%s11515_s0 + $0x8] sm:$0xff] }
  0x5b   : > { %6553 = vmatpush1.bf16.msra.mxu0 %v8551_v13  ;;  %6977 = vmatpush1.bf16.msra.mxu1 %v8553_v14  ;;  %v372_v13 = vld [vmem:[%s10008_s6 + $0x460] sm:$0xff]  ;;  %v369_v14 = vld [vmem:[%s10008_s6 + $0x448] sm:$0xff] }
  0x5c   : > { %6554 = vmatprep.subr.bf16.mxu0 %v8560_v15  ;;  %6978 = vmatprep.subr.bf16.mxu1 %v8562_v16  ;;  %v10103_v15 = vcombine.low %v10045_v53, %v10050_v54  ;;  %v373_v16 = vld [vmem:[%s10008_s6 + $0x468] sm:$0xff]  ;;  %v216_v17 = vld [vmem:[%s11515_s0 + $0x80] sm:$0xff]  ;;  %v8623_v26 = vcombine.low %v368_v12, %v372_v13 }
  0x5d   : > { %v224_v18 = vld [vmem:[%s11515_s0 + $0xc0] sm:$0xff]  ;;  %v8626_v53 = vcombine.high %v369_v14, %v373_v16  ;;  %v8625_v27 = vcombine.low %v369_v14, %v373_v16  ;;  %v10136_v36 = vld [vmem:[%s11515_s0 + $0x48] sm:$0xff] }
  0x5e   : > { %v376_v54 = vld [vmem:[%s10008_s6 + $0x480] sm:$0xff]  ;;  %v10126_v34 = vcombine.low %v216_v17, %v224_v18  ;;  %v10142_v43 = vcombine.high %v10131_v35, %v10136_v36  ;;  %v393_v44 = vld [vmem:[%s10008_s6 + $0x508] sm:$0xff] }
  0x5f   : > { %6555 = vmatpush1.bf16.msra.mxu0 %v8559_v21  ;;  %6979 = vmatpush1.bf16.msra.mxu1 %v8561_v22  ;;  %v8624_v21 = vcombine.high %v368_v12, %v372_v13  ;;  %v380_v22 = vld [vmem:[%s10008_s6 + $0x4a0] sm:$0xff]  ;;  %v401_v52 = vld [vmem:[%s10008_s6 + $0x548] sm:$0xff] }
  0x60   : > { %6556 = vmatprep.subr.bf16.mxu0 %v8568_v23  ;;  %6980 = vmatprep.subr.bf16.mxu1 %v8570_v24  ;;  %v10114_v23 = vcombine.high %v216_v17, %v224_v18  ;;  %v377_v24 = vld [vmem:[%s10008_s6 + $0x488] sm:$0xff]  ;;  %v8632_v28 = vcombine.high %v376_v54, %v380_v22  ;;  %v392_v41 = vld [vmem:[%s10008_s6 + $0x500] sm:$0xff] }
  0x61   : > { %v396_v42 = vld [vmem:[%s10008_s6 + $0x520] sm:$0xff]  ;;  %v409_v63 = vld [vmem:[%s10008_s6 + $0x588] sm:$0xff] }
  0x62   : > { %v400_v50 = vld [vmem:[%s10008_s6 + $0x540] sm:$0xff]  ;;  %v417_v7 = vld [vmem:[%s10008_s6 + $0x5c8] sm:$0xff] }
  0x63   : > { %6557 = vmatpush1.bf16.msra.mxu0 %v8567_v29  ;;  %6981 = vmatpush1.bf16.msra.mxu1 %v8569_v30  ;;  %v8634_v29 = vcombine.high %v377_v24, %v381_v25  ;;  %v384_v30 = vld [vmem:[%s10008_s6 + $0x4c0] sm:$0xff]  ;;  %v425_v16 = vld [vmem:[%s10008_s6 + $0x608] sm:$0xff] }
  0x64   : > { %6558 = vmatprep.subr.bf16.mxu0 %v8576_v31  ;;  %6982 = vmatprep.subr.bf16.mxu1 %v8578_v32  ;;  %v388_v31 = vld [vmem:[%s10008_s6 + $0x4e0] sm:$0xff]  ;;  %v385_v32 = vld [vmem:[%s10008_s6 + $0x4c8] sm:$0xff] }
  0x65   : > { %v404_v51 = vld [vmem:[%s10008_s6 + $0x560] sm:$0xff]  ;;  %v429_v17 = vld [vmem:[%s10008_s6 + $0x628] sm:$0xff] }
  0x66   : > { %v408_v61 = vld [vmem:[%s10008_s6 + $0x580] sm:$0xff] }
  0x67   : > { %6559 = vmatpush1.bf16.msra.mxu0 %v8575_v37  ;;  %6983 = vmatpush1.bf16.msra.mxu1 %v8577_v38  ;;  %v8631_v37 = vcombine.low %v376_v54, %v380_v22  ;;  %v8633_v38 = vcombine.low %v377_v24, %v381_v25  ;;  %v412_v62 = vld [vmem:[%s10008_s6 + $0x5a0] sm:$0xff]  ;;  %v433_v22 = vld [vmem:[%s10008_s6 + $0x648] sm:$0xff] }
  0x68   : > { %6560 = vmatprep.subr.bf16.mxu0 %v8584_v39  ;;  %6984 = vmatprep.subr.bf16.mxu1 %v8586_v40  ;;  %v8640_v39 = vcombine.high %v384_v30, %v388_v31  ;;  %v8642_v40 = vcombine.high %v385_v32, %v389_v33  ;;  %v416_v5 = vld [vmem:[%s10008_s6 + $0x5c0] sm:$0xff]  ;;  %v437_v24 = vld [vmem:[%s10008_s6 + $0x668] sm:$0xff] }
  0x69   : > { %v420_v6 = vld [vmem:[%s10008_s6 + $0x5e0] sm:$0xff] }
  0x6a   : > { %v424_v13 = vld [vmem:[%s10008_s6 + $0x600] sm:$0xff]  ;;  %v8671_v18 = vcombine.low %v416_v5, %v420_v6 }
  0x6b   : > { %6561 = vmatpush1.bf16.msra.mxu0 %v8583_v45  ;;  %6985 = vmatpush1.bf16.msra.mxu1 %v8585_v46  ;;  %v397_v45 = vld [vmem:[%s10008_s6 + $0x528] sm:$0xff]  ;;  %v8639_v46 = vcombine.low %v384_v30, %v388_v31  ;;  %v428_v14 = vld [vmem:[%s10008_s6 + $0x620] sm:$0xff] }
  0x6c   : > { %6562 = vmatprep.subr.bf16.mxu0 %v8592_v47  ;;  %6986 = vmatprep.subr.bf16.mxu1 %v8594_v48  ;;  %v8641_v47 = vcombine.low %v385_v32, %v389_v33  ;;  %v8648_v48 = vcombine.high %v392_v41, %v396_v42  ;;  %v8650_v49 = vcombine.high %v393_v44, %v397_v45  ;;  %v436_v54 = vld [vmem:[%s10008_s6 + $0x660] sm:$0xff]  ;;  %v441_v31 = vld [vmem:[%s10008_s6 + $0x688] sm:$0xff] }
  0x6d   : > { %v8679_v25 = vcombine.low %v424_v13, %v428_v14  ;;  %v444_v30 = vld [vmem:[%s10008_s6 + $0x6a0] sm:$0xff]  ;;  %v445_v32 = vld [vmem:[%s10008_s6 + $0x6a8] sm:$0xff] }
  0x6f   : > { %6563 = vmatpush1.bf16.msra.mxu0 %v8591_v55  ;;  %6987 = vmatpush1.bf16.msra.mxu1 %v8593_v56  ;;  %v405_v55 = vld [vmem:[%s10008_s6 + $0x568] sm:$0xff]  ;;  %v8647_v56 = vcombine.low %v392_v41, %v396_v42  ;;  %v452_v41 = vld [vmem:[%s10008_s6 + $0x6e0] sm:$0xff] }
  0x70   : > { %6564 = vmatprep.subr.bf16.mxu0 %v8600_v57  ;;  %6988 = vmatprep.subr.bf16.mxu1 %v8602_v59  ;;  %v8649_v57 = vcombine.low %v393_v44, %v397_v45  ;;  %v8656_v59 = vcombine.high %v400_v50, %v404_v51  ;;  %v8658_v60 = vcombine.high %v401_v52, %v405_v55  ;;  %v449_v42 = vld [vmem:[%s10008_s6 + $0x6c8] sm:$0xff] }
  0x71   : > { %v453_v44 = vld [vmem:[%s10008_s6 + $0x6e8] sm:$0xff] }
  0x73   : > { %6565 = vmatpush1.bf16.msra.mxu0 %v8599_v0  ;;  %6989 = vmatpush1.bf16.msra.mxu1 %v8601_v1  ;;  %v413_v0 = vld [vmem:[%s10008_s6 + $0x5a8] sm:$0xff]  ;;  %v8655_v1 = vcombine.low %v400_v50, %v404_v51  ;;  %v460_v50 = vld [vmem:[%s10008_s6 + $0x720] sm:$0xff] }
  0x74   : > { %6566 = vmatprep.subr.bf16.mxu0 %v8608_v2  ;;  %6990 = vmatprep.subr.bf16.mxu1 %v8610_v3  ;;  %v8657_v2 = vcombine.low %v401_v52, %v405_v55  ;;  %v8664_v3 = vcombine.high %v408_v61, %v412_v62  ;;  %v8666_v4 = vcombine.high %v409_v63, %v413_v0  ;;  %v457_v51 = vld [vmem:[%s10008_s6 + $0x708] sm:$0xff] }
  0x75   : > { %v461_v52 = vld [vmem:[%s10008_s6 + $0x728] sm:$0xff] }
  0x77   : > { %6567 = vmatpush1.bf16.msra.mxu0 %v8607_v8  ;;  %6991 = vmatpush1.bf16.msra.mxu1 %v8609_v9  ;;  %v421_v8 = vld [vmem:[%s10008_s6 + $0x5e8] sm:$0xff]  ;;  %v8663_v9 = vcombine.low %v408_v61, %v412_v62  ;;  %v468_v61 = vld [vmem:[%s10008_s6 + $0x760] sm:$0xff] }
  0x78   : > { %6589 = vmatprep.subr.bf16.mxu0 %v8616_v10  ;;  %7013 = vmatprep.subr.bf16.mxu1 %v8618_v11  ;;  %v8665_v10 = vcombine.low %v409_v63, %v413_v0  ;;  %v8672_v11 = vcombine.high %v416_v5, %v420_v6  ;;  %v8674_v12 = vcombine.high %v417_v7, %v421_v8  ;;  %v465_v62 = vld [vmem:[%s10008_s6 + $0x748] sm:$0xff]  ;;  %v476_v5 = vld [vmem:[%s10008_s6 + $0x7a0] sm:$0xff] }
  0x79   : > { %v469_v63 = vld [vmem:[%s10008_s6 + $0x768] sm:$0xff] }
  0x7a   : > { %6569 = vmatmul.mubr.bf16.vlgmr.msra.gmra.mrb[0].mxu0 %v10103_v15  ;;  %6993 = vmatmul.mubr.bf16.vlgmr.msra.gmra.mrb[0].mxu1 %v10103_v15  ;;  %v473_v6 = vld [vmem:[%s10008_s6 + $0x788] sm:$0xff] }
  0x7b   : > { %6590 = vmatpush1.bf16.msra.mxu0 %v8615_v19  ;;  %7014 = vmatpush1.bf16.msra.mxu1 %v8617_v20  ;;  %v8673_v19 = vcombine.low %v417_v7, %v421_v8  ;;  %v8680_v20 = vcombine.high %v424_v13, %v428_v14  ;;  %v477_v7 = vld [vmem:[%s10008_s6 + $0x7a8] sm:$0xff]  ;;  %v484_v13 = vld [vmem:[%s10008_s6 + $0x7e0] sm:$0xff] }
  0x7c   : > { %6591 = vmatprep.subr.bf16.mxu0 %v8624_v21  ;;  %7015 = vmatprep.subr.bf16.mxu1 %v8626_v53  ;;  %v8682_v21 = vcombine.high %v425_v16, %v429_v17  ;;  %v432_v53 = vld [vmem:[%s10008_s6 + $0x640] sm:$0xff]  ;;  %v481_v14 = vld [vmem:[%s10008_s6 + $0x7c8] sm:$0xff] }
  0x7d   : > { %6578 = vmatprep.mubr.bf16.mxu0 %v10114_v23  ;;  %7002 = vmatprep.mubr.bf16.mxu1 %v10114_v23  ;;  %v8687_v33 = vcombine.low %v432_v53, %v436_v54 }
  0x7f   : > { %6592 = vmatpush1.bf16.msra.mxu0 %v8623_v26  ;;  %7016 = vmatpush1.bf16.msra.mxu1 %v8625_v27  ;;  %v8681_v26 = vcombine.low %v425_v16, %v429_v17  ;;  %v8688_v27 = vcombine.high %v432_v53, %v436_v54  ;;  %v485_v16 = vld [vmem:[%s10008_s6 + $0x7e8] sm:$0xff]  ;;  %v492_v53 = vld [vmem:[%s10008_s6 + $0x820] sm:$0xff] }
  0x80   : > { %6593 = vmatprep.subr.bf16.mxu0 %v8632_v28  ;;  %7017 = vmatprep.subr.bf16.mxu1 %v8634_v29  ;;  %v8690_v28 = vcombine.high %v433_v22, %v437_v24  ;;  %v440_v29 = vld [vmem:[%s10008_s6 + $0x680] sm:$0xff]  ;;  %v489_v54 = vld [vmem:[%s10008_s6 + $0x808] sm:$0xff] }
  0x81   : > { %v8695_v45 = vcombine.low %v440_v29, %v444_v30 }
  0x82   : > { %6579 = vmatmul.mubr.bf16.gmra.mrb[4].mxu0 %v10126_v34  ;;  %7003 = vmatmul.mubr.bf16.gmra.mrb[4].mxu1 %v10126_v34 }
  0x83   : > { %6594 = vmatpush1.bf16.msra.mxu0 %v8631_v37  ;;  %7018 = vmatpush1.bf16.msra.mxu1 %v8633_v38  ;;  %v8689_v37 = vcombine.low %v433_v22, %v437_v24  ;;  %v8696_v38 = vcombine.high %v440_v29, %v444_v30  ;;  %v493_v22 = vld [vmem:[%s10008_s6 + $0x828] sm:$0xff]  ;;  %v500_v29 = vld [vmem:[%s10008_s6 + $0x860] sm:$0xff] }
  0x84   : > { %6595 = vmatprep.subr.bf16.mxu0 %v8640_v39  ;;  %7019 = vmatprep.subr.bf16.mxu1 %v8642_v40  ;;  %v8698_v39 = vcombine.high %v441_v31, %v445_v32  ;;  %v448_v40 = vld [vmem:[%s10008_s6 + $0x6c0] sm:$0xff]  ;;  %v497_v30 = vld [vmem:[%s10008_s6 + $0x848] sm:$0xff] }
  0x85   : > { %6621 = vmatprep.mubr.bf16.mxu0 %v10142_v43  ;;  %7045 = vmatprep.mubr.bf16.mxu1 %v10142_v43  ;;  %v8703_v55 = vcombine.low %v448_v40, %v452_v41 }
  0x87   : > { %6596 = vmatpush1.bf16.msra.mxu0 %v8639_v46  ;;  %7020 = vmatpush1.bf16.msra.mxu1 %v8641_v47  ;;  %v8697_v46 = vcombine.low %v441_v31, %v445_v32  ;;  %v8704_v47 = vcombine.high %v448_v40, %v452_v41  ;;  %v10203_v31 = vcombine.low %v10131_v35, %v10136_v36  ;;  %v501_v32 = vld [vmem:[%s10008_s6 + $0x868] sm:$0xff]  ;;  %v504_v36 = vld [vmem:[%s10008_s6 + $0x880] sm:$0xff] }
  0x88   : > { %6597 = vmatprep.subr.bf16.mxu0 %v8648_v48  ;;  %7021 = vmatprep.subr.bf16.mxu1 %v8650_v49  ;;  %v8706_v48 = vcombine.high %v449_v42, %v453_v44  ;;  %v456_v49 = vld [vmem:[%s10008_s6 + $0x700] sm:$0xff]  ;;  %v8754_v35 = vcombine.high %v497_v30, %v501_v32 }
  0x89   : > { %v8711_v0 = vcombine.low %v456_v49, %v460_v50  ;;  %v508_v41 = vld [vmem:[%s10008_s6 + $0x8a0] sm:$0xff] }
  0x8b   : > { %6598 = vmatpush1.bf16.msra.mxu0 %v8647_v56  ;;  %7022 = vmatpush1.bf16.msra.mxu1 %v8649_v57  ;;  %v8705_v56 = vcombine.low %v449_v42, %v453_v44  ;;  %v8712_v57 = vcombine.high %v456_v49, %v460_v50  ;;  %v505_v44 = vld [vmem:[%s10008_s6 + $0x888] sm:$0xff]  ;;  %v512_v50 = vld [vmem:[%s10008_s6 + $0x8c0] sm:$0xff] }
  0x8c   : > { %6599 = vmatprep.subr.bf16.mxu0 %v8656_v59  ;;  %7023 = vmatprep.subr.bf16.mxu1 %v8658_v60  ;;  %v8714_v59 = vcombine.high %v457_v51, %v461_v52  ;;  %v464_v60 = vld [vmem:[%s10008_s6 + $0x740] sm:$0xff] }
  0x8d   : > { %v8719_v8 = vcombine.low %v464_v60, %v468_v61 }
  0x8f   : > { %6600 = vmatpush1.bf16.msra.mxu0 %v8655_v1  ;;  %7024 = vmatpush1.bf16.msra.mxu1 %v8657_v2  ;;  %v8713_v1 = vcombine.low %v457_v51, %v461_v52  ;;  %v8720_v2 = vcombine.high %v464_v60, %v468_v61  ;;  %v516_v51 = vld [vmem:[%s10008_s6 + $0x8e0] sm:$0xff]  ;;  %v513_v52 = vld [vmem:[%s10008_s6 + $0x8c8] sm:$0xff]  ;;  %v8759_v60 = vcombine.low %v504_v36, %v508_v41 }
  0x90   : > { %6601 = vmatprep.subr.bf16.mxu0 %v8664_v3  ;;  %7025 = vmatprep.subr.bf16.mxu1 %v8666_v4  ;;  %v8722_v3 = vcombine.high %v465_v62, %v469_v63  ;;  %v472_v4 = vld [vmem:[%s10008_s6 + $0x780] sm:$0xff] }
  0x91   : > { %v8727_v17 = vcombine.low %v472_v4, %v476_v5 }
  0x93   : > { %6602 = vmatpush1.bf16.msra.mxu0 %v8663_v9  ;;  %7026 = vmatpush1.bf16.msra.mxu1 %v8665_v10  ;;  %v8721_v9 = vcombine.low %v465_v62, %v469_v63  ;;  %v8728_v10 = vcombine.high %v472_v4, %v476_v5  ;;  %v8768_v62 = vcombine.high %v512_v50, %v516_v51  ;;  %v525_v4 = vld [vmem:[%s10008_s6 + $0x928] sm:$0xff] }
  0x94   : > { %6603 = vmatprep.subr.bf16.mxu0 %v8672_v11  ;;  %7027 = vmatprep.subr.bf16.mxu1 %v8674_v12  ;;  %v8730_v11 = vcombine.high %v473_v6, %v477_v7  ;;  %v480_v12 = vld [vmem:[%s10008_s6 + $0x7c0] sm:$0xff]  ;;  %v8767_v5 = vcombine.low %v512_v50, %v516_v51 }
  0x95   : > { %v8735_v24 = vcombine.low %v480_v12, %v484_v13 }
  0x97   : > { %6604 = vmatpush1.bf16.msra.mxu0 %v8671_v18  ;;  %7028 = vmatpush1.bf16.msra.mxu1 %v8673_v19  ;;  %v8729_v18 = vcombine.low %v473_v6, %v477_v7  ;;  %v8736_v19 = vcombine.high %v480_v12, %v484_v13  ;;  %v533_v12 = vld [vmem:[%s10008_s6 + $0x968] sm:$0xff] }
  0x98   : > { %6605 = vmatprep.subr.bf16.mxu0 %v8680_v20  ;;  %7029 = vmatprep.subr.bf16.mxu1 %v8682_v21  ;;  %v8738_v20 = vcombine.high %v481_v14, %v485_v16  ;;  %v488_v21 = vld [vmem:[%s10008_s6 + $0x800] sm:$0xff] }
  0x9b   : > { %6606 = vmatpush1.bf16.msra.mxu0 %v8679_v25  ;;  %7030 = vmatpush1.bf16.msra.mxu1 %v8681_v26  ;;  %v8737_v25 = vcombine.low %v481_v14, %v485_v16  ;;  %v8744_v26 = vcombine.high %v488_v21, %v492_v53 }
  0x9c   : > { %6607 = vmatprep.subr.bf16.mxu0 %v8688_v27  ;;  %7031 = vmatprep.subr.bf16.mxu1 %v8690_v28  ;;  %v8746_v27 = vcombine.high %v489_v54, %v493_v22  ;;  %v496_v28 = vld [vmem:[%s10008_s6 + $0x840] sm:$0xff] }
  0x9d   : > { %v8752_v40 = vcombine.high %v496_v28, %v500_v29 }
  0x9f   : > { %6608 = vmatpush1.bf16.msra.mxu0 %v8687_v33  ;;  %7032 = vmatpush1.bf16.msra.mxu1 %v8689_v37  ;;  %v217_v33 = vld [vmem:[%s11515_s0 + $0x88] sm:$0xff] }
  0xa0   : > { %6609 = vmatprep.subr.bf16.mxu0 %v8696_v38  ;;  %7033 = vmatprep.subr.bf16.mxu1 %v8698_v39  ;;  %v225_v37 = vld [vmem:[%s11515_s0 + $0xc8] sm:$0xff]  ;;  %v8743_v38 = vcombine.low %v488_v21, %v492_v53  ;;  %v8745_v39 = vcombine.low %v489_v54, %v493_v22 }
  0xa1   : > { %v10214_v42 = vcombine.high %v217_v33, %v225_v37  ;;  %v541_v21 = vld [vmem:[%s10008_s6 + $0x9a8] sm:$0xff] }
  0xa3   : > { %6610 = vmatpush1.bf16.msra.mxu0 %v8695_v45  ;;  %7034 = vmatpush1.bf16.msra.mxu1 %v8697_v46  ;;  %v509_v45 = vld [vmem:[%s10008_s6 + $0x8a8] sm:$0xff]  ;;  %v8751_v46 = vcombine.low %v496_v28, %v500_v29 }
  0xa4   : > { %6611 = vmatprep.subr.bf16.mxu0 %v8704_v47  ;;  %7035 = vmatprep.subr.bf16.mxu1 %v8706_v48  ;;  %v8753_v47 = vcombine.low %v497_v30, %v501_v32  ;;  %v8760_v48 = vcombine.high %v504_v36, %v508_v41  ;;  %v8762_v49 = vcombine.high %v505_v44, %v509_v45  ;;  %v549_v28 = vld [vmem:[%s10008_s6 + $0x9e8] sm:$0xff] }
  0xa5   : > { %v8761_v61 = vcombine.low %v505_v44, %v509_v45  ;;  %v560_v45 = vld [vmem:[%s10008_s6 + $0xa40] sm:$0xff] }
  0xa7   : > { %6612 = vmatpush1.bf16.msra.mxu0 %v8703_v55  ;;  %7036 = vmatpush1.bf16.msra.mxu1 %v8705_v56  ;;  %v517_v55 = vld [vmem:[%s10008_s6 + $0x8e8] sm:$0xff]  ;;  %v10226_v56 = vcombine.low %v217_v33, %v225_v37  ;;  %v552_v37 = vld [vmem:[%s10008_s6 + $0xa00] sm:$0xff] }
  0xa8   : > { %6613 = vmatprep.subr.bf16.mxu0 %v8712_v57  ;;  %7037 = vmatprep.subr.bf16.mxu1 %v8714_v59  ;;  %v10231_v57 = vld [vmem:[%s11515_s0 + $0x10] sm:$0xff]  ;;  %v8770_v63 = vcombine.high %v513_v52, %v517_v55  ;;  %v8769_v6 = vcombine.low %v513_v52, %v517_v55  ;;  %v568_v55 = vld [vmem:[%s10008_s6 + $0xa80] sm:$0xff] }
  0xa9   : > { %v10236_v59 = vld [vmem:[%s11515_s0 + $0x50] sm:$0xff] }
  0xab   : > { %6614 = vmatpush1.bf16.msra.mxu0 %v8711_v0  ;;  %7038 = vmatpush1.bf16.msra.mxu1 %v8713_v1  ;;  %v520_v0 = vld [vmem:[%s10008_s6 + $0x900] sm:$0xff] }
  0xac   : > { %6615 = vmatprep.subr.bf16.mxu0 %v8720_v2  ;;  %7039 = vmatprep.subr.bf16.mxu1 %v8722_v3  ;;  %v524_v1 = vld [vmem:[%s10008_s6 + $0x920] sm:$0xff]  ;;  %v10242_v2 = vcombine.high %v10231_v57, %v10236_v59  ;;  %v521_v3 = vld [vmem:[%s10008_s6 + $0x908] sm:$0xff] }
  0xad   : > { %v8776_v7 = vcombine.high %v520_v0, %v524_v1  ;;  %v8775_v13 = vcombine.low %v520_v0, %v524_v1  ;;  %v8777_v14 = vcombine.low %v521_v3, %v525_v4 }
  0xaf   : > { %6616 = vmatpush1.bf16.msra.mxu0 %v8719_v8  ;;  %7040 = vmatpush1.bf16.msra.mxu1 %v8721_v9  ;;  %v8778_v8 = vcombine.high %v521_v3, %v525_v4  ;;  %v528_v9 = vld [vmem:[%s10008_s6 + $0x940] sm:$0xff] }
  0xb0   : > { %6617 = vmatprep.subr.bf16.mxu0 %v8728_v10  ;;  %7041 = vmatprep.subr.bf16.mxu1 %v8730_v11  ;;  %v532_v10 = vld [vmem:[%s10008_s6 + $0x960] sm:$0xff]  ;;  %v529_v11 = vld [vmem:[%s10008_s6 + $0x948] sm:$0xff] }
  0xb1   : > { %v8784_v16 = vcombine.high %v528_v9, %v532_v10  ;;  %v8783_v53 = vcombine.low %v528_v9, %v532_v10  ;;  %v8785_v54 = vcombine.low %v529_v11, %v533_v12  ;;  %v576_v4 = vld [vmem:[%s10008_s6 + $0xac0] sm:$0xff] }
  0xb3   : > { %6618 = vmatpush1.bf16.msra.mxu0 %v8727_v17  ;;  %7042 = vmatpush1.bf16.msra.mxu1 %v8729_v18  ;;  %v8786_v17 = vcombine.high %v529_v11, %v533_v12  ;;  %v536_v18 = vld [vmem:[%s10008_s6 + $0x980] sm:$0xff] }
  0xb4   : > { %6619 = vmatprep.subr.bf16.mxu0 %v8736_v19  ;;  %7043 = vmatprep.subr.bf16.mxu1 %v8738_v20  ;;  %v540_v19 = vld [vmem:[%s10008_s6 + $0x9a0] sm:$0xff]  ;;  %v537_v20 = vld [vmem:[%s10008_s6 + $0x988] sm:$0xff] }
  0xb5   : > { %v8792_v22 = vcombine.high %v536_v18, %v540_v19  ;;  %v8791_v29 = vcombine.low %v536_v18, %v540_v19  ;;  %v8793_v30 = vcombine.low %v537_v20, %v541_v21  ;;  %v584_v12 = vld [vmem:[%s10008_s6 + $0xb00] sm:$0xff] }
  0xb7   : > { %6620 = vmatpush1.bf16.msra.mxu0 %v8735_v24  ;;  %7044 = vmatpush1.bf16.msra.mxu1 %v8737_v25  ;;  %v8794_v24 = vcombine.high %v537_v20, %v541_v21  ;;  %v544_v25 = vld [vmem:[%s10008_s6 + $0x9c0] sm:$0xff] }
  0xb8   : > { %6642 = vmatprep.subr.bf16.mxu0 %v8744_v26  ;;  %7066 = vmatprep.subr.bf16.mxu1 %v8746_v27  ;;  %v548_v26 = vld [vmem:[%s10008_s6 + $0x9e0] sm:$0xff]  ;;  %v545_v27 = vld [vmem:[%s10008_s6 + $0x9c8] sm:$0xff] }
  0xb9   : > { %v8800_v32 = vcombine.high %v544_v25, %v548_v26  ;;  %v8802_v33 = vcombine.high %v545_v27, %v549_v28  ;;  %v8801_v36 = vcombine.low %v545_v27, %v549_v28  ;;  %v592_v21 = vld [vmem:[%s10008_s6 + $0xb40] sm:$0xff] }
  0xba   : > { %6622 = vmatmul.mubr.bf16.vlgmr.msra.gmra.mrb[0].mxu0 %v10203_v31  ;;  %7046 = vmatmul.mubr.bf16.vlgmr.msra.gmra.mrb[0].mxu1 %v10203_v31  ;;  %v600_v28 = vld [vmem:[%s10008_s6 + $0xb80] sm:$0xff] }
  0xbb   : > { %6643 = vmatpush1.bf16.msra.mxu0 %v8743_v38  ;;  %7067 = vmatpush1.bf16.msra.mxu1 %v8745_v39  ;;  %v556_v38 = vld [vmem:[%s10008_s6 + $0xa20] sm:$0xff]  ;;  %v553_v39 = vld [vmem:[%s10008_s6 + $0xa08] sm:$0xff] }
  0xbc   : > { %6644 = vmatprep.subr.bf16.mxu0 %v8752_v40  ;;  %7068 = vmatprep.subr.bf16.mxu1 %v8754_v35  ;;  %v557_v40 = vld [vmem:[%s10008_s6 + $0xa28] sm:$0xff]  ;;  %v8799_v35 = vcombine.low %v544_v25, %v548_v26  ;;  %v8808_v41 = vcombine.high %v552_v37, %v556_v38 }
  0xbd   : > { %6631 = vmatprep.mubr.bf16.mxu0 %v10214_v42  ;;  %7055 = vmatprep.mubr.bf16.mxu1 %v10214_v42  ;;  %v8810_v44 = vcombine.high %v553_v39, %v557_v40  ;;  %v8809_v50 = vcombine.low %v553_v39, %v557_v40  ;;  %v608_v40 = vld [vmem:[%s10008_s6 + $0xbc0] sm:$0xff] }
  0xbf   : > { %6645 = vmatpush1.bf16.msra.mxu0 %v8751_v46  ;;  %7069 = vmatpush1.bf16.msra.mxu1 %v8753_v47  ;;  %v564_v46 = vld [vmem:[%s10008_s6 + $0xa60] sm:$0xff]  ;;  %v561_v47 = vld [vmem:[%s10008_s6 + $0xa48] sm:$0xff] }
  0xc0   : > { %6646 = vmatprep.subr.bf16.mxu0 %v8760_v48  ;;  %7070 = vmatprep.subr.bf16.mxu1 %v8762_v49  ;;  %v565_v48 = vld [vmem:[%s10008_s6 + $0xa68] sm:$0xff]  ;;  %v8807_v49 = vcombine.low %v552_v37, %v556_v38  ;;  %v8816_v51 = vcombine.high %v560_v45, %v564_v46 }
  0xc1   : > { %v8818_v52 = vcombine.high %v561_v47, %v565_v48  ;;  %v8817_v0 = vcombine.low %v561_v47, %v565_v48  ;;  %v616_v48 = vld [vmem:[%s10008_s6 + $0xc00] sm:$0xff] }
  0xc2   : > { %6632 = vmatmul.mubr.bf16.gmra.mrb[4].mxu0 %v10226_v56  ;;  %7056 = vmatmul.mubr.bf16.gmra.mrb[4].mxu1 %v10226_v56 }
  0xc3   : > { %6647 = vmatpush1.bf16.msra.mxu0 %v8759_v60  ;;  %7071 = vmatpush1.bf16.msra.mxu1 %v8761_v61  ;;  %v572_v60 = vld [vmem:[%s10008_s6 + $0xaa0] sm:$0xff]  ;;  %v569_v61 = vld [vmem:[%s10008_s6 + $0xa88] sm:$0xff] }
  0xc4   : > { %6648 = vmatprep.subr.bf16.mxu0 %v8768_v62  ;;  %7072 = vmatprep.subr.bf16.mxu1 %v8770_v63  ;;  %v573_v62 = vld [vmem:[%s10008_s6 + $0xaa8] sm:$0xff]  ;;  %v8815_v63 = vcombine.low %v560_v45, %v564_v46  ;;  %v8824_v1 = vcombine.high %v568_v55, %v572_v60 }
  0xc5   : > { %6674 = vmatprep.mubr.bf16.mxu0 %v10242_v2  ;;  %7098 = vmatprep.mubr.bf16.mxu1 %v10242_v2  ;;  %v8826_v3 = vcombine.high %v569_v61, %v573_v62  ;;  %v8825_v9 = vcombine.low %v569_v61, %v573_v62  ;;  %v624_v62 = vld [vmem:[%s10008_s6 + $0xc40] sm:$0xff] }
  0xc7   : > { %6649 = vmatpush1.bf16.msra.mxu0 %v8767_v5  ;;  %7073 = vmatpush1.bf16.msra.mxu1 %v8769_v6  ;;  %v580_v5 = vld [vmem:[%s10008_s6 + $0xae0] sm:$0xff]  ;;  %v577_v6 = vld [vmem:[%s10008_s6 + $0xac8] sm:$0xff] }
  0xc8   : > { %6650 = vmatprep.subr.bf16.mxu0 %v8776_v7  ;;  %7074 = vmatprep.subr.bf16.mxu1 %v8778_v8  ;;  %v581_v7 = vld [vmem:[%s10008_s6 + $0xae8] sm:$0xff]  ;;  %v8823_v8 = vcombine.low %v568_v55, %v572_v60  ;;  %v8832_v10 = vcombine.high %v576_v4, %v580_v5 }
  0xc9   : > { %v8834_v11 = vcombine.high %v577_v6, %v581_v7  ;;  %v8833_v18 = vcombine.low %v577_v6, %v581_v7 }
  0xcb   : > { %6651 = vmatpush1.bf16.msra.mxu0 %v8775_v13  ;;  %7075 = vmatpush1.bf16.msra.mxu1 %v8777_v14  ;;  %v588_v13 = vld [vmem:[%s10008_s6 + $0xb20] sm:$0xff]  ;;  %v585_v14 = vld [vmem:[%s10008_s6 + $0xb08] sm:$0xff] }
  0xcc   : > { %6652 = vmatprep.subr.bf16.mxu0 %v8784_v16  ;;  %7076 = vmatprep.subr.bf16.mxu1 %v8786_v17  ;;  %v589_v16 = vld [vmem:[%s10008_s6 + $0xb28] sm:$0xff]  ;;  %v8831_v17 = vcombine.low %v576_v4, %v580_v5  ;;  %v8840_v19 = vcombine.high %v584_v12, %v588_v13  ;;  %v218_v4 = vld [vmem:[%s11515_s0 + $0x90] sm:$0xff] }
  0xcd   : > { %v8842_v20 = vcombine.high %v585_v14, %v589_v16  ;;  %v8841_v25 = vcombine.low %v585_v14, %v589_v16  ;;  %v226_v5 = vld [vmem:[%s11515_s0 + $0xd0] sm:$0xff] }
  0xcf   : > { %6653 = vmatpush1.bf16.msra.mxu0 %v8783_v53  ;;  %7077 = vmatpush1.bf16.msra.mxu1 %v8785_v54  ;;  %v596_v53 = vld [vmem:[%s10008_s6 + $0xb60] sm:$0xff]  ;;  %v593_v54 = vld [vmem:[%s10008_s6 + $0xb48] sm:$0xff] }
  0xd0   : > { %6654 = vmatprep.subr.bf16.mxu0 %v8792_v22  ;;  %7078 = vmatprep.subr.bf16.mxu1 %v8794_v24  ;;  %v597_v22 = vld [vmem:[%s10008_s6 + $0xb68] sm:$0xff]  ;;  %v8839_v24 = vcombine.low %v584_v12, %v588_v13  ;;  %v8848_v26 = vcombine.high %v592_v21, %v596_v53 }
  0xd1   : > { %v8850_v27 = vcombine.high %v593_v54, %v597_v22  ;;  %v8849_v37 = vcombine.low %v593_v54, %v597_v22  ;;  %v637_v12 = vld [vmem:[%s10008_s6 + $0xca8] sm:$0xff]  ;;  %v10331_v54 = vld [vmem:[%s11515_s0 + $0x18] sm:$0xff] }
  0xd2   : > { %v10336_v22 = vld [vmem:[%s11515_s0 + $0x58] sm:$0xff] }
  0xd3   : > { %6655 = vmatpush1.bf16.msra.mxu0 %v8791_v29  ;;  %7079 = vmatpush1.bf16.msra.mxu1 %v8793_v30  ;;  %v604_v29 = vld [vmem:[%s10008_s6 + $0xba0] sm:$0xff]  ;;  %v601_v30 = vld [vmem:[%s10008_s6 + $0xb88] sm:$0xff] }
  0xd4   : > { %6656 = vmatprep.subr.bf16.mxu0 %v8800_v32  ;;  %7080 = vmatprep.subr.bf16.mxu1 %v8802_v33  ;;  %v605_v32 = vld [vmem:[%s10008_s6 + $0xba8] sm:$0xff]  ;;  %v8847_v33 = vcombine.low %v592_v21, %v596_v53  ;;  %v8856_v38 = vcombine.high %v600_v28, %v604_v29  ;;  %v10326_v53 = vcombine.low %v218_v4, %v226_v5 }
  0xd5   : > { %v8858_v39 = vcombine.high %v601_v30, %v605_v32  ;;  %v8857_v45 = vcombine.low %v601_v30, %v605_v32  ;;  %v645_v21 = vld [vmem:[%s10008_s6 + $0xce8] sm:$0xff]  ;;  %v10342_v30 = vcombine.high %v10331_v54, %v10336_v22 }
  0xd6   : > { %v649_v32 = vld [vmem:[%s10008_s6 + $0xd08] sm:$0xff] }
  0xd7   : > { %6657 = vmatpush1.bf16.msra.mxu0 %v8799_v35  ;;  %7081 = vmatpush1.bf16.msra.mxu1 %v8801_v36  ;;  %v612_v35 = vld [vmem:[%s10008_s6 + $0xbe0] sm:$0xff]  ;;  %v609_v36 = vld [vmem:[%s10008_s6 + $0xbc8] sm:$0xff] }
  0xd8   : > { %6658 = vmatprep.subr.bf16.mxu0 %v8808_v41  ;;  %7082 = vmatprep.subr.bf16.mxu1 %v8810_v44  ;;  %v613_v41 = vld [vmem:[%s10008_s6 + $0xbe8] sm:$0xff]  ;;  %v8855_v44 = vcombine.low %v600_v28, %v604_v29  ;;  %v8864_v46 = vcombine.high %v608_v40, %v612_v35  ;;  %v648_v28 = vld [vmem:[%s10008_s6 + $0xd00] sm:$0xff] }
  0xd9   : > { %v8866_v47 = vcombine.high %v609_v36, %v613_v41  ;;  %v8865_v55 = vcombine.low %v609_v36, %v613_v41  ;;  %v652_v29 = vld [vmem:[%s10008_s6 + $0xd20] sm:$0xff]  ;;  %v657_v41 = vld [vmem:[%s10008_s6 + $0xd48] sm:$0xff] }
  0xda   : > { %v660_v36 = vld [vmem:[%s10008_s6 + $0xd60] sm:$0xff] }
  0xdb   : > { %6659 = vmatpush1.bf16.msra.mxu0 %v8807_v49  ;;  %7083 = vmatpush1.bf16.msra.mxu1 %v8809_v50  ;;  %v620_v49 = vld [vmem:[%s10008_s6 + $0xc20] sm:$0xff]  ;;  %v617_v50 = vld [vmem:[%s10008_s6 + $0xc08] sm:$0xff] }
  0xdc   : > { %6660 = vmatprep.subr.bf16.mxu0 %v8816_v51  ;;  %7084 = vmatprep.subr.bf16.mxu1 %v8818_v52  ;;  %v621_v51 = vld [vmem:[%s10008_s6 + $0xc28] sm:$0xff]  ;;  %v8863_v52 = vcombine.low %v608_v40, %v612_v35  ;;  %v8872_v60 = vcombine.high %v616_v48, %v620_v49  ;;  %v8871_v6 = vcombine.low %v616_v48, %v620_v49  ;;  %v656_v35 = vld [vmem:[%s10008_s6 + $0xd40] sm:$0xff] }
  0xdd   : > { %v8874_v61 = vcombine.high %v617_v50, %v621_v51  ;;  %v8873_v7 = vcombine.low %v617_v50, %v621_v51  ;;  %v664_v49 = vld [vmem:[%s10008_s6 + $0xd80] sm:$0xff]  ;;  %v665_v51 = vld [vmem:[%s10008_s6 + $0xd88] sm:$0xff] }
  0xde   : > { %v668_v50 = vld [vmem:[%s10008_s6 + $0xda0] sm:$0xff] }
  0xdf   : > { %6661 = vmatpush1.bf16.msra.mxu0 %v8815_v63  ;;  %7085 = vmatpush1.bf16.msra.mxu1 %v8817_v0  ;;  %v628_v63 = vld [vmem:[%s10008_s6 + $0xc60] sm:$0xff]  ;;  %v625_v0 = vld [vmem:[%s10008_s6 + $0xc48] sm:$0xff] }
  0xe0   : > { %6662 = vmatprep.subr.bf16.mxu0 %v8824_v1  ;;  %7086 = vmatprep.subr.bf16.mxu1 %v8826_v3  ;;  %v10303_v1 = vcombine.low %v10231_v57, %v10236_v59  ;;  %v629_v3 = vld [vmem:[%s10008_s6 + $0xc68] sm:$0xff]  ;;  %v632_v59 = vld [vmem:[%s10008_s6 + $0xc80] sm:$0xff]  ;;  %v8879_v13 = vcombine.low %v624_v62, %v628_v63 }
  0xe1   : > { %v8882_v57 = vcombine.high %v625_v0, %v629_v3  ;;  %v8881_v14 = vcombine.low %v625_v0, %v629_v3  ;;  %v676_v0 = vld [vmem:[%s10008_s6 + $0xde0] sm:$0xff]  ;;  %v673_v3 = vld [vmem:[%s10008_s6 + $0xdc8] sm:$0xff] }
  0xe3   : > { %6663 = vmatpush1.bf16.msra.mxu0 %v8823_v8  ;;  %7087 = vmatpush1.bf16.msra.mxu1 %v8825_v9  ;;  %v8880_v8 = vcombine.high %v624_v62, %v628_v63  ;;  %v636_v9 = vld [vmem:[%s10008_s6 + $0xca0] sm:$0xff] }
  0xe4   : > { %6664 = vmatprep.subr.bf16.mxu0 %v8832_v10  ;;  %7088 = vmatprep.subr.bf16.mxu1 %v8834_v11  ;;  %v10314_v10 = vcombine.high %v218_v4, %v226_v5  ;;  %v633_v11 = vld [vmem:[%s10008_s6 + $0xc88] sm:$0xff]  ;;  %v8888_v16 = vcombine.high %v632_v59, %v636_v9  ;;  %v672_v63 = vld [vmem:[%s10008_s6 + $0xdc0] sm:$0xff]  ;;  %v8919_v5 = vcombine.low %v664_v49, %v668_v50 }
  0xe5   : > { %v677_v4 = vld [vmem:[%s10008_s6 + $0xde8] sm:$0xff] }
  0xe7   : > { %6665 = vmatpush1.bf16.msra.mxu0 %v8831_v17  ;;  %7089 = vmatpush1.bf16.msra.mxu1 %v8833_v18  ;;  %v8890_v17 = vcombine.high %v633_v11, %v637_v12  ;;  %v640_v18 = vld [vmem:[%s10008_s6 + $0xcc0] sm:$0xff] }
  0xe8   : > { %6666 = vmatprep.subr.bf16.mxu0 %v8840_v19  ;;  %7090 = vmatprep.subr.bf16.mxu1 %v8842_v20  ;;  %v644_v19 = vld [vmem:[%s10008_s6 + $0xce0] sm:$0xff]  ;;  %v641_v20 = vld [vmem:[%s10008_s6 + $0xcc8] sm:$0xff] }
  0xeb   : > { %6667 = vmatpush1.bf16.msra.mxu0 %v8839_v24  ;;  %7091 = vmatpush1.bf16.msra.mxu1 %v8841_v25  ;;  %v8887_v24 = vcombine.low %v632_v59, %v636_v9  ;;  %v8889_v25 = vcombine.low %v633_v11, %v637_v12  ;;  %v684_v59 = vld [vmem:[%s10008_s6 + $0xe20] sm:$0xff]  ;;  %v681_v9 = vld [vmem:[%s10008_s6 + $0xe08] sm:$0xff]  ;;  %v8927_v12 = vcombine.low %v672_v63, %v676_v0 }
  0xec   : > { %6668 = vmatprep.subr.bf16.mxu0 %v8848_v26  ;;  %7092 = vmatprep.subr.bf16.mxu1 %v8850_v27  ;;  %v8896_v26 = vcombine.high %v640_v18, %v644_v19  ;;  %v8898_v27 = vcombine.high %v641_v20, %v645_v21  ;;  %v685_v11 = vld [vmem:[%s10008_s6 + $0xe28] sm:$0xff] }
  0xef   : > { %6669 = vmatpush1.bf16.msra.mxu0 %v8847_v33  ;;  %7093 = vmatpush1.bf16.msra.mxu1 %v8849_v37  ;;  %v653_v33 = vld [vmem:[%s10008_s6 + $0xd28] sm:$0xff]  ;;  %v8895_v37 = vcombine.low %v640_v18, %v644_v19  ;;  %v692_v18 = vld [vmem:[%s10008_s6 + $0xe60] sm:$0xff] }
  0xf0   : > { %6670 = vmatprep.subr.bf16.mxu0 %v8856_v38  ;;  %7094 = vmatprep.subr.bf16.mxu1 %v8858_v39  ;;  %v8897_v38 = vcombine.low %v641_v20, %v645_v21  ;;  %v8904_v39 = vcombine.high %v648_v28, %v652_v29  ;;  %v8906_v40 = vcombine.high %v649_v32, %v653_v33  ;;  %v689_v19 = vld [vmem:[%s10008_s6 + $0xe48] sm:$0xff] }
  0xf1   : > { %v693_v20 = vld [vmem:[%s10008_s6 + $0xe68] sm:$0xff] }
  0xf3   : > { %6671 = vmatpush1.bf16.msra.mxu0 %v8855_v44  ;;  %7095 = vmatpush1.bf16.msra.mxu1 %v8857_v45  ;;  %v661_v44 = vld [vmem:[%s10008_s6 + $0xd68] sm:$0xff]  ;;  %v8903_v45 = vcombine.low %v648_v28, %v652_v29  ;;  %v700_v28 = vld [vmem:[%s10008_s6 + $0xea0] sm:$0xff] }
  0xf4   : > { %6672 = vmatprep.subr.bf16.mxu0 %v8864_v46  ;;  %7096 = vmatprep.subr.bf16.mxu1 %v8866_v47  ;;  %v8905_v46 = vcombine.low %v649_v32, %v653_v33  ;;  %v8912_v47 = vcombine.high %v656_v35, %v660_v36  ;;  %v8914_v48 = vcombine.high %v657_v41, %v661_v44  ;;  %v697_v29 = vld [vmem:[%s10008_s6 + $0xe88] sm:$0xff] }
  0xf5   : > { %v701_v32 = vld [vmem:[%s10008_s6 + $0xea8] sm:$0xff] }
  0xf7   : > { %6673 = vmatpush1.bf16.msra.mxu0 %v8863_v52  ;;  %7097 = vmatpush1.bf16.msra.mxu1 %v8865_v55  ;;  %v669_v52 = vld [vmem:[%s10008_s6 + $0xda8] sm:$0xff]  ;;  %v8911_v55 = vcombine.low %v656_v35, %v660_v36  ;;  %v708_v35 = vld [vmem:[%s10008_s6 + $0xee0] sm:$0xff] }
  0xf8   : > { %6695 = vmatprep.subr.bf16.mxu0 %v8872_v60  ;;  %7119 = vmatprep.subr.bf16.mxu1 %v8874_v61  ;;  %v8913_v60 = vcombine.low %v657_v41, %v661_v44  ;;  %v8920_v61 = vcombine.high %v664_v49, %v668_v50  ;;  %v8922_v62 = vcombine.high %v665_v51, %v669_v52  ;;  %v705_v36 = vld [vmem:[%s10008_s6 + $0xec8] sm:$0xff]  ;;  %v716_v49 = vld [vmem:[%s10008_s6 + $0xf20] sm:$0xff] }
  0xf9   : > { %v709_v41 = vld [vmem:[%s10008_s6 + $0xee8] sm:$0xff] }
  0xfa   : > { %6675 = vmatmul.mubr.bf16.vlgmr.msra.gmra.mrb[0].mxu0 %v10303_v1  ;;  %7099 = vmatmul.mubr.bf16.vlgmr.msra.gmra.mrb[0].mxu1 %v10303_v1  ;;  %v713_v50 = vld [vmem:[%s10008_s6 + $0xf08] sm:$0xff] }
  0xfb   : > { %6696 = vmatpush1.bf16.msra.mxu0 %v8871_v6  ;;  %7120 = vmatpush1.bf16.msra.mxu1 %v8873_v7  ;;  %v8921_v6 = vcombine.low %v665_v51, %v669_v52  ;;  %v8928_v7 = vcombine.high %v672_v63, %v676_v0  ;;  %v717_v51 = vld [vmem:[%s10008_s6 + $0xf28] sm:$0xff]  ;;  %v724_v63 = vld [vmem:[%s10008_s6 + $0xf60] sm:$0xff] }
  0xfc   : > { %6697 = vmatprep.subr.bf16.mxu0 %v8880_v8  ;;  %7121 = vmatprep.subr.bf16.mxu1 %v8882_v57  ;;  %v8930_v8 = vcombine.high %v673_v3, %v677_v4  ;;  %v680_v57 = vld [vmem:[%s10008_s6 + $0xe00] sm:$0xff]  ;;  %v721_v0 = vld [vmem:[%s10008_s6 + $0xf48] sm:$0xff] }
  0xfd   : > { %6684 = vmatprep.mubr.bf16.mxu0 %v10314_v10  ;;  %7108 = vmatprep.mubr.bf16.mxu1 %v10314_v10  ;;  %v8935_v21 = vcombine.low %v680_v57, %v684_v59 }
  0xff   : > { %6698 = vmatpush1.bf16.msra.mxu0 %v8879_v13  ;;  %7122 = vmatpush1.bf16.msra.mxu1 %v8881_v14  ;;  %v8929_v13 = vcombine.low %v673_v3, %v677_v4  ;;  %v8936_v14 = vcombine.high %v680_v57, %v684_v59  ;;  %v725_v3 = vld [vmem:[%s10008_s6 + $0xf68] sm:$0xff]  ;;  %v732_v57 = vld [vmem:[%s10008_s6 + $0xfa0] sm:$0xff] }
 0x100   : > { %6699 = vmatprep.subr.bf16.mxu0 %v8888_v16  ;;  %7123 = vmatprep.subr.bf16.mxu1 %v8890_v17  ;;  %v8938_v16 = vcombine.high %v681_v9, %v685_v11  ;;  %v688_v17 = vld [vmem:[%s10008_s6 + $0xe40] sm:$0xff]  ;;  %v729_v59 = vld [vmem:[%s10008_s6 + $0xf88] sm:$0xff] }
 0x101   : > { %v8943_v33 = vcombine.low %v688_v17, %v692_v18 }
 0x102   : > { %6685 = vmatmul.mubr.bf16.gmra.mrb[4].mxu0 %v10326_v53  ;;  %7109 = vmatmul.mubr.bf16.gmra.mrb[4].mxu1 %v10326_v53 }
 0x103   : > { %6700 = vmatpush1.bf16.msra.mxu0 %v8887_v24  ;;  %7124 = vmatpush1.bf16.msra.mxu1 %v8889_v25  ;;  %v8937_v24 = vcombine.low %v681_v9, %v685_v11  ;;  %v8944_v25 = vcombine.high %v688_v17, %v692_v18  ;;  %v733_v9 = vld [vmem:[%s10008_s6 + $0xfa8] sm:$0xff]  ;;  %v740_v17 = vld [vmem:[%s10008_s6 + $0xfe0] sm:$0xff] }
 0x104   : > { %6701 = vmatprep.subr.bf16.mxu0 %v8896_v26  ;;  %7125 = vmatprep.subr.bf16.mxu1 %v8898_v27  ;;  %v8946_v26 = vcombine.high %v689_v19, %v693_v20  ;;  %v696_v27 = vld [vmem:[%s10008_s6 + $0xe80] sm:$0xff]  ;;  %v737_v18 = vld [vmem:[%s10008_s6 + $0xfc8] sm:$0xff] }
 0x105   : > { %6727 = vmatprep.mubr.bf16.mxu0 %v10342_v30  ;;  %7151 = vmatprep.mubr.bf16.mxu1 %v10342_v30  ;;  %v8951_v44 = vcombine.low %v696_v27, %v700_v28 }
 0x107   : > { %6702 = vmatpush1.bf16.msra.mxu0 %v8895_v37  ;;  %7126 = vmatpush1.bf16.msra.mxu1 %v8897_v38  ;;  %v8945_v37 = vcombine.low %v689_v19, %v693_v20  ;;  %v8952_v38 = vcombine.high %v696_v27, %v700_v28  ;;  %v741_v19 = vld [vmem:[%s10008_s6 + $0xfe8] sm:$0xff]  ;;  %v748_v27 = vld [vmem:[%s10008_s6 + $0x1020] sm:$0xff] }
 0x108   : > { %6703 = vmatprep.subr.bf16.mxu0 %v8904_v39  ;;  %7127 = vmatprep.subr.bf16.mxu1 %v8906_v40  ;;  %v8954_v39 = vcombine.high %v697_v29, %v701_v32  ;;  %v704_v40 = vld [vmem:[%s10008_s6 + $0xec0] sm:$0xff]  ;;  %v745_v28 = vld [vmem:[%s10008_s6 + $0x1008] sm:$0xff] }
 0x109   : > { %v8959_v52 = vcombine.low %v704_v40, %v708_v35 }
 0x10b   : > { %6704 = vmatpush1.bf16.msra.mxu0 %v8903_v45  ;;  %7128 = vmatpush1.bf16.msra.mxu1 %v8905_v46  ;;  %v8953_v45 = vcombine.low %v697_v29, %v701_v32  ;;  %v8960_v46 = vcombine.high %v704_v40, %v708_v35  ;;  %v749_v29 = vld [vmem:[%s10008_s6 + $0x1028] sm:$0xff]  ;;  %v756_v40 = vld [vmem:[%s10008_s6 + $0x1060] sm:$0xff] }
 0x10c   : > { %6705 = vmatprep.subr.bf16.mxu0 %v8912_v47  ;;  %7129 = vmatprep.subr.bf16.mxu1 %v8914_v48  ;;  %v8962_v47 = vcombine.high %v705_v36, %v709_v41  ;;  %v712_v48 = vld [vmem:[%s10008_s6 + $0xf00] sm:$0xff]  ;;  %v753_v35 = vld [vmem:[%s10008_s6 + $0x1048] sm:$0xff] }
 0x10d   : > { %v8967_v4 = vcombine.low %v712_v48, %v716_v49 }
 0x10f   : > { %6706 = vmatpush1.bf16.msra.mxu0 %v8911_v55  ;;  %7130 = vmatpush1.bf16.msra.mxu1 %v8913_v60  ;;  %v8961_v55 = vcombine.low %v705_v36, %v709_v41  ;;  %v8968_v60 = vcombine.high %v712_v48, %v716_v49  ;;  %v10403_v36 = vcombine.low %v10331_v54, %v10336_v22  ;;  %v757_v41 = vld [vmem:[%s10008_s6 + $0x1068] sm:$0xff]  ;;  %v760_v22 = vld [vmem:[%s10008_s6 + $0x1080] sm:$0xff] }
 0x110   : > { %6707 = vmatprep.subr.bf16.mxu0 %v8920_v61  ;;  %7131 = vmatprep.subr.bf16.mxu1 %v8922_v62  ;;  %v8970_v61 = vcombine.high %v713_v50, %v717_v51  ;;  %v720_v62 = vld [vmem:[%s10008_s6 + $0xf40] sm:$0xff]  ;;  %v9010_v54 = vcombine.high %v753_v35, %v757_v41 }
 0x111   : > { %v8975_v11 = vcombine.low %v720_v62, %v724_v63  ;;  %v764_v49 = vld [vmem:[%s10008_s6 + $0x10a0] sm:$0xff] }
 0x113   : > { %6708 = vmatpush1.bf16.msra.mxu0 %v8919_v5  ;;  %7132 = vmatpush1.bf16.msra.mxu1 %v8921_v6  ;;  %v8969_v5 = vcombine.low %v713_v50, %v717_v51  ;;  %v8976_v6 = vcombine.high %v720_v62, %v724_v63  ;;  %v761_v51 = vld [vmem:[%s10008_s6 + $0x1088] sm:$0xff]  ;;  %v768_v63 = vld [vmem:[%s10008_s6 + $0x10c0] sm:$0xff] }
 0x114   : > { %6709 = vmatprep.subr.bf16.mxu0 %v8928_v7  ;;  %7133 = vmatprep.subr.bf16.mxu1 %v8930_v8  ;;  %v8978_v7 = vcombine.high %v721_v0, %v725_v3  ;;  %v728_v8 = vld [vmem:[%s10008_s6 + $0xf80] sm:$0xff] }
 0x115   : > { %v8983_v20 = vcombine.low %v728_v8, %v732_v57 }
 0x117   : > { %6710 = vmatpush1.bf16.msra.mxu0 %v8927_v12  ;;  %7134 = vmatpush1.bf16.msra.mxu1 %v8929_v13  ;;  %v8977_v12 = vcombine.low %v721_v0, %v725_v3  ;;  %v8984_v13 = vcombine.high %v728_v8, %v732_v57  ;;  %v772_v0 = vld [vmem:[%s10008_s6 + $0x10e0] sm:$0xff]  ;;  %v769_v3 = vld [vmem:[%s10008_s6 + $0x10c8] sm:$0xff]  ;;  %v9015_v8 = vcombine.low %v760_v22, %v764_v49 }
 0x118   : > { %6711 = vmatprep.subr.bf16.mxu0 %v8936_v14  ;;  %7135 = vmatprep.subr.bf16.mxu1 %v8938_v16  ;;  %v8986_v14 = vcombine.high %v729_v59, %v733_v9  ;;  %v736_v16 = vld [vmem:[%s10008_s6 + $0xfc0] sm:$0xff] }
 0x119   : > { %v8991_v32 = vcombine.low %v736_v16, %v740_v17 }
 0x11b   : > { %6712 = vmatpush1.bf16.msra.mxu0 %v8935_v21  ;;  %7136 = vmatpush1.bf16.msra.mxu1 %v8937_v24  ;;  %v8985_v21 = vcombine.low %v729_v59, %v733_v9  ;;  %v8992_v24 = vcombine.high %v736_v16, %v740_v17  ;;  %v9024_v59 = vcombine.high %v768_v63, %v772_v0  ;;  %v781_v16 = vld [vmem:[%s10008_s6 + $0x1128] sm:$0xff] }
 0x11c   : > { %6713 = vmatprep.subr.bf16.mxu0 %v8944_v25  ;;  %7137 = vmatprep.subr.bf16.mxu1 %v8946_v26  ;;  %v8994_v25 = vcombine.high %v737_v18, %v741_v19  ;;  %v744_v26 = vld [vmem:[%s10008_s6 + $0x1000] sm:$0xff]  ;;  %v9023_v17 = vcombine.low %v768_v63, %v772_v0 }
 0x11f   : > { %6714 = vmatpush1.bf16.msra.mxu0 %v8943_v33  ;;  %7138 = vmatpush1.bf16.msra.mxu1 %v8945_v37  ;;  %v8993_v33 = vcombine.low %v737_v18, %v741_v19  ;;  %v9000_v37 = vcombine.high %v744_v26, %v748_v27 }
 0x120   : > { %6715 = vmatprep.subr.bf16.mxu0 %v8952_v38  ;;  %7139 = vmatprep.subr.bf16.mxu1 %v8954_v39  ;;  %v9002_v38 = vcombine.high %v745_v28, %v749_v29  ;;  %v752_v39 = vld [vmem:[%s10008_s6 + $0x1040] sm:$0xff] }
 0x121   : > { %v9008_v48 = vcombine.high %v752_v39, %v756_v40 }
 0x123   : > { %6716 = vmatpush1.bf16.msra.mxu0 %v8951_v44  ;;  %7140 = vmatpush1.bf16.msra.mxu1 %v8953_v45  ;;  %v219_v44 = vld [vmem:[%s11515_s0 + $0x98] sm:$0xff] }
 0x124   : > { %6717 = vmatprep.subr.bf16.mxu0 %v8960_v46  ;;  %7141 = vmatprep.subr.bf16.mxu1 %v8962_v47  ;;  %v227_v45 = vld [vmem:[%s11515_s0 + $0xd8] sm:$0xff]  ;;  %v8999_v46 = vcombine.low %v744_v26, %v748_v27  ;;  %v9001_v47 = vcombine.low %v745_v28, %v749_v29  ;;  %v789_v26 = vld [vmem:[%s10008_s6 + $0x1168] sm:$0xff] }
 0x125   : > { %v10414_v50 = vcombine.high %v219_v44, %v227_v45 }
 0x127   : > { %6718 = vmatpush1.bf16.msra.mxu0 %v8959_v52  ;;  %7142 = vmatpush1.bf16.msra.mxu1 %v8961_v55  ;;  %v765_v52 = vld [vmem:[%s10008_s6 + $0x10a8] sm:$0xff]  ;;  %v9007_v55 = vcombine.low %v752_v39, %v756_v40 }
 0x128   : > { %6719 = vmatprep.subr.bf16.mxu0 %v8968_v60  ;;  %7143 = vmatprep.subr.bf16.mxu1 %v8970_v61  ;;  %v9009_v60 = vcombine.low %v753_v35, %v757_v41  ;;  %v9016_v61 = vcombine.high %v760_v22, %v764_v49  ;;  %v9018_v62 = vcombine.high %v761_v51, %v765_v52  ;;  %v797_v39 = vld [vmem:[%s10008_s6 + $0x11a8] sm:$0xff] }
 0x129   : > { %v9017_v57 = vcombine.low %v761_v51, %v765_v52  ;;  %v808_v52 = vld [vmem:[%s10008_s6 + $0x1200] sm:$0xff] }
 0x12b   : > { %6720 = vmatpush1.bf16.msra.mxu0 %v8967_v4  ;;  %7144 = vmatpush1.bf16.msra.mxu1 %v8969_v5  ;;  %v773_v4 = vld [vmem:[%s10008_s6 + $0x10e8] sm:$0xff]  ;;  %v10426_v5 = vcombine.low %v219_v44, %v227_v45  ;;  %v800_v45 = vld [vmem:[%s10008_s6 + $0x11c0] sm:$0xff] }
 0x12c   : > { %6721 = vmatprep.subr.bf16.mxu0 %v8976_v6  ;;  %7145 = vmatprep.subr.bf16.mxu1 %v8978_v7  ;;  %v10431_v6 = vld [vmem:[%s11515_s0 + $0x20] sm:$0xff]  ;;  %v9026_v9 = vcombine.high %v769_v3, %v773_v4  ;;  %v9025_v18 = vcombine.low %v769_v3, %v773_v4 }
 0x12d   : > { %v10436_v7 = vld [vmem:[%s11515_s0 + $0x60] sm:$0xff] }
 0x12e   : > { %v816_v4 = vld [vmem:[%s10008_s6 + $0x1240] sm:$0xff] }
 0x12f   : > { %6722 = vmatpush1.bf16.msra.mxu0 %v8975_v11  ;;  %7146 = vmatpush1.bf16.msra.mxu1 %v8977_v12  ;;  %v776_v11 = vld [vmem:[%s10008_s6 + $0x1100] sm:$0xff] }
 0x130   : > { %6723 = vmatprep.subr.bf16.mxu0 %v8984_v13  ;;  %7147 = vmatprep.subr.bf16.mxu1 %v8986_v14  ;;  %v780_v12 = vld [vmem:[%s10008_s6 + $0x1120] sm:$0xff]  ;;  %v10442_v13 = vcombine.high %v10431_v6, %v10436_v7  ;;  %v777_v14 = vld [vmem:[%s10008_s6 + $0x1108] sm:$0xff] }
 0x131   : > { %v9032_v19 = vcombine.high %v776_v11, %v780_v12  ;;  %v9031_v27 = vcombine.low %v776_v11, %v780_v12  ;;  %v9033_v28 = vcombine.low %v777_v14, %v781_v16 }
 0x133   : > { %6724 = vmatpush1.bf16.msra.mxu0 %v8983_v20  ;;  %7148 = vmatpush1.bf16.msra.mxu1 %v8985_v21  ;;  %v9034_v20 = vcombine.high %v777_v14, %v781_v16  ;;  %v784_v21 = vld [vmem:[%s10008_s6 + $0x1140] sm:$0xff] }
 0x134   : > { %6725 = vmatprep.subr.bf16.mxu0 %v8992_v24  ;;  %7149 = vmatprep.subr.bf16.mxu1 %v8994_v25  ;;  %v788_v24 = vld [vmem:[%s10008_s6 + $0x1160] sm:$0xff]  ;;  %v785_v25 = vld [vmem:[%s10008_s6 + $0x1148] sm:$0xff] }
 0x135   : > { %v9040_v29 = vcombine.high %v784_v21, %v788_v24  ;;  %v9039_v40 = vcombine.low %v784_v21, %v788_v24  ;;  %v9041_v35 = vcombine.low %v785_v25, %v789_v26  ;;  %v824_v16 = vld [vmem:[%s10008_s6 + $0x1280] sm:$0xff] }
 0x137   : > { %6726 = vmatpush1.bf16.msra.mxu0 %v8991_v32  ;;  %7150 = vmatpush1.bf16.msra.mxu1 %v8993_v33  ;;  %v9042_v32 = vcombine.high %v785_v25, %v789_v26  ;;  %v792_v33 = vld [vmem:[%s10008_s6 + $0x1180] sm:$0xff] }
 0x138   : > { %6748 = vmatprep.subr.bf16.mxu0 %v9000_v37  ;;  %7172 = vmatprep.subr.bf16.mxu1 %v9002_v38  ;;  %v796_v37 = vld [vmem:[%s10008_s6 + $0x11a0] sm:$0xff]  ;;  %v793_v38 = vld [vmem:[%s10008_s6 + $0x1188] sm:$0xff] }
 0x139   : > { %v9048_v41 = vcombine.high %v792_v33, %v796_v37  ;;  %v9050_v44 = vcombine.high %v793_v38, %v797_v39  ;;  %v9049_v22 = vcombine.low %v793_v38, %v797_v39  ;;  %v832_v26 = vld [vmem:[%s10008_s6 + $0x12c0] sm:$0xff] }
 0x13a   : > { %6728 = vmatmul.mubr.bf16.vlgmr.msra.gmra.mrb[0].mxu0 %v10403_v36  ;;  %7152 = vmatmul.mubr.bf16.vlgmr.msra.gmra.mrb[0].mxu1 %v10403_v36  ;;  %v840_v39 = vld [vmem:[%s10008_s6 + $0x1300] sm:$0xff] }
 0x13b   : > { %6749 = vmatpush1.bf16.msra.mxu0 %v8999_v46  ;;  %7173 = vmatpush1.bf16.msra.mxu1 %v9001_v47  ;;  %v804_v46 = vld [vmem:[%s10008_s6 + $0x11e0] sm:$0xff]  ;;  %v801_v47 = vld [vmem:[%s10008_s6 + $0x11c8] sm:$0xff] }
 0x13c   : > { %6750 = vmatprep.subr.bf16.mxu0 %v9008_v48  ;;  %7174 = vmatprep.subr.bf16.mxu1 %v9010_v54  ;;  %v805_v48 = vld [vmem:[%s10008_s6 + $0x11e8] sm:$0xff]  ;;  %v9047_v54 = vcombine.low %v792_v33, %v796_v37  ;;  %v9056_v49 = vcombine.high %v800_v45, %v804_v46 }
 0x13d   : > { %6737 = vmatprep.mubr.bf16.mxu0 %v10414_v50  ;;  %7161 = vmatprep.mubr.bf16.mxu1 %v10414_v50  ;;  %v9058_v51 = vcombine.high %v801_v47, %v805_v48  ;;  %v9057_v63 = vcombine.low %v801_v47, %v805_v48  ;;  %v848_v48 = vld [vmem:[%s10008_s6 + $0x1340] sm:$0xff] }
 0x13f   : > { %6751 = vmatpush1.bf16.msra.mxu0 %v9007_v55  ;;  %7175 = vmatpush1.bf16.msra.mxu1 %v9009_v60  ;;  %v812_v55 = vld [vmem:[%s10008_s6 + $0x1220] sm:$0xff]  ;;  %v809_v60 = vld [vmem:[%s10008_s6 + $0x1208] sm:$0xff] }
 0x140   : > { %6752 = vmatprep.subr.bf16.mxu0 %v9016_v61  ;;  %7176 = vmatprep.subr.bf16.mxu1 %v9018_v62  ;;  %v813_v61 = vld [vmem:[%s10008_s6 + $0x1228] sm:$0xff]  ;;  %v9055_v62 = vcombine.low %v800_v45, %v804_v46  ;;  %v9064_v0 = vcombine.high %v808_v52, %v812_v55 }
 0x141   : > { %v9066_v3 = vcombine.high %v809_v60, %v813_v61  ;;  %v9065_v11 = vcombine.low %v809_v60, %v813_v61  ;;  %v856_v61 = vld [vmem:[%s10008_s6 + $0x1380] sm:$0xff] }
 0x142   : > { %6738 = vmatmul.mubr.bf16.gmra.mrb[4].mxu0 %v10426_v5  ;;  %7162 = vmatmul.mubr.bf16.gmra.mrb[4].mxu1 %v10426_v5 }
 0x143   : > { %6753 = vmatpush1.bf16.msra.mxu0 %v9015_v8  ;;  %7177 = vmatpush1.bf16.msra.mxu1 %v9017_v57  ;;  %v820_v8 = vld [vmem:[%s10008_s6 + $0x1260] sm:$0xff]  ;;  %v817_v57 = vld [vmem:[%s10008_s6 + $0x1248] sm:$0xff] }
 0x144   : > { %6754 = vmatprep.subr.bf16.mxu0 %v9024_v59  ;;  %7178 = vmatprep.subr.bf16.mxu1 %v9026_v9  ;;  %v821_v59 = vld [vmem:[%s10008_s6 + $0x1268] sm:$0xff]  ;;  %v9063_v9 = vcombine.low %v808_v52, %v812_v55  ;;  %v9072_v12 = vcombine.high %v816_v4, %v820_v8 }
 0x145   : > { %6780 = vmatprep.mubr.bf16.mxu0 %v10442_v13  ;;  %7204 = vmatprep.mubr.bf16.mxu1 %v10442_v13  ;;  %v9074_v14 = vcombine.high %v817_v57, %v821_v59  ;;  %v9073_v21 = vcombine.low %v817_v57, %v821_v59  ;;  %v864_v59 = vld [vmem:[%s10008_s6 + $0x13c0] sm:$0xff] }
 0x147   : > { %6755 = vmatpush1.bf16.msra.mxu0 %v9023_v17  ;;  %7179 = vmatpush1.bf16.msra.mxu1 %v9025_v18  ;;  %v828_v17 = vld [vmem:[%s10008_s6 + $0x12a0] sm:$0xff]  ;;  %v825_v18 = vld [vmem:[%s10008_s6 + $0x1288] sm:$0xff] }
 0x148   : > { %6756 = vmatprep.subr.bf16.mxu0 %v9032_v19  ;;  %7180 = vmatprep.subr.bf16.mxu1 %v9034_v20  ;;  %v829_v19 = vld [vmem:[%s10008_s6 + $0x12a8] sm:$0xff]  ;;  %v9071_v20 = vcombine.low %v816_v4, %v820_v8  ;;  %v9080_v24 = vcombine.high %v824_v16, %v828_v17 }
 0x149   : > { %v9082_v25 = vcombine.high %v825_v18, %v829_v19  ;;  %v9081_v33 = vcombine.low %v825_v18, %v829_v19  ;;  %v872_v19 = vld [vmem:[%s10008_s6 + $0x1400] sm:$0xff] }
 0x14b   : > { %6757 = vmatpush1.bf16.msra.mxu0 %v9031_v27  ;;  %7181 = vmatpush1.bf16.msra.mxu1 %v9033_v28  ;;  %v836_v27 = vld [vmem:[%s10008_s6 + $0x12e0] sm:$0xff]  ;;  %v833_v28 = vld [vmem:[%s10008_s6 + $0x12c8] sm:$0xff] }
 0x14c   : > { %6758 = vmatprep.subr.bf16.mxu0 %v9040_v29  ;;  %7182 = vmatprep.subr.bf16.mxu1 %v9042_v32  ;;  %v837_v29 = vld [vmem:[%s10008_s6 + $0x12e8] sm:$0xff]  ;;  %v9079_v32 = vcombine.low %v824_v16, %v828_v17  ;;  %v9088_v37 = vcombine.high %v832_v26, %v836_v27 }
 0x14d   : > { %v9090_v38 = vcombine.high %v833_v28, %v837_v29  ;;  %v9089_v45 = vcombine.low %v833_v28, %v837_v29  ;;  %v880_v29 = vld [vmem:[%s10008_s6 + $0x1440] sm:$0xff] }
 0x14f   : > { %6759 = vmatpush1.bf16.msra.mxu0 %v9039_v40  ;;  %7183 = vmatpush1.bf16.msra.mxu1 %v9041_v35  ;;  %v844_v40 = vld [vmem:[%s10008_s6 + $0x1320] sm:$0xff]  ;;  %v841_v35 = vld [vmem:[%s10008_s6 + $0x1308] sm:$0xff] }
 0x150   : > { %6760 = vmatprep.subr.bf16.mxu0 %v9048_v41  ;;  %7184 = vmatprep.subr.bf16.mxu1 %v9050_v44  ;;  %v845_v41 = vld [vmem:[%s10008_s6 + $0x1328] sm:$0xff]  ;;  %v9087_v44 = vcombine.low %v832_v26, %v836_v27  ;;  %v9096_v46 = vcombine.high %v840_v39, %v844_v40 }
 0x151   : > { %v9098_v47 = vcombine.high %v841_v35, %v845_v41  ;;  %v9097_v52 = vcombine.low %v841_v35, %v845_v41 }
 0x153   : > { %6761 = vmatpush1.bf16.msra.mxu0 %v9047_v54  ;;  %7185 = vmatpush1.bf16.msra.mxu1 %v9049_v22  ;;  %v852_v54 = vld [vmem:[%s10008_s6 + $0x1360] sm:$0xff]  ;;  %v849_v22 = vld [vmem:[%s10008_s6 + $0x1348] sm:$0xff] }
 0x154   : > { %6762 = vmatprep.subr.bf16.mxu0 %v9056_v49  ;;  %7186 = vmatprep.subr.bf16.mxu1 %v9058_v51  ;;  %v853_v49 = vld [vmem:[%s10008_s6 + $0x1368] sm:$0xff]  ;;  %v9095_v51 = vcombine.low %v840_v39, %v844_v40  ;;  %v9104_v55 = vcombine.high %v848_v48, %v852_v54  ;;  %v220_v39 = vld [vmem:[%s11515_s0 + $0xa0] sm:$0xff] }
 0x155   : > { %v9106_v60 = vcombine.high %v849_v22, %v853_v49  ;;  %v9105_v4 = vcombine.low %v849_v22, %v853_v49  ;;  %v228_v40 = vld [vmem:[%s11515_s0 + $0xe0] sm:$0xff] }
 0x157   : > { %6763 = vmatpush1.bf16.msra.mxu0 %v9055_v62  ;;  %7187 = vmatpush1.bf16.msra.mxu1 %v9057_v63  ;;  %v860_v62 = vld [vmem:[%s10008_s6 + $0x13a0] sm:$0xff]  ;;  %v857_v63 = vld [vmem:[%s10008_s6 + $0x1388] sm:$0xff] }
 0x158   : > { %6764 = vmatprep.subr.bf16.mxu0 %v9064_v0  ;;  %7188 = vmatprep.subr.bf16.mxu1 %v9066_v3  ;;  %v861_v0 = vld [vmem:[%s10008_s6 + $0x13a8] sm:$0xff]  ;;  %v9103_v3 = vcombine.low %v848_v48, %v852_v54  ;;  %v9112_v8 = vcombine.high %v856_v61, %v860_v62 }
 0x159   : > { %v9114_v57 = vcombine.high %v857_v63, %v861_v0  ;;  %v9113_v16 = vcombine.low %v857_v63, %v861_v0  ;;  %v893_v48 = vld [vmem:[%s10008_s6 + $0x14a8] sm:$0xff] }
 0x15a   : > { %v10531_v63 = vld [vmem:[%s11515_s0 + $0x28] sm:$0xff] }
 0x15b   : > { %6765 = vmatpush1.bf16.msra.mxu0 %v9063_v9  ;;  %7189 = vmatpush1.bf16.msra.mxu1 %v9065_v11  ;;  %v868_v9 = vld [vmem:[%s10008_s6 + $0x13e0] sm:$0xff]  ;;  %v865_v11 = vld [vmem:[%s10008_s6 + $0x13c8] sm:$0xff] }
 0x15c   : > { %6766 = vmatprep.subr.bf16.mxu0 %v9072_v12  ;;  %7190 = vmatprep.subr.bf16.mxu1 %v9074_v14  ;;  %v869_v12 = vld [vmem:[%s10008_s6 + $0x13e8] sm:$0xff]  ;;  %v9111_v14 = vcombine.low %v856_v61, %v860_v62  ;;  %v9120_v17 = vcombine.high %v864_v59, %v868_v9  ;;  %v10526_v62 = vcombine.low %v220_v39, %v228_v40 }
 0x15d   : > { %v9122_v18 = vcombine.high %v865_v11, %v869_v12  ;;  %v9121_v26 = vcombine.low %v865_v11, %v869_v12  ;;  %v901_v61 = vld [vmem:[%s10008_s6 + $0x14e8] sm:$0xff] }
 0x15e   : > { %v10536_v0 = vld [vmem:[%s11515_s0 + $0x68] sm:$0xff] }
 0x15f   : > { %6767 = vmatpush1.bf16.msra.mxu0 %v9071_v20  ;;  %7191 = vmatpush1.bf16.msra.mxu1 %v9073_v21  ;;  %v876_v20 = vld [vmem:[%s10008_s6 + $0x1420] sm:$0xff]  ;;  %v873_v21 = vld [vmem:[%s10008_s6 + $0x1408] sm:$0xff]  ;;  %v10542_v11 = vcombine.high %v10531_v63, %v10536_v0 }
 0x160   : > { %6768 = vmatprep.subr.bf16.mxu0 %v9080_v24  ;;  %7192 = vmatprep.subr.bf16.mxu1 %v9082_v25  ;;  %v877_v24 = vld [vmem:[%s10008_s6 + $0x1428] sm:$0xff]  ;;  %v9119_v25 = vcombine.low %v864_v59, %v868_v9  ;;  %v9128_v27 = vcombine.high %v872_v19, %v876_v20  ;;  %v9127_v35 = vcombine.low %v872_v19, %v876_v20  ;;  %v904_v59 = vld [vmem:[%s10008_s6 + $0x1500] sm:$0xff] }
 0x161   : > { %v9130_v28 = vcombine.high %v873_v21, %v877_v24  ;;  %v9129_v41 = vcombine.low %v873_v21, %v877_v24  ;;  %v908_v9 = vld [vmem:[%s10008_s6 + $0x1520] sm:$0xff]  ;;  %v905_v12 = vld [vmem:[%s10008_s6 + $0x1508] sm:$0xff] }
 0x162   : > { %v912_v20 = vld [vmem:[%s10008_s6 + $0x1540] sm:$0xff]  ;;  %v913_v24 = vld [vmem:[%s10008_s6 + $0x1548] sm:$0xff] }
 0x163   : > { %6769 = vmatpush1.bf16.msra.mxu0 %v9079_v32  ;;  %7193 = vmatpush1.bf16.msra.mxu1 %v9081_v33  ;;  %v884_v32 = vld [vmem:[%s10008_s6 + $0x1460] sm:$0xff]  ;;  %v881_v33 = vld [vmem:[%s10008_s6 + $0x1448] sm:$0xff] }
 0x164   : > { %6770 = vmatprep.subr.bf16.mxu0 %v9088_v37  ;;  %7194 = vmatprep.subr.bf16.mxu1 %v9090_v38  ;;  %v10503_v37 = vcombine.low %v10431_v6, %v10436_v7  ;;  %v885_v38 = vld [vmem:[%s10008_s6 + $0x1468] sm:$0xff]  ;;  %v888_v7 = vld [vmem:[%s10008_s6 + $0x1480] sm:$0xff]  ;;  %v9135_v54 = vcombine.low %v880_v29, %v884_v32 }
 0x165   : > { %v9138_v6 = vcombine.high %v881_v33, %v885_v38  ;;  %v9137_v22 = vcombine.low %v881_v33, %v885_v38  ;;  %v916_v21 = vld [vmem:[%s10008_s6 + $0x1560] sm:$0xff]  ;;  %v921_v38 = vld [vmem:[%s10008_s6 + $0x1588] sm:$0xff] }
 0x166   : > { %v924_v33 = vld [vmem:[%s10008_s6 + $0x15a0] sm:$0xff] }
 0x167   : > { %6771 = vmatpush1.bf16.msra.mxu0 %v9087_v44  ;;  %7195 = vmatpush1.bf16.msra.mxu1 %v9089_v45  ;;  %v9136_v44 = vcombine.high %v880_v29, %v884_v32  ;;  %v892_v45 = vld [vmem:[%s10008_s6 + $0x14a0] sm:$0xff] }
 0x168   : > { %6772 = vmatprep.subr.bf16.mxu0 %v9096_v46  ;;  %7196 = vmatprep.subr.bf16.mxu1 %v9098_v47  ;;  %v10514_v46 = vcombine.high %v220_v39, %v228_v40  ;;  %v889_v47 = vld [vmem:[%s10008_s6 + $0x1488] sm:$0xff]  ;;  %v9144_v49 = vcombine.high %v888_v7, %v892_v45  ;;  %v920_v32 = vld [vmem:[%s10008_s6 + $0x1580] sm:$0xff]  ;;  %v9167_v40 = vcombine.low %v912_v20, %v916_v21 }
 0x169   : > { %v925_v39 = vld [vmem:[%s10008_s6 + $0x15a8] sm:$0xff] }
 0x16b   : > { %6773 = vmatpush1.bf16.msra.mxu0 %v9095_v51  ;;  %7197 = vmatpush1.bf16.msra.mxu1 %v9097_v52  ;;  %v9146_v51 = vcombine.high %v889_v47, %v893_v48  ;;  %v896_v52 = vld [vmem:[%s10008_s6 + $0x14c0] sm:$0xff] }
 0x16c   : > { %6774 = vmatprep.subr.bf16.mxu0 %v9104_v55  ;;  %7198 = vmatprep.subr.bf16.mxu1 %v9106_v60  ;;  %v900_v55 = vld [vmem:[%s10008_s6 + $0x14e0] sm:$0xff]  ;;  %v897_v60 = vld [vmem:[%s10008_s6 + $0x14c8] sm:$0xff] }
 0x16f   : > { %6775 = vmatpush1.bf16.msra.mxu0 %v9103_v3  ;;  %7199 = vmatpush1.bf16.msra.mxu1 %v9105_v4  ;;  %v9143_v3 = vcombine.low %v888_v7, %v892_v45  ;;  %v9145_v4 = vcombine.low %v889_v47, %v893_v48  ;;  %v932_v7 = vld [vmem:[%s10008_s6 + $0x15e0] sm:$0xff]  ;;  %v929_v45 = vld [vmem:[%s10008_s6 + $0x15c8] sm:$0xff]  ;;  %v9175_v48 = vcombine.low %v920_v32, %v924_v33 }
 0x170   : > { %6776 = vmatprep.subr.bf16.mxu0 %v9112_v8  ;;  %7200 = vmatprep.subr.bf16.mxu1 %v9114_v57  ;;  %v9152_v8 = vcombine.high %v896_v52, %v900_v55  ;;  %v9154_v57 = vcombine.high %v897_v60, %v901_v61  ;;  %v933_v47 = vld [vmem:[%s10008_s6 + $0x15e8] sm:$0xff] }
 0x173   : > { %6777 = vmatpush1.bf16.msra.mxu0 %v9111_v14  ;;  %7201 = vmatpush1.bf16.msra.mxu1 %v9113_v16  ;;  %v909_v14 = vld [vmem:[%s10008_s6 + $0x1528] sm:$0xff]  ;;  %v9151_v16 = vcombine.low %v896_v52, %v900_v55  ;;  %v940_v52 = vld [vmem:[%s10008_s6 + $0x1620] sm:$0xff] }
 0x174   : > { %6778 = vmatprep.subr.bf16.mxu0 %v9120_v17  ;;  %7202 = vmatprep.subr.bf16.mxu1 %v9122_v18  ;;  %v9153_v17 = vcombine.low %v897_v60, %v901_v61  ;;  %v9160_v18 = vcombine.high %v904_v59, %v908_v9  ;;  %v9162_v19 = vcombine.high %v905_v12, %v909_v14  ;;  %v937_v55 = vld [vmem:[%s10008_s6 + $0x1608] sm:$0xff] }
 0x175   : > { %v941_v60 = vld [vmem:[%s10008_s6 + $0x1628] sm:$0xff] }
 0x177   : > { %6779 = vmatpush1.bf16.msra.mxu0 %v9119_v25  ;;  %7203 = vmatpush1.bf16.msra.mxu1 %v9121_v26  ;;  %v917_v25 = vld [vmem:[%s10008_s6 + $0x1568] sm:$0xff]  ;;  %v9159_v26 = vcombine.low %v904_v59, %v908_v9  ;;  %v948_v59 = vld [vmem:[%s10008_s6 + $0x1660] sm:$0xff] }
 0x178   : > { %6801 = vmatprep.subr.bf16.mxu0 %v9128_v27  ;;  %7225 = vmatprep.subr.bf16.mxu1 %v9130_v28  ;;  %v9161_v27 = vcombine.low %v905_v12, %v909_v14  ;;  %v9168_v28 = vcombine.high %v912_v20, %v916_v21  ;;  %v9170_v29 = vcombine.high %v913_v24, %v917_v25  ;;  %v945_v9 = vld [vmem:[%s10008_s6 + $0x1648] sm:$0xff]  ;;  %v956_v20 = vld [vmem:[%s10008_s6 + $0x16a0] sm:$0xff] }
 0x179   : > { %v949_v12 = vld [vmem:[%s10008_s6 + $0x1668] sm:$0xff] }
 0x17a   : > { %6781 = vmatmul.mubr.bf16.vlgmr.msra.gmra.mrb[0].mxu0 %v10503_v37  ;;  %7205 = vmatmul.mubr.bf16.vlgmr.msra.gmra.mrb[0].mxu1 %v10503_v37  ;;  %v953_v21 = vld [vmem:[%s10008_s6 + $0x1688] sm:$0xff] }
 0x17b   : > { %6802 = vmatpush1.bf16.msra.mxu0 %v9127_v35  ;;  %7226 = vmatpush1.bf16.msra.mxu1 %v9129_v41  ;;  %v9169_v35 = vcombine.low %v913_v24, %v917_v25  ;;  %v9176_v41 = vcombine.high %v920_v32, %v924_v33  ;;  %v957_v24 = vld [vmem:[%s10008_s6 + $0x16a8] sm:$0xff]  ;;  %v964_v32 = vld [vmem:[%s10008_s6 + $0x16e0] sm:$0xff] }
 0x17c   : > { %6803 = vmatprep.subr.bf16.mxu0 %v9136_v44  ;;  %7227 = vmatprep.subr.bf16.mxu1 %v9138_v6  ;;  %v9178_v44 = vcombine.high %v921_v38, %v925_v39  ;;  %v928_v6 = vld [vmem:[%s10008_s6 + $0x15c0] sm:$0xff]  ;;  %v961_v33 = vld [vmem:[%s10008_s6 + $0x16c8] sm:$0xff] }
 0x17d   : > { %6790 = vmatprep.mubr.bf16.mxu0 %v10514_v46  ;;  %7214 = vmatprep.mubr.bf16.mxu1 %v10514_v46  ;;  %v9183_v61 = vcombine.low %v928_v6, %v932_v7 }
 0x17f   : > { %6804 = vmatpush1.bf16.msra.mxu0 %v9135_v54  ;;  %7228 = vmatpush1.bf16.msra.mxu1 %v9137_v22  ;;  %v9177_v54 = vcombine.low %v921_v38, %v925_v39  ;;  %v9184_v22 = vcombine.high %v928_v6, %v932_v7  ;;  %v965_v38 = vld [vmem:[%s10008_s6 + $0x16e8] sm:$0xff]  ;;  %v972_v6 = vld [vmem:[%s10008_s6 + $0x1720] sm:$0xff] }
 0x180   : > { %6805 = vmatprep.subr.bf16.mxu0 %v9144_v49  ;;  %7229 = vmatprep.subr.bf16.mxu1 %v9146_v51  ;;  %v9186_v49 = vcombine.high %v929_v45, %v933_v47  ;;  %v936_v51 = vld [vmem:[%s10008_s6 + $0x1600] sm:$0xff]  ;;  %v969_v7 = vld [vmem:[%s10008_s6 + $0x1708] sm:$0xff] }
 0x181   : > { %v9191_v14 = vcombine.low %v936_v51, %v940_v52 }
 0x182   : > { %6791 = vmatmul.mubr.bf16.gmra.mrb[4].mxu0 %v10526_v62  ;;  %7215 = vmatmul.mubr.bf16.gmra.mrb[4].mxu1 %v10526_v62 }
 0x183   : > { %6806 = vmatpush1.bf16.msra.mxu0 %v9143_v3  ;;  %7230 = vmatpush1.bf16.msra.mxu1 %v9145_v4  ;;  %v9185_v3 = vcombine.low %v929_v45, %v933_v47  ;;  %v9192_v4 = vcombine.high %v936_v51, %v940_v52  ;;  %v973_v45 = vld [vmem:[%s10008_s6 + $0x1728] sm:$0xff]  ;;  %v980_v51 = vld [vmem:[%s10008_s6 + $0x1760] sm:$0xff] }
 0x184   : > { %6807 = vmatprep.subr.bf16.mxu0 %v9152_v8  ;;  %7231 = vmatprep.subr.bf16.mxu1 %v9154_v57  ;;  %v9194_v8 = vcombine.high %v937_v55, %v941_v60  ;;  %v944_v57 = vld [vmem:[%s10008_s6 + $0x1640] sm:$0xff]  ;;  %v977_v52 = vld [vmem:[%s10008_s6 + $0x1748] sm:$0xff] }
 0x185   : > { %6833 = vmatprep.mubr.bf16.mxu0 %v10542_v11  ;;  %7257 = vmatprep.mubr.bf16.mxu1 %v10542_v11  ;;  %v9199_v25 = vcombine.low %v944_v57, %v948_v59 }
 0x187   : > { %6808 = vmatpush1.bf16.msra.mxu0 %v9151_v16  ;;  %7232 = vmatpush1.bf16.msra.mxu1 %v9153_v17  ;;  %v9193_v16 = vcombine.low %v937_v55, %v941_v60  ;;  %v9200_v17 = vcombine.high %v944_v57, %v948_v59  ;;  %v981_v55 = vld [vmem:[%s10008_s6 + $0x1768] sm:$0xff]  ;;  %v988_v57 = vld [vmem:[%s10008_s6 + $0x17a0] sm:$0xff] }
 0x188   : > { %6809 = vmatprep.subr.bf16.mxu0 %v9160_v18  ;;  %7233 = vmatprep.subr.bf16.mxu1 %v9162_v19  ;;  %v9202_v18 = vcombine.high %v945_v9, %v949_v12  ;;  %v952_v19 = vld [vmem:[%s10008_s6 + $0x1680] sm:$0xff]  ;;  %v985_v59 = vld [vmem:[%s10008_s6 + $0x1788] sm:$0xff] }
 0x189   : > { %v9207_v39 = vcombine.low %v952_v19, %v956_v20 }
 0x18b   : > { %6810 = vmatpush1.bf16.msra.mxu0 %v9159_v26  ;;  %7234 = vmatpush1.bf16.msra.mxu1 %v9161_v27  ;;  %v9201_v26 = vcombine.low %v945_v9, %v949_v12  ;;  %v9208_v27 = vcombine.high %v952_v19, %v956_v20  ;;  %v989_v9 = vld [vmem:[%s10008_s6 + $0x17a8] sm:$0xff]  ;;  %v996_v19 = vld [vmem:[%s10008_s6 + $0x17e0] sm:$0xff] }
 0x18c   : > { %6811 = vmatprep.subr.bf16.mxu0 %v9168_v28  ;;  %7235 = vmatprep.subr.bf16.mxu1 %v9170_v29  ;;  %v9210_v28 = vcombine.high %v953_v21, %v957_v24  ;;  %v960_v29 = vld [vmem:[%s10008_s6 + $0x16c0] sm:$0xff]  ;;  %v993_v20 = vld [vmem:[%s10008_s6 + $0x17c8] sm:$0xff] }
 0x18d   : > { %v9215_v47 = vcombine.low %v960_v29, %v964_v32 }
 0x18f   : > { %6812 = vmatpush1.bf16.msra.mxu0 %v9167_v40  ;;  %7236 = vmatpush1.bf16.msra.mxu1 %v9169_v35  ;;  %v9209_v40 = vcombine.low %v953_v21, %v957_v24  ;;  %v9216_v35 = vcombine.high %v960_v29, %v964_v32  ;;  %v997_v21 = vld [vmem:[%s10008_s6 + $0x17e8] sm:$0xff]  ;;  %v1004_v29 = vld [vmem:[%s10008_s6 + $0x1820] sm:$0xff] }
 0x190   : > { %6813 = vmatprep.subr.bf16.mxu0 %v9176_v41  ;;  %7237 = vmatprep.subr.bf16.mxu1 %v9178_v44  ;;  %v9218_v41 = vcombine.high %v961_v33, %v965_v38  ;;  %v968_v44 = vld [vmem:[%s10008_s6 + $0x1700] sm:$0xff]  ;;  %v1001_v32 = vld [vmem:[%s10008_s6 + $0x1808] sm:$0xff] }
 0x191   : > { %v9223_v60 = vcombine.low %v968_v44, %v972_v6 }
 0x193   : > { %6814 = vmatpush1.bf16.msra.mxu0 %v9175_v48  ;;  %7238 = vmatpush1.bf16.msra.mxu1 %v9177_v54  ;;  %v9217_v48 = vcombine.low %v961_v33, %v965_v38  ;;  %v9224_v54 = vcombine.high %v968_v44, %v972_v6  ;;  %v1005_v33 = vld [vmem:[%s10008_s6 + $0x1828] sm:$0xff]  ;;  %v1012_v44 = vld [vmem:[%s10008_s6 + $0x1860] sm:$0xff] }
 0x194   : > { %6815 = vmatprep.subr.bf16.mxu0 %v9184_v22  ;;  %7239 = vmatprep.subr.bf16.mxu1 %v9186_v49  ;;  %v9226_v22 = vcombine.high %v969_v7, %v973_v45  ;;  %v976_v49 = vld [vmem:[%s10008_s6 + $0x1740] sm:$0xff]  ;;  %v1009_v6 = vld [vmem:[%s10008_s6 + $0x1848] sm:$0xff] }
 0x195   : > { %v9231_v12 = vcombine.low %v976_v49, %v980_v51 }
 0x197   : > { %6816 = vmatpush1.bf16.msra.mxu0 %v9183_v61  ;;  %7240 = vmatpush1.bf16.msra.mxu1 %v9185_v3  ;;  %v9225_v61 = vcombine.low %v969_v7, %v973_v45  ;;  %v9232_v3 = vcombine.high %v976_v49, %v980_v51  ;;  %v10603_v7 = vcombine.low %v10531_v63, %v10536_v0  ;;  %v1013_v45 = vld [vmem:[%s10008_s6 + $0x1868] sm:$0xff]  ;;  %v1016_v0 = vld [vmem:[%s10008_s6 + $0x1880] sm:$0xff] }
 0x198   : > { %6817 = vmatprep.subr.bf16.mxu0 %v9192_v4  ;;  %7241 = vmatprep.subr.bf16.mxu1 %v9194_v8  ;;  %v9234_v4 = vcombine.high %v977_v52, %v981_v55  ;;  %v984_v8 = vld [vmem:[%s10008_s6 + $0x1780] sm:$0xff]  ;;  %v9266_v63 = vcombine.high %v1009_v6, %v1013_v45 }
 0x199   : > { %v9239_v24 = vcombine.low %v984_v8, %v988_v57  ;;  %v1020_v51 = vld [vmem:[%s10008_s6 + $0x18a0] sm:$0xff] }
 0x19b   : > { %6818 = vmatpush1.bf16.msra.mxu0 %v9191_v14  ;;  %7242 = vmatpush1.bf16.msra.mxu1 %v9193_v16  ;;  %v9233_v14 = vcombine.low %v977_v52, %v981_v55  ;;  %v9240_v16 = vcombine.high %v984_v8, %v988_v57  ;;  %v1017_v55 = vld [vmem:[%s10008_s6 + $0x1888] sm:$0xff]  ;;  %v1024_v57 = vld [vmem:[%s10008_s6 + $0x18c0] sm:$0xff] }
 0x19c   : > { %6819 = vmatprep.subr.bf16.mxu0 %v9200_v17  ;;  %7243 = vmatprep.subr.bf16.mxu1 %v9202_v18  ;;  %v9242_v17 = vcombine.high %v985_v59, %v989_v9  ;;  %v992_v18 = vld [vmem:[%s10008_s6 + $0x17c0] sm:$0xff] }
 0x19d   : > { %v9247_v38 = vcombine.low %v992_v18, %v996_v19 }
 0x19f   : > { %6820 = vmatpush1.bf16.msra.mxu0 %v9199_v25  ;;  %7244 = vmatpush1.bf16.msra.mxu1 %v9201_v26  ;;  %v9241_v25 = vcombine.low %v985_v59, %v989_v9  ;;  %v9248_v26 = vcombine.high %v992_v18, %v996_v19  ;;  %v1028_v59 = vld [vmem:[%s10008_s6 + $0x18e0] sm:$0xff]  ;;  %v1025_v9 = vld [vmem:[%s10008_s6 + $0x18c8] sm:$0xff]  ;;  %v9271_v18 = vcombine.low %v1016_v0, %v1020_v51 }
 0x1a0   : > { %6821 = vmatprep.subr.bf16.mxu0 %v9208_v27  ;;  %7245 = vmatprep.subr.bf16.mxu1 %v9210_v28  ;;  %v9250_v27 = vcombine.high %v993_v20, %v997_v21  ;;  %v1000_v28 = vld [vmem:[%s10008_s6 + $0x1800] sm:$0xff] }
 0x1a3   : > { %6822 = vmatpush1.bf16.msra.mxu0 %v9207_v39  ;;  %7246 = vmatpush1.bf16.msra.mxu1 %v9209_v40  ;;  %v9249_v39 = vcombine.low %v993_v20, %v997_v21  ;;  %v9256_v40 = vcombine.high %v1000_v28, %v1004_v29  ;;  %v9280_v20 = vcombine.high %v1024_v57, %v1028_v59 }
 0x1a4   : > { %6823 = vmatprep.subr.bf16.mxu0 %v9216_v35  ;;  %7247 = vmatprep.subr.bf16.mxu1 %v9218_v41  ;;  %v9258_v35 = vcombine.high %v1001_v32, %v1005_v33  ;;  %v1008_v41 = vld [vmem:[%s10008_s6 + $0x1840] sm:$0xff] }
 0x1a5   : > { %v9264_v49 = vcombine.high %v1008_v41, %v1012_v44 }
 0x1a7   : > { %6824 = vmatpush1.bf16.msra.mxu0 %v9215_v47  ;;  %7248 = vmatpush1.bf16.msra.mxu1 %v9217_v48  ;;  %v221_v47 = vld [vmem:[%s11515_s0 + $0xa8] sm:$0xff] }
 0x1a8   : > { %6825 = vmatprep.subr.bf16.mxu0 %v9224_v54  ;;  %7249 = vmatprep.subr.bf16.mxu1 %v9226_v22  ;;  %v229_v48 = vld [vmem:[%s11515_s0 + $0xe8] sm:$0xff]  ;;  %v9255_v54 = vcombine.low %v1000_v28, %v1004_v29  ;;  %v9257_v22 = vcombine.low %v1001_v32, %v1005_v33  ;;  %v9279_v29 = vcombine.low %v1024_v57, %v1028_v59 }
 0x1a9   : > { %v10614_v52 = vcombine.high %v221_v47, %v229_v48  ;;  %v1037_v28 = vld [vmem:[%s10008_s6 + $0x1928] sm:$0xff] }
 0x1ab   : > { %6826 = vmatpush1.bf16.msra.mxu0 %v9223_v60  ;;  %7250 = vmatpush1.bf16.msra.mxu1 %v9225_v61  ;;  %v1021_v60 = vld [vmem:[%s10008_s6 + $0x18a8] sm:$0xff]  ;;  %v9263_v61 = vcombine.low %v1008_v41, %v1012_v44 }
 0x1ac   : > { %6827 = vmatprep.subr.bf16.mxu0 %v9232_v3  ;;  %7251 = vmatprep.subr.bf16.mxu1 %v9234_v4  ;;  %v9265_v3 = vcombine.low %v1009_v6, %v1013_v45  ;;  %v9272_v4 = vcombine.high %v1016_v0, %v1020_v51  ;;  %v9274_v8 = vcombine.high %v1017_v55, %v1021_v60  ;;  %v1045_v41 = vld [vmem:[%s10008_s6 + $0x1968] sm:$0xff] }
 0x1ad   : > { %v9273_v19 = vcombine.low %v1017_v55, %v1021_v60  ;;  %v1056_v60 = vld [vmem:[%s10008_s6 + $0x19c0] sm:$0xff] }
 0x1af   : > { %6828 = vmatpush1.bf16.msra.mxu0 %v9231_v12  ;;  %7252 = vmatpush1.bf16.msra.mxu1 %v9233_v14  ;;  %v1029_v12 = vld [vmem:[%s10008_s6 + $0x18e8] sm:$0xff]  ;;  %v10626_v14 = vcombine.low %v221_v47, %v229_v48  ;;  %v1048_v48 = vld [vmem:[%s10008_s6 + $0x1980] sm:$0xff] }
 0x1b0   : > { %6829 = vmatprep.subr.bf16.mxu0 %v9240_v16  ;;  %7253 = vmatprep.subr.bf16.mxu1 %v9242_v17  ;;  %v10631_v16 = vld [vmem:[%s11515_s0 + $0x30] sm:$0xff]  ;;  %v9282_v21 = vcombine.high %v1025_v9, %v1029_v12  ;;  %v9281_v32 = vcombine.low %v1025_v9, %v1029_v12  ;;  %v1064_v12 = vld [vmem:[%s10008_s6 + $0x1a00] sm:$0xff] }
 0x1b1   : > { %v10636_v17 = vld [vmem:[%s11515_s0 + $0x70] sm:$0xff] }
 0x1b3   : > { %6830 = vmatpush1.bf16.msra.mxu0 %v9239_v24  ;;  %7254 = vmatpush1.bf16.msra.mxu1 %v9241_v25  ;;  %v1032_v24 = vld [vmem:[%s10008_s6 + $0x1900] sm:$0xff] }
 0x1b4   : > { %6831 = vmatprep.subr.bf16.mxu0 %v9248_v26  ;;  %7255 = vmatprep.subr.bf16.mxu1 %v9250_v27  ;;  %v1036_v25 = vld [vmem:[%s10008_s6 + $0x1920] sm:$0xff]  ;;  %v10642_v26 = vcombine.high %v10631_v16, %v10636_v17  ;;  %v1033_v27 = vld [vmem:[%s10008_s6 + $0x1908] sm:$0xff] }
 0x1b5   : > { %v9288_v33 = vcombine.high %v1032_v24, %v1036_v25  ;;  %v9287_v44 = vcombine.low %v1032_v24, %v1036_v25  ;;  %v9289_v6 = vcombine.low %v1033_v27, %v1037_v28 }
 0x1b7   : > { %6832 = vmatpush1.bf16.msra.mxu0 %v9247_v38  ;;  %7256 = vmatpush1.bf16.msra.mxu1 %v9249_v39  ;;  %v9290_v38 = vcombine.high %v1033_v27, %v1037_v28  ;;  %v1040_v39 = vld [vmem:[%s10008_s6 + $0x1940] sm:$0xff] }
 0x1b8   : > { %6854 = vmatprep.subr.bf16.mxu0 %v9256_v40  ;;  %7278 = vmatprep.subr.bf16.mxu1 %v9258_v35  ;;  %v1044_v40 = vld [vmem:[%s10008_s6 + $0x1960] sm:$0xff]  ;;  %v1041_v35 = vld [vmem:[%s10008_s6 + $0x1948] sm:$0xff] }
 0x1b9   : > { %v9296_v45 = vcombine.high %v1040_v39, %v1044_v40  ;;  %v9298_v47 = vcombine.high %v1041_v35, %v1045_v41  ;;  %v9297_v0 = vcombine.low %v1041_v35, %v1045_v41  ;;  %v1072_v28 = vld [vmem:[%s10008_s6 + $0x1a40] sm:$0xff] }
 0x1ba   : > { %6834 = vmatmul.mubr.bf16.vlgmr.msra.gmra.mrb[0].mxu0 %v10603_v7  ;;  %7258 = vmatmul.mubr.bf16.vlgmr.msra.gmra.mrb[0].mxu1 %v10603_v7  ;;  %v1080_v41 = vld [vmem:[%s10008_s6 + $0x1a80] sm:$0xff] }
 0x1bb   : > { %6855 = vmatpush1.bf16.msra.mxu0 %v9255_v54  ;;  %7279 = vmatpush1.bf16.msra.mxu1 %v9257_v22  ;;  %v1052_v54 = vld [vmem:[%s10008_s6 + $0x19a0] sm:$0xff]  ;;  %v1049_v22 = vld [vmem:[%s10008_s6 + $0x1988] sm:$0xff] }
 0x1bc   : > { %6856 = vmatprep.subr.bf16.mxu0 %v9264_v49  ;;  %7280 = vmatprep.subr.bf16.mxu1 %v9266_v63  ;;  %v1053_v49 = vld [vmem:[%s10008_s6 + $0x19a8] sm:$0xff]  ;;  %v9295_v63 = vcombine.low %v1040_v39, %v1044_v40  ;;  %v9304_v51 = vcombine.high %v1048_v48, %v1052_v54 }
 0x1bd   : > { %6843 = vmatprep.mubr.bf16.mxu0 %v10614_v52  ;;  %7267 = vmatprep.mubr.bf16.mxu1 %v10614_v52  ;;  %v9306_v55 = vcombine.high %v1049_v22, %v1053_v49  ;;  %v9305_v57 = vcombine.low %v1049_v22, %v1053_v49  ;;  %v1088_v49 = vld [vmem:[%s10008_s6 + $0x1ac0] sm:$0xff] }
 0x1bf   : > { %6857 = vmatpush1.bf16.msra.mxu0 %v9263_v61  ;;  %7281 = vmatpush1.bf16.msra.mxu1 %v9265_v3  ;;  %v1060_v61 = vld [vmem:[%s10008_s6 + $0x19e0] sm:$0xff]  ;;  %v1057_v3 = vld [vmem:[%s10008_s6 + $0x19c8] sm:$0xff] }
 0x1c0   : > { %6858 = vmatprep.subr.bf16.mxu0 %v9272_v4  ;;  %7282 = vmatprep.subr.bf16.mxu1 %v9274_v8  ;;  %v1061_v4 = vld [vmem:[%s10008_s6 + $0x19e8] sm:$0xff]  ;;  %v9303_v8 = vcombine.low %v1048_v48, %v1052_v54  ;;  %v9312_v59 = vcombine.high %v1056_v60, %v1060_v61 }
 0x1c1   : > { %v9314_v9 = vcombine.high %v1057_v3, %v1061_v4  ;;  %v9313_v24 = vcombine.low %v1057_v3, %v1061_v4  ;;  %v1096_v4 = vld [vmem:[%s10008_s6 + $0x1b00] sm:$0xff] }
 0x1c2   : > { %6844 = vmatmul.mubr.bf16.gmra.mrb[4].mxu0 %v10626_v14  ;;  %7268 = vmatmul.mubr.bf16.gmra.mrb[4].mxu1 %v10626_v14 }
 0x1c3   : > { %6859 = vmatpush1.bf16.msra.mxu0 %v9271_v18  ;;  %7283 = vmatpush1.bf16.msra.mxu1 %v9273_v19  ;;  %v1068_v18 = vld [vmem:[%s10008_s6 + $0x1a20] sm:$0xff]  ;;  %v1065_v19 = vld [vmem:[%s10008_s6 + $0x1a08] sm:$0xff] }
 0x1c4   : > { %6860 = vmatprep.subr.bf16.mxu0 %v9280_v20  ;;  %7284 = vmatprep.subr.bf16.mxu1 %v9282_v21  ;;  %v1069_v20 = vld [vmem:[%s10008_s6 + $0x1a28] sm:$0xff]  ;;  %v9311_v21 = vcombine.low %v1056_v60, %v1060_v61  ;;  %v9320_v25 = vcombine.high %v1064_v12, %v1068_v18 }
 0x1c5   : > { %6886 = vmatprep.mubr.bf16.mxu0 %v10642_v26  ;;  %7310 = vmatprep.mubr.bf16.mxu1 %v10642_v26  ;;  %v9322_v27 = vcombine.high %v1065_v19, %v1069_v20  ;;  %v9321_v39 = vcombine.low %v1065_v19, %v1069_v20  ;;  %v1104_v20 = vld [vmem:[%s10008_s6 + $0x1b40] sm:$0xff] }
 0x1c7   : > { %6861 = vmatpush1.bf16.msra.mxu0 %v9279_v29  ;;  %7285 = vmatpush1.bf16.msra.mxu1 %v9281_v32  ;;  %v1076_v29 = vld [vmem:[%s10008_s6 + $0x1a60] sm:$0xff]  ;;  %v1073_v32 = vld [vmem:[%s10008_s6 + $0x1a48] sm:$0xff] }
 0x1c8   : > { %6862 = vmatprep.subr.bf16.mxu0 %v9288_v33  ;;  %7286 = vmatprep.subr.bf16.mxu1 %v9290_v38  ;;  %v1077_v33 = vld [vmem:[%s10008_s6 + $0x1a68] sm:$0xff]  ;;  %v9319_v38 = vcombine.low %v1064_v12, %v1068_v18  ;;  %v9328_v40 = vcombine.high %v1072_v28, %v1076_v29 }
 0x1c9   : > { %v9330_v35 = vcombine.high %v1073_v32, %v1077_v33  ;;  %v9329_v48 = vcombine.low %v1073_v32, %v1077_v33  ;;  %v1112_v33 = vld [vmem:[%s10008_s6 + $0x1b80] sm:$0xff] }
 0x1cb   : > { %6863 = vmatpush1.bf16.msra.mxu0 %v9287_v44  ;;  %7287 = vmatpush1.bf16.msra.mxu1 %v9289_v6  ;;  %v1084_v44 = vld [vmem:[%s10008_s6 + $0x1aa0] sm:$0xff]  ;;  %v1081_v6 = vld [vmem:[%s10008_s6 + $0x1a88] sm:$0xff] }
 0x1cc   : > { %6864 = vmatprep.subr.bf16.mxu0 %v9296_v45  ;;  %7288 = vmatprep.subr.bf16.mxu1 %v9298_v47  ;;  %v1085_v45 = vld [vmem:[%s10008_s6 + $0x1aa8] sm:$0xff]  ;;  %v9327_v47 = vcombine.low %v1072_v28, %v1076_v29  ;;  %v9336_v54 = vcombine.high %v1080_v41, %v1084_v44 }
 0x1cd   : > { %v9338_v22 = vcombine.high %v1081_v6, %v1085_v45  ;;  %v9337_v60 = vcombine.low %v1081_v6, %v1085_v45  ;;  %v1120_v45 = vld [vmem:[%s10008_s6 + $0x1bc0] sm:$0xff] }
 0x1cf   : > { %6865 = vmatpush1.bf16.msra.mxu0 %v9295_v63  ;;  %7289 = vmatpush1.bf16.msra.mxu1 %v9297_v0  ;;  %v1092_v63 = vld [vmem:[%s10008_s6 + $0x1ae0] sm:$0xff]  ;;  %v1089_v0 = vld [vmem:[%s10008_s6 + $0x1ac8] sm:$0xff] }
 0x1d0   : > { %6866 = vmatprep.subr.bf16.mxu0 %v9304_v51  ;;  %7290 = vmatprep.subr.bf16.mxu1 %v9306_v55  ;;  %v1093_v51 = vld [vmem:[%s10008_s6 + $0x1ae8] sm:$0xff]  ;;  %v9335_v55 = vcombine.low %v1080_v41, %v1084_v44  ;;  %v9344_v61 = vcombine.high %v1088_v49, %v1092_v63 }
 0x1d1   : > { %v9346_v3 = vcombine.high %v1089_v0, %v1093_v51  ;;  %v9345_v12 = vcombine.low %v1089_v0, %v1093_v51  ;;  %v1128_v51 = vld [vmem:[%s10008_s6 + $0x1c00] sm:$0xff] }
 0x1d3   : > { %6867 = vmatpush1.bf16.msra.mxu0 %v9303_v8  ;;  %7291 = vmatpush1.bf16.msra.mxu1 %v9305_v57  ;;  %v1100_v8 = vld [vmem:[%s10008_s6 + $0x1b20] sm:$0xff]  ;;  %v1097_v57 = vld [vmem:[%s10008_s6 + $0x1b08] sm:$0xff] }
 0x1d4   : > { %6868 = vmatprep.subr.bf16.mxu0 %v9312_v59  ;;  %7292 = vmatprep.subr.bf16.mxu1 %v9314_v9  ;;  %v1101_v59 = vld [vmem:[%s10008_s6 + $0x1b28] sm:$0xff]  ;;  %v9343_v9 = vcombine.low %v1088_v49, %v1092_v63  ;;  %v9352_v18 = vcombine.high %v1096_v4, %v1100_v8 }
 0x1d5   : > { %v9354_v19 = vcombine.high %v1097_v57, %v1101_v59  ;;  %v9353_v28 = vcombine.low %v1097_v57, %v1101_v59  ;;  %v1136_v59 = vld [vmem:[%s10008_s6 + $0x1c40] sm:$0xff] }
 0x1d7   : > { %6869 = vmatpush1.bf16.msra.mxu0 %v9311_v21  ;;  %7293 = vmatpush1.bf16.msra.mxu1 %v9313_v24  ;;  %v1108_v21 = vld [vmem:[%s10008_s6 + $0x1b60] sm:$0xff]  ;;  %v1105_v24 = vld [vmem:[%s10008_s6 + $0x1b48] sm:$0xff] }
 0x1d8   : > { %6870 = vmatprep.subr.bf16.mxu0 %v9320_v25  ;;  %7294 = vmatprep.subr.bf16.mxu1 %v9322_v27  ;;  %v1109_v25 = vld [vmem:[%s10008_s6 + $0x1b68] sm:$0xff]  ;;  %v9351_v27 = vcombine.low %v1096_v4, %v1100_v8  ;;  %v9360_v29 = vcombine.high %v1104_v20, %v1108_v21 }
 0x1d9   : > { %v9362_v32 = vcombine.high %v1105_v24, %v1109_v25  ;;  %v9361_v41 = vcombine.low %v1105_v24, %v1109_v25 }
 0x1db   : > { %6871 = vmatpush1.bf16.msra.mxu0 %v9319_v38  ;;  %7295 = vmatpush1.bf16.msra.mxu1 %v9321_v39  ;;  %v1116_v38 = vld [vmem:[%s10008_s6 + $0x1ba0] sm:$0xff]  ;;  %v1113_v39 = vld [vmem:[%s10008_s6 + $0x1b88] sm:$0xff] }
 0x1dc   : > { %6872 = vmatprep.subr.bf16.mxu0 %v9328_v40  ;;  %7296 = vmatprep.subr.bf16.mxu1 %v9330_v35  ;;  %v1117_v40 = vld [vmem:[%s10008_s6 + $0x1ba8] sm:$0xff]  ;;  %v9359_v35 = vcombine.low %v1104_v20, %v1108_v21  ;;  %v9368_v44 = vcombine.high %v1112_v33, %v1116_v38  ;;  %v222_v20 = vld [vmem:[%s11515_s0 + $0xb0] sm:$0xff] }
 0x1dd   : > { %v9370_v6 = vcombine.high %v1113_v39, %v1117_v40  ;;  %v9369_v49 = vcombine.low %v1113_v39, %v1117_v40  ;;  %v230_v21 = vld [vmem:[%s11515_s0 + $0xf0] sm:$0xff] }
 0x1df   : > { %6873 = vmatpush1.bf16.msra.mxu0 %v9327_v47  ;;  %7297 = vmatpush1.bf16.msra.mxu1 %v9329_v48  ;;  %v1124_v47 = vld [vmem:[%s10008_s6 + $0x1be0] sm:$0xff]  ;;  %v1121_v48 = vld [vmem:[%s10008_s6 + $0x1bc8] sm:$0xff] }
 0x1e0   : > { %6874 = vmatprep.subr.bf16.mxu0 %v9336_v54  ;;  %7298 = vmatprep.subr.bf16.mxu1 %v9338_v22  ;;  %v1125_v54 = vld [vmem:[%s10008_s6 + $0x1be8] sm:$0xff]  ;;  %v9367_v22 = vcombine.low %v1112_v33, %v1116_v38  ;;  %v9376_v63 = vcombine.high %v1120_v45, %v1124_v47 }
 0x1e1   : > { %v9378_v0 = vcombine.high %v1121_v48, %v1125_v54  ;;  %v9377_v4 = vcombine.low %v1121_v48, %v1125_v54  ;;  %v1149_v33 = vld [vmem:[%s10008_s6 + $0x1ca8] sm:$0xff]  ;;  %v10731_v48 = vld [vmem:[%s11515_s0 + $0x38] sm:$0xff] }
 0x1e2   : > { %v10736_v54 = vld [vmem:[%s11515_s0 + $0x78] sm:$0xff] }
 0x1e3   : > { %6875 = vmatpush1.bf16.msra.mxu0 %v9335_v55  ;;  %7299 = vmatpush1.bf16.msra.mxu1 %v9337_v60  ;;  %v1132_v55 = vld [vmem:[%s10008_s6 + $0x1c20] sm:$0xff]  ;;  %v1129_v60 = vld [vmem:[%s10008_s6 + $0x1c08] sm:$0xff] }
 0x1e4   : > { %6876 = vmatprep.subr.bf16.mxu0 %v9344_v61  ;;  %7300 = vmatprep.subr.bf16.mxu1 %v9346_v3  ;;  %v1133_v61 = vld [vmem:[%s10008_s6 + $0x1c28] sm:$0xff]  ;;  %v9375_v3 = vcombine.low %v1120_v45, %v1124_v47  ;;  %v9384_v8 = vcombine.high %v1128_v51, %v1132_v55  ;;  %v9383_v24 = vcombine.low %v1128_v51, %v1132_v55  ;;  %v1160_v51 = vld [vmem:[%s10008_s6 + $0x1d00] sm:$0xff] }
 0x1e5   : > { %v9386_v57 = vcombine.high %v1129_v60, %v1133_v61  ;;  %v9385_v25 = vcombine.low %v1129_v60, %v1133_v61  ;;  %v1157_v45 = vld [vmem:[%s10008_s6 + $0x1ce8] sm:$0xff]  ;;  %v10726_v47 = vcombine.low %v222_v20, %v230_v21  ;;  %v1164_v55 = vld [vmem:[%s10008_s6 + $0x1d20] sm:$0xff]  ;;  %v10742_v60 = vcombine.high %v10731_v48, %v10736_v54 }
 0x1e6   : > { %v1161_v61 = vld [vmem:[%s10008_s6 + $0x1d08] sm:$0xff] }
 0x1e7   : > { %6877 = vmatpush1.bf16.msra.mxu0 %v9343_v9  ;;  %7301 = vmatpush1.bf16.msra.mxu1 %v9345_v12  ;;  %v1140_v9 = vld [vmem:[%s10008_s6 + $0x1c60] sm:$0xff]  ;;  %v1137_v12 = vld [vmem:[%s10008_s6 + $0x1c48] sm:$0xff] }
 0x1e8   : > { %6878 = vmatprep.subr.bf16.mxu0 %v9352_v18  ;;  %7302 = vmatprep.subr.bf16.mxu1 %v9354_v19  ;;  %v10703_v18 = vcombine.low %v10631_v16, %v10636_v17  ;;  %v1141_v19 = vld [vmem:[%s10008_s6 + $0x1c68] sm:$0xff]  ;;  %v1144_v17 = vld [vmem:[%s10008_s6 + $0x1c80] sm:$0xff]  ;;  %v9391_v38 = vcombine.low %v1136_v59, %v1140_v9 }
 0x1e9   : > { %v9394_v16 = vcombine.high %v1137_v12, %v1141_v19  ;;  %v9393_v39 = vcombine.low %v1137_v12, %v1141_v19  ;;  %v1172_v12 = vld [vmem:[%s10008_s6 + $0x1d60] sm:$0xff]  ;;  %v1169_v19 = vld [vmem:[%s10008_s6 + $0x1d48] sm:$0xff] }
 0x1eb   : > { %6879 = vmatpush1.bf16.msra.mxu0 %v9351_v27  ;;  %7303 = vmatpush1.bf16.msra.mxu1 %v9353_v28  ;;  %v9392_v27 = vcombine.high %v1136_v59, %v1140_v9  ;;  %v1148_v28 = vld [vmem:[%s10008_s6 + $0x1ca0] sm:$0xff] }
 0x1ec   : > { %6880 = vmatprep.subr.bf16.mxu0 %v9360_v29  ;;  %7304 = vmatprep.subr.bf16.mxu1 %v9362_v32  ;;  %v10714_v29 = vcombine.high %v222_v20, %v230_v21  ;;  %v1145_v32 = vld [vmem:[%s10008_s6 + $0x1c88] sm:$0xff]  ;;  %v9400_v40 = vcombine.high %v1144_v17, %v1148_v28  ;;  %v1168_v9 = vld [vmem:[%s10008_s6 + $0x1d40] sm:$0xff]  ;;  %v9415_v21 = vcombine.low %v1160_v51, %v1164_v55 }
 0x1ed   : > { %v1173_v20 = vld [vmem:[%s10008_s6 + $0x1d68] sm:$0xff] }
 0x1ef   : > { %6881 = vmatpush1.bf16.msra.mxu0 %v9359_v35  ;;  %7305 = vmatpush1.bf16.msra.mxu1 %v9361_v41  ;;  %v9402_v35 = vcombine.high %v1145_v32, %v1149_v33  ;;  %v1152_v41 = vld [vmem:[%s10008_s6 + $0x1cc0] sm:$0xff] }
 0x1f0   : > { %6882 = vmatprep.subr.bf16.mxu0 %v9368_v44  ;;  %7306 = vmatprep.subr.bf16.mxu1 %v9370_v6  ;;  %v1156_v44 = vld [vmem:[%s10008_s6 + $0x1ce0] sm:$0xff]  ;;  %v1153_v6 = vld [vmem:[%s10008_s6 + $0x1cc8] sm:$0xff] }
 0x1f3   : > { %6883 = vmatpush1.bf16.msra.mxu0 %v9367_v22  ;;  %7307 = vmatpush1.bf16.msra.mxu1 %v9369_v49  ;;  %v9399_v22 = vcombine.low %v1144_v17, %v1148_v28  ;;  %v9401_v49 = vcombine.low %v1145_v32, %v1149_v33  ;;  %v1180_v17 = vld [vmem:[%s10008_s6 + $0x1da0] sm:$0xff]  ;;  %v1177_v28 = vld [vmem:[%s10008_s6 + $0x1d88] sm:$0xff]  ;;  %v9423_v33 = vcombine.low %v1168_v9, %v1172_v12 }
 0x1f4   : > { %6884 = vmatprep.subr.bf16.mxu0 %v9376_v63  ;;  %7308 = vmatprep.subr.bf16.mxu1 %v9378_v0  ;;  %v9408_v63 = vcombine.high %v1152_v41, %v1156_v44  ;;  %v9410_v0 = vcombine.high %v1153_v6, %v1157_v45  ;;  %v1181_v32 = vld [vmem:[%s10008_s6 + $0x1da8] sm:$0xff] }
 0x1f7   : > { %6885 = vmatpush1.bf16.msra.mxu0 %v9375_v3  ;;  %7309 = vmatpush1.bf16.msra.mxu1 %v9377_v4  ;;  %v1165_v3 = vld [vmem:[%s10008_s6 + $0x1d28] sm:$0xff]  ;;  %v9407_v4 = vcombine.low %v1152_v41, %v1156_v44  ;;  %v1188_v41 = vld [vmem:[%s10008_s6 + $0x1de0] sm:$0xff] }
 0x1f8   : > { %6907 = vmatprep.subr.bf16.mxu0 %v9384_v8  ;;  %7331 = vmatprep.subr.bf16.mxu1 %v9386_v57  ;;  %v9409_v8 = vcombine.low %v1153_v6, %v1157_v45  ;;  %v9416_v57 = vcombine.high %v1160_v51, %v1164_v55  ;;  %v9418_v59 = vcombine.high %v1161_v61, %v1165_v3  ;;  %v1185_v44 = vld [vmem:[%s10008_s6 + $0x1dc8] sm:$0xff]  ;;  %v1196_v51 = vld [vmem:[%s10008_s6 + $0x1e20] sm:$0xff] }
 0x1f9   : > { %v1189_v6 = vld [vmem:[%s10008_s6 + $0x1de8] sm:$0xff] }
 0x1fa   : > { %6887 = vmatmul.mubr.bf16.vlgmr.msra.gmra.mrb[0].mxu0 %v10703_v18  ;;  %7311 = vmatmul.mubr.bf16.vlgmr.msra.gmra.mrb[0].mxu1 %v10703_v18  ;;  %v1193_v55 = vld [vmem:[%s10008_s6 + $0x1e08] sm:$0xff] }
 0x1fb   : > { %6908 = vmatpush1.bf16.msra.mxu0 %v9383_v24  ;;  %7332 = vmatpush1.bf16.msra.mxu1 %v9385_v25  ;;  %v9417_v24 = vcombine.low %v1161_v61, %v1165_v3  ;;  %v9424_v25 = vcombine.high %v1168_v9, %v1172_v12  ;;  %v1197_v61 = vld [vmem:[%s10008_s6 + $0x1e28] sm:$0xff]  ;;  %v1204_v9 = vld [vmem:[%s10008_s6 + $0x1e60] sm:$0xff] }
 0x1fc   : > { %6909 = vmatprep.subr.bf16.mxu0 %v9392_v27  ;;  %7333 = vmatprep.subr.bf16.mxu1 %v9394_v16  ;;  %v9426_v27 = vcombine.high %v1169_v19, %v1173_v20  ;;  %v1176_v16 = vld [vmem:[%s10008_s6 + $0x1d80] sm:$0xff]  ;;  %v1201_v12 = vld [vmem:[%s10008_s6 + $0x1e48] sm:$0xff] }
 0x1fd   : > { %6896 = vmatprep.mubr.bf16.mxu0 %v10714_v29  ;;  %7320 = vmatprep.mubr.bf16.mxu1 %v10714_v29  ;;  %v9431_v45 = vcombine.low %v1176_v16, %v1180_v17 }
 0x1ff   : > { %6910 = vmatpush1.bf16.msra.mxu0 %v9391_v38  ;;  %7334 = vmatpush1.bf16.msra.mxu1 %v9393_v39  ;;  %v9425_v38 = vcombine.low %v1169_v19, %v1173_v20  ;;  %v9432_v39 = vcombine.high %v1176_v16, %v1180_v17  ;;  %v1205_v19 = vld [vmem:[%s10008_s6 + $0x1e68] sm:$0xff]  ;;  %v1212_v16 = vld [vmem:[%s10008_s6 + $0x1ea0] sm:$0xff] }
 0x200   : > { %6911 = vmatprep.subr.bf16.mxu0 %v9400_v40  ;;  %7335 = vmatprep.subr.bf16.mxu1 %v9402_v35  ;;  %v9434_v40 = vcombine.high %v1177_v28, %v1181_v32  ;;  %v1184_v35 = vld [vmem:[%s10008_s6 + $0x1dc0] sm:$0xff]  ;;  %v1209_v17 = vld [vmem:[%s10008_s6 + $0x1e88] sm:$0xff] }
 0x201   : > { %v9439_v3 = vcombine.low %v1184_v35, %v1188_v41 }
 0x202   : > { %6897 = vmatmul.mubr.bf16.gmra.mrb[4].mxu0 %v10726_v47  ;;  %7321 = vmatmul.mubr.bf16.gmra.mrb[4].mxu1 %v10726_v47 }
 0x203   : > { %6912 = vmatpush1.bf16.msra.mxu0 %v9399_v22  ;;  %7336 = vmatpush1.bf16.msra.mxu1 %v9401_v49  ;;  %v9433_v22 = vcombine.low %v1177_v28, %v1181_v32  ;;  %v9440_v49 = vcombine.high %v1184_v35, %v1188_v41  ;;  %v1213_v28 = vld [vmem:[%s10008_s6 + $0x1ea8] sm:$0xff]  ;;  %v1220_v35 = vld [vmem:[%s10008_s6 + $0x1ee0] sm:$0xff] }
 0x204   : > { %6913 = vmatprep.subr.bf16.mxu0 %v9408_v63  ;;  %7337 = vmatprep.subr.bf16.mxu1 %v9410_v0  ;;  %v9442_v63 = vcombine.high %v1185_v44, %v1189_v6  ;;  %v1192_v0 = vld [vmem:[%s10008_s6 + $0x1e00] sm:$0xff]  ;;  %v1217_v41 = vld [vmem:[%s10008_s6 + $0x1ec8] sm:$0xff] }
 0x205   : > { %6939 = vmatprep.mubr.bf16.mxu0 %v10742_v60  ;;  %7363 = vmatprep.mubr.bf16.mxu1 %v10742_v60  ;;  %v9447_v20 = vcombine.low %v1192_v0, %v1196_v51 }
 0x207   : > { %6914 = vmatpush1.bf16.msra.mxu0 %v9407_v4  ;;  %7338 = vmatpush1.bf16.msra.mxu1 %v9409_v8  ;;  %v9441_v4 = vcombine.low %v1185_v44, %v1189_v6  ;;  %v9448_v8 = vcombine.high %v1192_v0, %v1196_v51  ;;  %v1221_v44 = vld [vmem:[%s10008_s6 + $0x1ee8] sm:$0xff]  ;;  %v1228_v0 = vld [vmem:[%s10008_s6 + $0x1f20] sm:$0xff] }
 0x208   : > { %6915 = vmatprep.subr.bf16.mxu0 %v9416_v57  ;;  %7339 = vmatprep.subr.bf16.mxu1 %v9418_v59  ;;  %v9450_v57 = vcombine.high %v1193_v55, %v1197_v61  ;;  %v1200_v59 = vld [vmem:[%s10008_s6 + $0x1e40] sm:$0xff]  ;;  %v1225_v51 = vld [vmem:[%s10008_s6 + $0x1f08] sm:$0xff] }
 0x209   : > { %v9455_v32 = vcombine.low %v1200_v59, %v1204_v9 }
 0x20b   : > { %6916 = vmatpush1.bf16.msra.mxu0 %v9415_v21  ;;  %7340 = vmatpush1.bf16.msra.mxu1 %v9417_v24  ;;  %v9449_v21 = vcombine.low %v1193_v55, %v1197_v61  ;;  %v9456_v24 = vcombine.high %v1200_v59, %v1204_v9  ;;  %v1229_v55 = vld [vmem:[%s10008_s6 + $0x1f28] sm:$0xff]  ;;  %v1236_v59 = vld [vmem:[%s10008_s6 + $0x1f60] sm:$0xff] }
 0x20c   : > { %6917 = vmatprep.subr.bf16.mxu0 %v9424_v25  ;;  %7341 = vmatprep.subr.bf16.mxu1 %v9426_v27  ;;  %v9458_v25 = vcombine.high %v1201_v12, %v1205_v19  ;;  %v1208_v27 = vld [vmem:[%s10008_s6 + $0x1e80] sm:$0xff]  ;;  %v1233_v9 = vld [vmem:[%s10008_s6 + $0x1f48] sm:$0xff] }
 0x20d   : > { %v9463_v6 = vcombine.low %v1208_v27, %v1212_v16 }
 0x20f   : > { %6918 = vmatpush1.bf16.msra.mxu0 %v9423_v33  ;;  %7342 = vmatpush1.bf16.msra.mxu1 %v9425_v38  ;;  %v9457_v33 = vcombine.low %v1201_v12, %v1205_v19  ;;  %v9464_v38 = vcombine.high %v1208_v27, %v1212_v16  ;;  %v1237_v12 = vld [vmem:[%s10008_s6 + $0x1f68] sm:$0xff]  ;;  %v1244_v27 = vld [vmem:[%s10008_s6 + $0x1fa0] sm:$0xff] }
 0x210   : > { %6919 = vmatprep.subr.bf16.mxu0 %v9432_v39  ;;  %7343 = vmatprep.subr.bf16.mxu1 %v9434_v40  ;;  %v9466_v39 = vcombine.high %v1209_v17, %v1213_v28  ;;  %v1216_v40 = vld [vmem:[%s10008_s6 + $0x1ec0] sm:$0xff]  ;;  %v1241_v16 = vld [vmem:[%s10008_s6 + $0x1f88] sm:$0xff] }
 0x211   : > { %v9471_v61 = vcombine.low %v1216_v40, %v1220_v35 }
 0x213   : > { %6920 = vmatpush1.bf16.msra.mxu0 %v9431_v45  ;;  %7344 = vmatpush1.bf16.msra.mxu1 %v9433_v22  ;;  %v9465_v45 = vcombine.low %v1209_v17, %v1213_v28  ;;  %v9472_v22 = vcombine.high %v1216_v40, %v1220_v35  ;;  %v1245_v17 = vld [vmem:[%s10008_s6 + $0x1fa8] sm:$0xff]  ;;  %v1252_v40 = vld [vmem:[%s10008_s6 + $0x1fe0] sm:$0xff] }
 0x214   : > { %6921 = vmatprep.subr.bf16.mxu0 %v9440_v49  ;;  %7345 = vmatprep.subr.bf16.mxu1 %v9442_v63  ;;  %v9474_v49 = vcombine.high %v1217_v41, %v1221_v44  ;;  %v1224_v63 = vld [vmem:[%s10008_s6 + $0x1f00] sm:$0xff]  ;;  %v1249_v35 = vld [vmem:[%s10008_s6 + $0x1fc8] sm:$0xff] }
 0x215   : > { %v9479_v19 = vcombine.low %v1224_v63, %v1228_v0 }
 0x217   : > { %6922 = vmatpush1.bf16.msra.mxu0 %v9439_v3  ;;  %7346 = vmatpush1.bf16.msra.mxu1 %v9441_v4  ;;  %v9473_v3 = vcombine.low %v1217_v41, %v1221_v44  ;;  %v9480_v4 = vcombine.high %v1224_v63, %v1228_v0  ;;  %v1253_v41 = vld [vmem:[%s10008_s6 + $0x1fe8] sm:$0xff]  ;;  %v238_v63 = vld [vmem:[%s10008_s6 + $0x30] sm:$0xff]  ;;  %v235_v0 = vld [vmem:[%s10008_s6 + $0x18] sm:$0xff] }
 0x218   : > { %6923 = vmatprep.subr.bf16.mxu0 %v9448_v8  ;;  %7347 = vmatprep.subr.bf16.mxu1 %v9450_v57  ;;  %v9482_v8 = vcombine.high %v1225_v51, %v1229_v55  ;;  %v1232_v57 = vld [vmem:[%s10008_s6 + $0x1f40] sm:$0xff] }
 0x219   : > { %v9487_v28 = vcombine.low %v1232_v57, %v1236_v59 }
 0x21b   : > { %6924 = vmatpush1.bf16.msra.mxu0 %v9447_v20  ;;  %7348 = vmatpush1.bf16.msra.mxu1 %v9449_v21  ;;  %v9481_v20 = vcombine.low %v1225_v51, %v1229_v55  ;;  %v9488_v21 = vcombine.high %v1232_v57, %v1236_v59  ;;  %v239_v51 = vld [vmem:[%s10008_s6 + $0x38] sm:$0xff]  ;;  %v246_v57 = vld [vmem:[%s10008_s6 + $0x70] sm:$0xff] }
 0x21c   : > { %6925 = vmatprep.subr.bf16.mxu0 %v9456_v24  ;;  %7349 = vmatprep.subr.bf16.mxu1 %v9458_v25  ;;  %v9490_v24 = vcombine.high %v1233_v9, %v1237_v12  ;;  %v1240_v25 = vld [vmem:[%s10008_s6 + $0x1f80] sm:$0xff]  ;;  %v243_v59 = vld [vmem:[%s10008_s6 + $0x58] sm:$0xff] }
 0x21d   : > { %v9495_v44 = vcombine.low %v1240_v25, %v1244_v27 }
 0x21f   : > { %6926 = vmatpush1.bf16.msra.mxu0 %v9455_v32  ;;  %7350 = vmatpush1.bf16.msra.mxu1 %v9457_v33  ;;  %v9489_v32 = vcombine.low %v1233_v9, %v1237_v12  ;;  %v9496_v33 = vcombine.high %v1240_v25, %v1244_v27  ;;  %v10803_v9 = vcombine.low %v10731_v48, %v10736_v54  ;;  %v247_v12 = vld [vmem:[%s10008_s6 + $0x78] sm:$0xff]  ;;  %v250_v27 = vld [vmem:[%s10008_s6 + $0x90] sm:$0xff] }
 0x220   : > { %6927 = vmatprep.subr.bf16.mxu0 %v9464_v38  ;;  %7351 = vmatprep.subr.bf16.mxu1 %v9466_v39  ;;  %v9498_v38 = vcombine.high %v1241_v16, %v1245_v17  ;;  %v1248_v39 = vld [vmem:[%s10008_s6 + $0x1fc0] sm:$0xff]  ;;  %v8502_v48 = vcombine.high %v243_v59, %v247_v12 }
 0x221   : > { %v9503_v55 = vcombine.low %v1248_v39, %v1252_v40 }
 0x223   : > { %6928 = vmatpush1.bf16.msra.mxu0 %v9463_v6  ;;  %7352 = vmatpush1.bf16.msra.mxu1 %v9465_v45  ;;  %v9497_v6 = vcombine.low %v1241_v16, %v1245_v17  ;;  %v9504_v45 = vcombine.high %v1248_v39, %v1252_v40  ;;  %v254_v16 = vld [vmem:[%s10008_s6 + $0xb0] sm:$0xff]  ;;  %v251_v17 = vld [vmem:[%s10008_s6 + $0x98] sm:$0xff] }
 0x224   : > { %6929 = vmatprep.subr.bf16.mxu0 %v9472_v22  ;;  %7353 = vmatprep.subr.bf16.mxu1 %v9474_v49  ;;  %v9506_v22 = vcombine.high %v1249_v35, %v1253_v41  ;;  %v234_v49 = vld [vmem:[%s10008_s6 + $0x10] sm:$0xff] }
 0x225   : > { %v258_v40 = vld [vmem:[%s10008_s6 + $0xd0] sm:$0xff] }
 0x227   : > { %6930 = vmatpush1.bf16.msra.mxu0 %v9471_v61  ;;  %7354 = vmatpush1.bf16.msra.mxu1 %v9473_v3  ;;  %v9505_v61 = vcombine.low %v1249_v35, %v1253_v41  ;;  %v8492_v3 = vcombine.high %v234_v49, %v238_v63  ;;  %v262_v35 = vld [vmem:[%s10008_s6 + $0xf0] sm:$0xff] }
 0x228   : > { %6931 = vmatprep.subr.bf16.mxu0 %v9480_v4  ;;  %7355 = vmatprep.subr.bf16.mxu1 %v9482_v8  ;;  %v8494_v4 = vcombine.high %v235_v0, %v239_v51  ;;  %v242_v8 = vld [vmem:[%s10008_s6 + $0x50] sm:$0xff] }
 0x229   : > { %v8500_v25 = vcombine.high %v242_v8, %v246_v57 }
 0x22b   : > { %6932 = vmatpush1.bf16.msra.mxu0 %v9479_v19  ;;  %7356 = vmatpush1.bf16.msra.mxu1 %v9481_v20  ;;  %v223_v19 = vld [vmem:[%s11515_s0 + $0xb8] sm:$0xff] }
 0x22c   : > { %6933 = vmatprep.subr.bf16.mxu0 %v9488_v21  ;;  %7357 = vmatprep.subr.bf16.mxu1 %v9490_v24  ;;  %v231_v20 = vld [vmem:[%s11515_s0 + $0xf8] sm:$0xff]  ;;  %v8491_v21 = vcombine.low %v234_v49, %v238_v63  ;;  %v8493_v24 = vcombine.low %v235_v0, %v239_v51  ;;  %v8516_v49 = vcombine.high %v258_v40, %v262_v35  ;;  %v266_v0 = vld [vmem:[%s10008_s6 + $0x110] sm:$0xff] }
 0x22d   : > { %v10812_v54 = vcombine.high %v223_v19, %v231_v20  ;;  %v10824_v41 = vcombine.low %v223_v19, %v231_v20  ;;  %v270_v51 = vld [vmem:[%s10008_s6 + $0x130] sm:$0xff]  ;;  %v275_v19 = vld [vmem:[%s10008_s6 + $0x158] sm:$0xff] }
 0x22e   : > { %v279_v20 = vld [vmem:[%s10008_s6 + $0x178] sm:$0xff] }
 0x22f   : > { %6934 = vmatpush1.bf16.msra.mxu0 %v9487_v28  ;;  %7358 = vmatpush1.bf16.msra.mxu1 %v9489_v32  ;;  %v255_v28 = vld [vmem:[%s10008_s6 + $0xb8] sm:$0xff]  ;;  %v8499_v32 = vcombine.low %v242_v8, %v246_v57  ;;  %v8524_v8 = vcombine.high %v266_v0, %v270_v51 }
 0x230   : > { %6935 = vmatprep.subr.bf16.mxu0 %v9496_v33  ;;  %7359 = vmatprep.subr.bf16.mxu1 %v9498_v38  ;;  %v8501_v33 = vcombine.low %v243_v59, %v247_v12  ;;  %v8508_v38 = vcombine.high %v250_v27, %v254_v16  ;;  %v8510_v39 = vcombine.high %v251_v17, %v255_v28  ;;  %v274_v59 = vld [vmem:[%s10008_s6 + $0x150] sm:$0xff] }
 0x231   : > { %v278_v12 = vld [vmem:[%s10008_s6 + $0x170] sm:$0xff] }
 0x233   : > { %6936 = vmatpush1.bf16.msra.mxu0 %v9495_v44  ;;  %7360 = vmatpush1.bf16.msra.mxu1 %v9497_v6  ;;  %v259_v44 = vld [vmem:[%s10008_s6 + $0xd8] sm:$0xff] }
 0x234   : > { %6937 = vmatprep.subr.bf16.mxu0 %v9504_v45  ;;  %7361 = vmatprep.subr.bf16.mxu1 %v9506_v22  ;;  %v263_v6 = vld [vmem:[%s10008_s6 + $0xf8] sm:$0xff]  ;;  %v8507_v45 = vcombine.low %v250_v27, %v254_v16  ;;  %v8509_v22 = vcombine.low %v251_v17, %v255_v28  ;;  %v282_v27 = vld [vmem:[%s10008_s6 + $0x190] sm:$0xff] }
 0x235   : > { %v8518_v63 = vcombine.high %v259_v44, %v263_v6  ;;  %v286_v16 = vld [vmem:[%s10008_s6 + $0x1b0] sm:$0xff]  ;;  %v283_v17 = vld [vmem:[%s10008_s6 + $0x198] sm:$0xff] }
 0x236   : > { %v287_v28 = vld [vmem:[%s10008_s6 + $0x1b8] sm:$0xff] }
 0x237   : > { %6938 = vmatpush1.bf16.msra.mxu0 %v9503_v55  ;;  %7362 = vmatpush1.bf16.msra.mxu1 %v9505_v61  ;;  %v267_v55 = vld [vmem:[%s10008_s6 + $0x118] sm:$0xff] }
 0x238   : > { %7384 = vmatprep.subr.bf16.mxu0 %v8492_v3  ;;  %7808 = vmatprep.subr.bf16.mxu1 %v8494_v4  ;;  %v271_v61 = vld [vmem:[%s10008_s6 + $0x138] sm:$0xff]  ;;  %v8515_v3 = vcombine.low %v258_v40, %v262_v35  ;;  %v8517_v4 = vcombine.low %v259_v44, %v263_v6  ;;  %v294_v40 = vld [vmem:[%s10008_s6 + $0x1f0] sm:$0xff]  ;;  %v8539_v6 = vcombine.low %v282_v27, %v286_v16 }
 0x239   : > { %v8526_v57 = vcombine.high %v267_v55, %v271_v61  ;;  %v291_v35 = vld [vmem:[%s10008_s6 + $0x1d8] sm:$0xff] }
 0x23a   : > { %6940 = vmatmul.mubr.bf16.vlgmr.msra.gmra.mrb[0].mxu0 %v10803_v9  ;;  %7364 = vmatmul.mubr.bf16.vlgmr.msra.gmra.mrb[0].mxu1 %v10803_v9  ;;  %v295_v44 = vld [vmem:[%s10008_s6 + $0x1f8] sm:$0xff] }
 0x23b   : > { %7385 = vmatpush1.bf16.msra.mxu0 %v8491_v21  ;;  %7809 = vmatpush1.bf16.msra.mxu1 %v8493_v24  ;;  %v8523_v21 = vcombine.low %v266_v0, %v270_v51  ;;  %v8525_v24 = vcombine.low %v267_v55, %v271_v61  ;;  %v302_v0 = vld [vmem:[%s10008_s6 + $0x230] sm:$0xff]  ;;  %v299_v51 = vld [vmem:[%s10008_s6 + $0x218] sm:$0xff] }
 0x23c   : > { %7386 = vmatprep.subr.bf16.mxu0 %v8500_v25  ;;  %7810 = vmatprep.subr.bf16.mxu1 %v8502_v48  ;;  %v8532_v25 = vcombine.high %v274_v59, %v278_v12  ;;  %v8534_v48 = vcombine.high %v275_v19, %v279_v20  ;;  %v303_v55 = vld [vmem:[%s10008_s6 + $0x238] sm:$0xff] }
 0x23d   : > { %6949 = vmatprep.mubr.bf16.mxu0 %v10812_v54  ;;  %7373 = vmatprep.mubr.bf16.mxu1 %v10812_v54 }
 0x23f   : > { %7387 = vmatpush1.bf16.msra.mxu0 %v8499_v32  ;;  %7811 = vmatpush1.bf16.msra.mxu1 %v8501_v33  ;;  %v8531_v32 = vcombine.low %v274_v59, %v278_v12  ;;  %v8540_v33 = vcombine.high %v282_v27, %v286_v16  ;;  %v310_v59 = vld [vmem:[%s10008_s6 + $0x270] sm:$0xff]  ;;  %v307_v12 = vld [vmem:[%s10008_s6 + $0x258] sm:$0xff] }
 0x240   : > { %7388 = vmatprep.subr.bf16.mxu0 %v8508_v38  ;;  %7812 = vmatprep.subr.bf16.mxu1 %v8510_v39  ;;  %v8542_v38 = vcombine.high %v283_v17, %v287_v28  ;;  %v290_v39 = vld [vmem:[%s10008_s6 + $0x1d0] sm:$0xff]  ;;  %v315_v16 = vld [vmem:[%s10008_s6 + $0x298] sm:$0xff] }
 0x241   : > { %v8547_v61 = vcombine.low %v290_v39, %v294_v40  ;;  %v318_v27 = vld [vmem:[%s10008_s6 + $0x2b0] sm:$0xff] }
 0x242   : > { %6950 = vmatmul.mubr.bf16.gmra.mrb[4].mxu0 %v10824_v41  ;;  %7374 = vmatmul.mubr.bf16.gmra.mrb[4].mxu1 %v10824_v41 }
 0x243   : > { %7389 = vmatpush1.bf16.msra.mxu0 %v8507_v45  ;;  %7813 = vmatpush1.bf16.msra.mxu1 %v8509_v22  ;;  %v8541_v45 = vcombine.low %v283_v17, %v287_v28  ;;  %v8548_v22 = vcombine.high %v290_v39, %v294_v40  ;;  %v319_v17 = vld [vmem:[%s10008_s6 + $0x2b8] sm:$0xff]  ;;  %v326_v39 = vld [vmem:[%s10008_s6 + $0x2f0] sm:$0xff] }
 0x244   : > { %7390 = vmatprep.subr.bf16.mxu0 %v8516_v49  ;;  %7814 = vmatprep.subr.bf16.mxu1 %v8518_v63  ;;  %v8550_v49 = vcombine.high %v291_v35, %v295_v44  ;;  %v298_v63 = vld [vmem:[%s10008_s6 + $0x210] sm:$0xff]  ;;  %v323_v40 = vld [vmem:[%s10008_s6 + $0x2d8] sm:$0xff] }
 0x245   : > { %7416 = vmatprep.mubr.bf16.mxu0 %v10056_v58  ;;  %7840 = vmatprep.mubr.bf16.mxu1 %v10056_v58  ;;  %v8533_v58 = vcombine.low %v275_v19, %v279_v20  ;;  %v311_v19 = vld [vmem:[%s10008_s6 + $0x278] sm:$0xff]  ;;  %v8555_v20 = vcombine.low %v298_v63, %v302_v0 }
 0x247   : > { %7391 = vmatpush1.bf16.msra.mxu0 %v8515_v3  ;;  %7815 = vmatpush1.bf16.msra.mxu1 %v8517_v4  ;;  %v8549_v3 = vcombine.low %v291_v35, %v295_v44  ;;  %v8556_v4 = vcombine.high %v298_v63, %v302_v0  ;;  %v327_v35 = vld [vmem:[%s10008_s6 + $0x2f8] sm:$0xff]  ;;  %v334_v63 = vld [vmem:[%s10008_s6 + $0x330] sm:$0xff] }
 0x248   : > { %7392 = vmatprep.subr.bf16.mxu0 %v8524_v8  ;;  %7816 = vmatprep.subr.bf16.mxu1 %v8526_v57  ;;  %v8558_v8 = vcombine.high %v299_v51, %v303_v55  ;;  %v306_v57 = vld [vmem:[%s10008_s6 + $0x250] sm:$0xff]  ;;  %v331_v0 = vld [vmem:[%s10008_s6 + $0x318] sm:$0xff] }
 0x249   : > { %v8563_v28 = vcombine.low %v306_v57, %v310_v59 }
 0x24b   : > { %7393 = vmatpush1.bf16.msra.mxu0 %v8523_v21  ;;  %7817 = vmatpush1.bf16.msra.mxu1 %v8525_v24  ;;  %v8557_v21 = vcombine.low %v299_v51, %v303_v55  ;;  %v8564_v24 = vcombine.high %v306_v57, %v310_v59  ;;  %v335_v51 = vld [vmem:[%s10008_s6 + $0x338] sm:$0xff]  ;;  %v342_v57 = vld [vmem:[%s10008_s6 + $0x370] sm:$0xff] }
 0x24c   : > { %7394 = vmatprep.subr.bf16.mxu0 %v8532_v25  ;;  %7818 = vmatprep.subr.bf16.mxu1 %v8534_v48  ;;  %v8566_v25 = vcombine.high %v307_v12, %v311_v19  ;;  %v314_v48 = vld [vmem:[%s10008_s6 + $0x290] sm:$0xff]  ;;  %v339_v59 = vld [vmem:[%s10008_s6 + $0x358] sm:$0xff] }
 0x24d   : > { %v8571_v44 = vcombine.low %v314_v48, %v318_v27 }
 0x24f   : > { %7395 = vmatpush1.bf16.msra.mxu0 %v8531_v32  ;;  %7819 = vmatpush1.bf16.msra.mxu1 %v8533_v58  ;;  %v8565_v32 = vcombine.low %v307_v12, %v311_v19  ;;  %v8572_v58 = vcombine.high %v314_v48, %v318_v27  ;;  %v343_v12 = vld [vmem:[%s10008_s6 + $0x378] sm:$0xff]  ;;  %v350_v48 = vld [vmem:[%s10008_s6 + $0x3b0] sm:$0xff] }
 0x250   : > { %7396 = vmatprep.subr.bf16.mxu0 %v8540_v33  ;;  %7820 = vmatprep.subr.bf16.mxu1 %v8542_v38  ;;  %v8574_v33 = vcombine.high %v315_v16, %v319_v17  ;;  %v322_v38 = vld [vmem:[%s10008_s6 + $0x2d0] sm:$0xff]  ;;  %v347_v27 = vld [vmem:[%s10008_s6 + $0x398] sm:$0xff] }
 0x251   : > { %v8579_v55 = vcombine.low %v322_v38, %v326_v39 }
 0x253   : > { %7397 = vmatpush1.bf16.msra.mxu0 %v8539_v6  ;;  %7821 = vmatpush1.bf16.msra.mxu1 %v8541_v45  ;;  %v8573_v6 = vcombine.low %v315_v16, %v319_v17  ;;  %v8580_v45 = vcombine.high %v322_v38, %v326_v39  ;;  %v351_v16 = vld [vmem:[%s10008_s6 + $0x3b8] sm:$0xff]  ;;  %v358_v38 = vld [vmem:[%s10008_s6 + $0x3f0] sm:$0xff] }
 0x254   : > { %7398 = vmatprep.subr.bf16.mxu0 %v8548_v22  ;;  %7822 = vmatprep.subr.bf16.mxu1 %v8550_v49  ;;  %v8582_v22 = vcombine.high %v323_v40, %v327_v35  ;;  %v330_v49 = vld [vmem:[%s10008_s6 + $0x310] sm:$0xff]  ;;  %v355_v39 = vld [vmem:[%s10008_s6 + $0x3d8] sm:$0xff] }
 0x255   : > { %v8587_v19 = vcombine.low %v330_v49, %v334_v63 }
 0x257   : > { %7399 = vmatpush1.bf16.msra.mxu0 %v8547_v61  ;;  %7823 = vmatpush1.bf16.msra.mxu1 %v8549_v3  ;;  %v8581_v61 = vcombine.low %v323_v40, %v327_v35  ;;  %v8588_v3 = vcombine.high %v330_v49, %v334_v63  ;;  %v359_v40 = vld [vmem:[%s10008_s6 + $0x3f8] sm:$0xff]  ;;  %v366_v49 = vld [vmem:[%s10008_s6 + $0x430] sm:$0xff] }
 0x258   : > { %7400 = vmatprep.subr.bf16.mxu0 %v8556_v4  ;;  %7824 = vmatprep.subr.bf16.mxu1 %v8558_v8  ;;  %v8590_v4 = vcombine.high %v331_v0, %v335_v51  ;;  %v338_v8 = vld [vmem:[%s10008_s6 + $0x350] sm:$0xff]  ;;  %v363_v63 = vld [vmem:[%s10008_s6 + $0x418] sm:$0xff] }
 0x259   : > { %v8595_v17 = vcombine.low %v338_v8, %v342_v57 }
 0x25b   : > { %7401 = vmatpush1.bf16.msra.mxu0 %v8555_v20  ;;  %7825 = vmatpush1.bf16.msra.mxu1 %v8557_v21  ;;  %v8589_v20 = vcombine.low %v331_v0, %v335_v51  ;;  %v8596_v21 = vcombine.high %v338_v8, %v342_v57  ;;  %v367_v0 = vld [vmem:[%s10008_s6 + $0x438] sm:$0xff]  ;;  %v374_v8 = vld [vmem:[%s10008_s6 + $0x470] sm:$0xff] }
 0x25c   : > { %7402 = vmatprep.subr.bf16.mxu0 %v8564_v24  ;;  %7826 = vmatprep.subr.bf16.mxu1 %v8566_v25  ;;  %v8598_v24 = vcombine.high %v339_v59, %v343_v12  ;;  %v346_v25 = vld [vmem:[%s10008_s6 + $0x390] sm:$0xff]  ;;  %v371_v57 = vld [vmem:[%s10008_s6 + $0x458] sm:$0xff] }
 0x25d   : > { %v8603_v35 = vcombine.low %v346_v25, %v350_v48 }
 0x25f   : > { %7403 = vmatpush1.bf16.msra.mxu0 %v8563_v28  ;;  %7827 = vmatpush1.bf16.msra.mxu1 %v8565_v32  ;;  %v8597_v28 = vcombine.low %v339_v59, %v343_v12  ;;  %v8604_v32 = vcombine.high %v346_v25, %v350_v48  ;;  %v375_v59 = vld [vmem:[%s10008_s6 + $0x478] sm:$0xff]  ;;  %v382_v25 = vld [vmem:[%s10008_s6 + $0x4b0] sm:$0xff] }
 0x260   : > { %7404 = vmatprep.subr.bf16.mxu0 %v8572_v58  ;;  %7828 = vmatprep.subr.bf16.mxu1 %v8574_v33  ;;  %v8606_v58 = vcombine.high %v347_v27, %v351_v16  ;;  %v354_v33 = vld [vmem:[%s10008_s6 + $0x3d0] sm:$0xff]  ;;  %v379_v48 = vld [vmem:[%s10008_s6 + $0x498] sm:$0xff] }
 0x261   : > { %v8611_v51 = vcombine.low %v354_v33, %v358_v38 }
 0x263   : > { %7405 = vmatpush1.bf16.msra.mxu0 %v8571_v44  ;;  %7829 = vmatpush1.bf16.msra.mxu1 %v8573_v6  ;;  %v8605_v44 = vcombine.low %v347_v27, %v351_v16  ;;  %v8612_v6 = vcombine.high %v354_v33, %v358_v38  ;;  %v383_v27 = vld [vmem:[%s10008_s6 + $0x4b8] sm:$0xff]  ;;  %v390_v33 = vld [vmem:[%s10008_s6 + $0x4f0] sm:$0xff] }
 0x264   : > { %7406 = vmatprep.subr.bf16.mxu0 %v8580_v45  ;;  %7830 = vmatprep.subr.bf16.mxu1 %v8582_v22  ;;  %v8614_v45 = vcombine.high %v355_v39, %v359_v40  ;;  %v362_v22 = vld [vmem:[%s10008_s6 + $0x410] sm:$0xff]  ;;  %v387_v38 = vld [vmem:[%s10008_s6 + $0x4d8] sm:$0xff] }
 0x265   : > { %v8619_v12 = vcombine.low %v362_v22, %v366_v49 }
 0x267   : > { %7407 = vmatpush1.bf16.msra.mxu0 %v8579_v55  ;;  %7831 = vmatpush1.bf16.msra.mxu1 %v8581_v61  ;;  %v8613_v55 = vcombine.low %v355_v39, %v359_v40  ;;  %v8620_v61 = vcombine.high %v362_v22, %v366_v49  ;;  %v391_v39 = vld [vmem:[%s10008_s6 + $0x4f8] sm:$0xff]  ;;  %v8637_v40 = vcombine.low %v379_v48, %v383_v27 }
 0x268   : > { %7408 = vmatprep.subr.bf16.mxu0 %v8588_v3  ;;  %7832 = vmatprep.subr.bf16.mxu1 %v8590_v4  ;;  %v8622_v3 = vcombine.high %v363_v63, %v367_v0  ;;  %v370_v4 = vld [vmem:[%s10008_s6 + $0x450] sm:$0xff]  ;;  %v395_v22 = vld [vmem:[%s10008_s6 + $0x518] sm:$0xff] }
 0x269   : > { %v8627_v16 = vcombine.low %v370_v4, %v374_v8  ;;  %v399_v49 = vld [vmem:[%s10008_s6 + $0x538] sm:$0xff] }
 0x26b   : > { %7409 = vmatpush1.bf16.msra.mxu0 %v8587_v19  ;;  %7833 = vmatpush1.bf16.msra.mxu1 %v8589_v20  ;;  %v8621_v19 = vcombine.low %v363_v63, %v367_v0  ;;  %v8628_v20 = vcombine.high %v370_v4, %v374_v8  ;;  %v8645_v63 = vcombine.low %v387_v38, %v391_v39  ;;  %v407_v4 = vld [vmem:[%s10008_s6 + $0x578] sm:$0xff] }
 0x26c   : > { %7410 = vmatprep.subr.bf16.mxu0 %v8596_v21  ;;  %7834 = vmatprep.subr.bf16.mxu1 %v8598_v24  ;;  %v8630_v21 = vcombine.high %v371_v57, %v375_v59  ;;  %v378_v24 = vld [vmem:[%s10008_s6 + $0x490] sm:$0xff]  ;;  %v8653_v8 = vcombine.low %v395_v22, %v399_v49 }
 0x26f   : > { %7411 = vmatpush1.bf16.msra.mxu0 %v8595_v17  ;;  %7835 = vmatpush1.bf16.msra.mxu1 %v8597_v28  ;;  %v8629_v17 = vcombine.low %v371_v57, %v375_v59  ;;  %v8636_v28 = vcombine.high %v378_v24, %v382_v25 }
 0x270   : > { %7412 = vmatprep.subr.bf16.mxu0 %v8604_v32  ;;  %7836 = vmatprep.subr.bf16.mxu1 %v8606_v58  ;;  %v8638_v32 = vcombine.high %v379_v48, %v383_v27  ;;  %v386_v58 = vld [vmem:[%s10008_s6 + $0x4d0] sm:$0xff] }
 0x271   : > { %v418_v27 = vld [vmem:[%s10008_s6 + $0x5d0] sm:$0xff] }
 0x273   : > { %7413 = vmatpush1.bf16.msra.mxu0 %v8603_v35  ;;  %7837 = vmatpush1.bf16.msra.mxu1 %v8605_v44  ;;  %v8644_v35 = vcombine.high %v386_v58, %v390_v33  ;;  %v8646_v44 = vcombine.high %v387_v38, %v391_v39  ;;  %v426_v39 = vld [vmem:[%s10008_s6 + $0x610] sm:$0xff] }
 0x274   : > { %7414 = vmatprep.subr.bf16.mxu0 %v8612_v6  ;;  %7838 = vmatprep.subr.bf16.mxu1 %v8614_v45  ;;  %v394_v6 = vld [vmem:[%s10008_s6 + $0x510] sm:$0xff] }
 0x275   : > { %v398_v45 = vld [vmem:[%s10008_s6 + $0x530] sm:$0xff] }
 0x276   : > { %v8652_v0 = vcombine.high %v394_v6, %v398_v45 }
 0x277   : > { %7415 = vmatpush1.bf16.msra.mxu0 %v8611_v51  ;;  %7839 = vmatpush1.bf16.msra.mxu1 %v8613_v55  ;;  %v8654_v51 = vcombine.high %v395_v22, %v399_v49  ;;  %v402_v55 = vld [vmem:[%s10008_s6 + $0x550] sm:$0xff] }
 0x278   : > { %7437 = vmatprep.subr.bf16.mxu0 %v8620_v61  ;;  %7861 = vmatprep.subr.bf16.mxu1 %v8622_v3  ;;  %v406_v61 = vld [vmem:[%s10008_s6 + $0x570] sm:$0xff]  ;;  %v403_v3 = vld [vmem:[%s10008_s6 + $0x558] sm:$0xff] }
 0x279   : > { %v8660_v57 = vcombine.high %v402_v55, %v406_v61  ;;  %v8662_v59 = vcombine.high %v403_v3, %v407_v4  ;;  %v434_v49 = vld [vmem:[%s10008_s6 + $0x650] sm:$0xff] }
 0x27a   : > { %7417 = vmatmul.mubr.bf16.vlgmr.msra.gmra.mrb[8].mxu0 %v10103_v15  ;;  %7841 = vmatmul.mubr.bf16.vlgmr.msra.gmra.mrb[8].mxu1 %v10103_v15  ;;  %v8635_v15 = vcombine.low %v378_v24, %v382_v25  ;;  %v8659_v24 = vcombine.low %v402_v55, %v406_v61 }
 0x27b   : > { %7438 = vmatpush1.bf16.msra.mxu0 %v8619_v12  ;;  %7862 = vmatpush1.bf16.msra.mxu1 %v8621_v19  ;;  %v410_v12 = vld [vmem:[%s10008_s6 + $0x590] sm:$0xff] }
 0x27c   : > { %7439 = vmatprep.subr.bf16.mxu0 %v8628_v20  ;;  %7863 = vmatprep.subr.bf16.mxu1 %v8630_v21  ;;  %v414_v19 = vld [vmem:[%s10008_s6 + $0x5b0] sm:$0xff]  ;;  %v411_v20 = vld [vmem:[%s10008_s6 + $0x598] sm:$0xff] }
 0x27d   : > { %7426 = vmatprep.mubr.bf16.mxu0 %v10114_v23  ;;  %7850 = vmatprep.mubr.bf16.mxu1 %v10114_v23  ;;  %v8643_v23 = vcombine.low %v386_v58, %v390_v33  ;;  %v415_v21 = vld [vmem:[%s10008_s6 + $0x5b8] sm:$0xff]  ;;  %v8668_v25 = vcombine.high %v410_v12, %v414_v19 }
 0x27e   : > { %v8670_v48 = vcombine.high %v411_v20, %v415_v21  ;;  %v8669_v58 = vcombine.low %v411_v20, %v415_v21  ;;  %v450_v21 = vld [vmem:[%s10008_s6 + $0x6d0] sm:$0xff] }
 0x27f   : > { %7440 = vmatpush1.bf16.msra.mxu0 %v8627_v16  ;;  %7864 = vmatpush1.bf16.msra.mxu1 %v8629_v17  ;;  %v422_v16 = vld [vmem:[%s10008_s6 + $0x5f0] sm:$0xff]  ;;  %v419_v17 = vld [vmem:[%s10008_s6 + $0x5d8] sm:$0xff] }
 0x280   : > { %7441 = vmatprep.subr.bf16.mxu0 %v8636_v28  ;;  %7865 = vmatprep.subr.bf16.mxu1 %v8638_v32  ;;  %v423_v28 = vld [vmem:[%s10008_s6 + $0x5f8] sm:$0xff]  ;;  %v8667_v32 = vcombine.low %v410_v12, %v414_v19  ;;  %v8676_v33 = vcombine.high %v418_v27, %v422_v16 }
 0x281   : > { %v8678_v38 = vcombine.high %v419_v17, %v423_v28 }
 0x282   : > { %7427 = vmatmul.mubr.bf16.gmra.mrb[12].mxu0 %v10126_v34  ;;  %7851 = vmatmul.mubr.bf16.gmra.mrb[12].mxu1 %v10126_v34  ;;  %v8651_v34 = vcombine.low %v394_v6, %v398_v45  ;;  %v8677_v6 = vcombine.low %v419_v17, %v423_v28  ;;  %v458_v28 = vld [vmem:[%s10008_s6 + $0x710] sm:$0xff] }
 0x283   : > { %7442 = vmatpush1.bf16.msra.mxu0 %v8635_v15  ;;  %7866 = vmatpush1.bf16.msra.mxu1 %v8637_v40  ;;  %v430_v15 = vld [vmem:[%s10008_s6 + $0x630] sm:$0xff]  ;;  %v427_v40 = vld [vmem:[%s10008_s6 + $0x618] sm:$0xff] }
 0x284   : > { %7443 = vmatprep.subr.bf16.mxu0 %v8644_v35  ;;  %7867 = vmatprep.subr.bf16.mxu1 %v8646_v44  ;;  %v431_v35 = vld [vmem:[%s10008_s6 + $0x638] sm:$0xff]  ;;  %v8675_v44 = vcombine.low %v418_v27, %v422_v16  ;;  %v8684_v45 = vcombine.high %v426_v39, %v430_v15 }
 0x285   : > { %7469 = vmatprep.mubr.bf16.mxu0 %v10142_v43  ;;  %7893 = vmatprep.mubr.bf16.mxu1 %v10142_v43  ;;  %v8661_v43 = vcombine.low %v403_v3, %v407_v4  ;;  %v8686_v22 = vcombine.high %v427_v40, %v431_v35  ;;  %v8685_v55 = vcombine.low %v427_v40, %v431_v35  ;;  %v442_v4 = vld [vmem:[%s10008_s6 + $0x690] sm:$0xff] }
 0x286   : > { %v466_v35 = vld [vmem:[%s10008_s6 + $0x750] sm:$0xff] }
 0x287   : > { %7444 = vmatpush1.bf16.msra.mxu0 %v8643_v23  ;;  %7868 = vmatpush1.bf16.msra.mxu1 %v8645_v63  ;;  %v438_v23 = vld [vmem:[%s10008_s6 + $0x670] sm:$0xff]  ;;  %v435_v63 = vld [vmem:[%s10008_s6 + $0x658] sm:$0xff] }
 0x288   : > { %7445 = vmatprep.subr.bf16.mxu0 %v8652_v0  ;;  %7869 = vmatprep.subr.bf16.mxu1 %v8654_v51  ;;  %v439_v0 = vld [vmem:[%s10008_s6 + $0x678] sm:$0xff]  ;;  %v8683_v51 = vcombine.low %v426_v39, %v430_v15  ;;  %v8692_v61 = vcombine.high %v434_v49, %v438_v23 }
 0x289   : > { %v8694_v3 = vcombine.high %v435_v63, %v439_v0  ;;  %v8693_v12 = vcombine.low %v435_v63, %v439_v0  ;;  %v474_v0 = vld [vmem:[%s10008_s6 + $0x790] sm:$0xff] }
 0x28b   : > { %7446 = vmatpush1.bf16.msra.mxu0 %v8651_v34  ;;  %7870 = vmatpush1.bf16.msra.mxu1 %v8653_v8  ;;  %v446_v34 = vld [vmem:[%s10008_s6 + $0x6b0] sm:$0xff]  ;;  %v443_v8 = vld [vmem:[%s10008_s6 + $0x698] sm:$0xff] }
 0x28c   : > { %7447 = vmatprep.subr.bf16.mxu0 %v8660_v57  ;;  %7871 = vmatprep.subr.bf16.mxu1 %v8662_v59  ;;  %v447_v57 = vld [vmem:[%s10008_s6 + $0x6b8] sm:$0xff]  ;;  %v8691_v59 = vcombine.low %v434_v49, %v438_v23  ;;  %v8700_v19 = vcombine.high %v442_v4, %v446_v34 }
 0x28d   : > { %v8702_v20 = vcombine.high %v443_v8, %v447_v57  ;;  %v8701_v27 = vcombine.low %v443_v8, %v447_v57  ;;  %v482_v57 = vld [vmem:[%s10008_s6 + $0x7d0] sm:$0xff] }
 0x28f   : > { %7448 = vmatpush1.bf16.msra.mxu0 %v8659_v24  ;;  %7872 = vmatpush1.bf16.msra.mxu1 %v8661_v43  ;;  %v454_v24 = vld [vmem:[%s10008_s6 + $0x6f0] sm:$0xff]  ;;  %v451_v43 = vld [vmem:[%s10008_s6 + $0x6d8] sm:$0xff] }
 0x290   : > { %7449 = vmatprep.subr.bf16.mxu0 %v8668_v25  ;;  %7873 = vmatprep.subr.bf16.mxu1 %v8670_v48  ;;  %v455_v25 = vld [vmem:[%s10008_s6 + $0x6f8] sm:$0xff]  ;;  %v8699_v48 = vcombine.low %v442_v4, %v446_v34  ;;  %v8708_v16 = vcombine.high %v450_v21, %v454_v24 }
 0x291   : > { %v8710_v17 = vcombine.high %v451_v43, %v455_v25  ;;  %v8709_v39 = vcombine.low %v451_v43, %v455_v25  ;;  %v490_v25 = vld [vmem:[%s10008_s6 + $0x810] sm:$0xff] }
 0x293   : > { %7450 = vmatpush1.bf16.msra.mxu0 %v8667_v32  ;;  %7874 = vmatpush1.bf16.msra.mxu1 %v8669_v58  ;;  %v462_v32 = vld [vmem:[%s10008_s6 + $0x730] sm:$0xff]  ;;  %v459_v58 = vld [vmem:[%s10008_s6 + $0x718] sm:$0xff] }
 0x294   : > { %7451 = vmatprep.subr.bf16.mxu0 %v8676_v33  ;;  %7875 = vmatprep.subr.bf16.mxu1 %v8678_v38  ;;  %v463_v33 = vld [vmem:[%s10008_s6 + $0x738] sm:$0xff]  ;;  %v8707_v38 = vcombine.low %v450_v21, %v454_v24  ;;  %v8716_v15 = vcombine.high %v458_v28, %v462_v32 }
 0x295   : > { %v8718_v40 = vcombine.high %v459_v58, %v463_v33  ;;  %v8717_v49 = vcombine.low %v459_v58, %v463_v33  ;;  %v498_v33 = vld [vmem:[%s10008_s6 + $0x850] sm:$0xff] }
 0x297   : > { %7452 = vmatpush1.bf16.msra.mxu0 %v8675_v44  ;;  %7876 = vmatpush1.bf16.msra.mxu1 %v8677_v6  ;;  %v470_v44 = vld [vmem:[%s10008_s6 + $0x770] sm:$0xff]  ;;  %v467_v6 = vld [vmem:[%s10008_s6 + $0x758] sm:$0xff] }
 0x298   : > { %7453 = vmatprep.subr.bf16.mxu0 %v8684_v45  ;;  %7877 = vmatprep.subr.bf16.mxu1 %v8686_v22  ;;  %v471_v45 = vld [vmem:[%s10008_s6 + $0x778] sm:$0xff]  ;;  %v8715_v22 = vcombine.low %v458_v28, %v462_v32  ;;  %v8724_v23 = vcombine.high %v466_v35, %v470_v44 }
 0x299   : > { %v8726_v63 = vcombine.high %v467_v6, %v471_v45  ;;  %v8725_v4 = vcombine.low %v467_v6, %v471_v45  ;;  %v506_v45 = vld [vmem:[%s10008_s6 + $0x890] sm:$0xff] }
 0x29b   : > { %7454 = vmatpush1.bf16.msra.mxu0 %v8683_v51  ;;  %7878 = vmatpush1.bf16.msra.mxu1 %v8685_v55  ;;  %v478_v51 = vld [vmem:[%s10008_s6 + $0x7b0] sm:$0xff]  ;;  %v475_v55 = vld [vmem:[%s10008_s6 + $0x798] sm:$0xff] }
 0x29c   : > { %7455 = vmatprep.subr.bf16.mxu0 %v8692_v61  ;;  %7879 = vmatprep.subr.bf16.mxu1 %v8694_v3  ;;  %v479_v61 = vld [vmem:[%s10008_s6 + $0x7b8] sm:$0xff]  ;;  %v8723_v3 = vcombine.low %v466_v35, %v470_v44  ;;  %v8732_v34 = vcombine.high %v474_v0, %v478_v51 }
 0x29d   : > { %v8734_v8 = vcombine.high %v475_v55, %v479_v61  ;;  %v8733_v21 = vcombine.low %v475_v55, %v479_v61  ;;  %v514_v61 = vld [vmem:[%s10008_s6 + $0x8d0] sm:$0xff] }
 0x29f   : > { %7456 = vmatpush1.bf16.msra.mxu0 %v8691_v59  ;;  %7880 = vmatpush1.bf16.msra.mxu1 %v8693_v12  ;;  %v486_v59 = vld [vmem:[%s10008_s6 + $0x7f0] sm:$0xff]  ;;  %v483_v12 = vld [vmem:[%s10008_s6 + $0x7d8] sm:$0xff] }
 0x2a0   : > { %7457 = vmatprep.subr.bf16.mxu0 %v8700_v19  ;;  %7881 = vmatprep.subr.bf16.mxu1 %v8702_v20  ;;  %v487_v19 = vld [vmem:[%s10008_s6 + $0x7f8] sm:$0xff]  ;;  %v8731_v20 = vcombine.low %v474_v0, %v478_v51  ;;  %v8740_v24 = vcombine.high %v482_v57, %v486_v59 }
 0x2a1   : > { %v8742_v43 = vcombine.high %v483_v12, %v487_v19  ;;  %v8741_v28 = vcombine.low %v483_v12, %v487_v19  ;;  %v522_v12 = vld [vmem:[%s10008_s6 + $0x910] sm:$0xff] }
 0x2a2   : > { %v526_v19 = vld [vmem:[%s10008_s6 + $0x930] sm:$0xff] }
 0x2a3   : > { %7458 = vmatpush1.bf16.msra.mxu0 %v8699_v48  ;;  %7882 = vmatpush1.bf16.msra.mxu1 %v8701_v27  ;;  %v494_v48 = vld [vmem:[%s10008_s6 + $0x830] sm:$0xff]  ;;  %v491_v27 = vld [vmem:[%s10008_s6 + $0x818] sm:$0xff] }
 0x2a4   : > { %7459 = vmatprep.subr.bf16.mxu0 %v8708_v16  ;;  %7883 = vmatprep.subr.bf16.mxu1 %v8710_v17  ;;  %v495_v16 = vld [vmem:[%s10008_s6 + $0x838] sm:$0xff]  ;;  %v8739_v17 = vcombine.low %v482_v57, %v486_v59  ;;  %v8748_v32 = vcombine.high %v490_v25, %v494_v48 }
 0x2a5   : > { %v8750_v58 = vcombine.high %v491_v27, %v495_v16  ;;  %v8749_v35 = vcombine.low %v491_v27, %v495_v16  ;;  %v534_v27 = vld [vmem:[%s10008_s6 + $0x970] sm:$0xff]  ;;  %v531_v16 = vld [vmem:[%s10008_s6 + $0x958] sm:$0xff] }
 0x2a7   : > { %7460 = vmatpush1.bf16.msra.mxu0 %v8707_v38  ;;  %7884 = vmatpush1.bf16.msra.mxu1 %v8709_v39  ;;  %v502_v38 = vld [vmem:[%s10008_s6 + $0x870] sm:$0xff]  ;;  %v499_v39 = vld [vmem:[%s10008_s6 + $0x858] sm:$0xff] }
 0x2a8   : > { %7461 = vmatprep.subr.bf16.mxu0 %v8716_v15  ;;  %7885 = vmatprep.subr.bf16.mxu1 %v8718_v40  ;;  %v503_v15 = vld [vmem:[%s10008_s6 + $0x878] sm:$0xff]  ;;  %v8747_v40 = vcombine.low %v490_v25, %v494_v48  ;;  %v8756_v44 = vcombine.high %v498_v33, %v502_v38  ;;  %v530_v48 = vld [vmem:[%s10008_s6 + $0x950] sm:$0xff] }
 0x2a9   : > { %v8758_v6 = vcombine.high %v499_v39, %v503_v15  ;;  %v8757_v0 = vcombine.low %v499_v39, %v503_v15  ;;  %v539_v39 = vld [vmem:[%s10008_s6 + $0x998] sm:$0xff] }
 0x2aa   : > { %v543_v15 = vld [vmem:[%s10008_s6 + $0x9b8] sm:$0xff] }
 0x2ab   : > { %7462 = vmatpush1.bf16.msra.mxu0 %v8715_v22  ;;  %7886 = vmatpush1.bf16.msra.mxu1 %v8717_v49  ;;  %v510_v22 = vld [vmem:[%s10008_s6 + $0x8b0] sm:$0xff]  ;;  %v507_v49 = vld [vmem:[%s10008_s6 + $0x898] sm:$0xff] }
 0x2ac   : > { %7463 = vmatprep.subr.bf16.mxu0 %v8724_v23  ;;  %7887 = vmatprep.subr.bf16.mxu1 %v8726_v63  ;;  %v511_v23 = vld [vmem:[%s10008_s6 + $0x8b8] sm:$0xff]  ;;  %v8755_v63 = vcombine.low %v498_v33, %v502_v38  ;;  %v8764_v51 = vcombine.high %v506_v45, %v510_v22  ;;  %v538_v33 = vld [vmem:[%s10008_s6 + $0x990] sm:$0xff] }
 0x2ad   : > { %v8766_v55 = vcombine.high %v507_v49, %v511_v23  ;;  %v542_v38 = vld [vmem:[%s10008_s6 + $0x9b0] sm:$0xff] }
 0x2af   : > { %7464 = vmatpush1.bf16.msra.mxu0 %v8723_v3  ;;  %7888 = vmatpush1.bf16.msra.mxu1 %v8725_v4  ;;  %v518_v3 = vld [vmem:[%s10008_s6 + $0x8f0] sm:$0xff]  ;;  %v515_v4 = vld [vmem:[%s10008_s6 + $0x8d8] sm:$0xff] }
 0x2b0   : > { %7465 = vmatprep.subr.bf16.mxu0 %v8732_v34  ;;  %7889 = vmatprep.subr.bf16.mxu1 %v8734_v8  ;;  %v519_v34 = vld [vmem:[%s10008_s6 + $0x8f8] sm:$0xff]  ;;  %v8765_v8 = vcombine.low %v507_v49, %v511_v23  ;;  %v8772_v57 = vcombine.high %v514_v61, %v518_v3  ;;  %v8795_v23 = vcombine.low %v538_v33, %v542_v38 }
 0x2b1   : > { %v8774_v59 = vcombine.high %v515_v4, %v519_v34  ;;  %v551_v49 = vld [vmem:[%s10008_s6 + $0x9f8] sm:$0xff] }
 0x2b3   : > { %7466 = vmatpush1.bf16.msra.mxu0 %v8731_v20  ;;  %7890 = vmatpush1.bf16.msra.mxu1 %v8733_v21  ;;  %v523_v20 = vld [vmem:[%s10008_s6 + $0x918] sm:$0xff] }
 0x2b4   : > { %7467 = vmatprep.subr.bf16.mxu0 %v8740_v24  ;;  %7891 = vmatprep.subr.bf16.mxu1 %v8742_v43  ;;  %v527_v21 = vld [vmem:[%s10008_s6 + $0x938] sm:$0xff]  ;;  %v8773_v24 = vcombine.low %v515_v4, %v519_v34  ;;  %v8780_v43 = vcombine.high %v522_v12, %v526_v19 }
 0x2b5   : > { %v8782_v25 = vcombine.high %v523_v20, %v527_v21  ;;  %v559_v4 = vld [vmem:[%s10008_s6 + $0xa38] sm:$0xff] }
 0x2b7   : > { %7468 = vmatpush1.bf16.msra.mxu0 %v8739_v17  ;;  %7892 = vmatpush1.bf16.msra.mxu1 %v8741_v28  ;;  %v535_v17 = vld [vmem:[%s10008_s6 + $0x978] sm:$0xff]  ;;  %v8781_v28 = vcombine.low %v523_v20, %v527_v21 }
 0x2b8   : > { %7490 = vmatprep.subr.bf16.mxu0 %v8748_v32  ;;  %7914 = vmatprep.subr.bf16.mxu1 %v8750_v58  ;;  %v8788_v32 = vcombine.high %v530_v48, %v534_v27  ;;  %v8790_v58 = vcombine.high %v531_v16, %v535_v17  ;;  %v567_v20 = vld [vmem:[%s10008_s6 + $0xa78] sm:$0xff] }
 0x2ba   : > { %7470 = vmatmul.mubr.bf16.vlgmr.msra.gmra.mrb[8].mxu0 %v10203_v31  ;;  %7894 = vmatmul.mubr.bf16.vlgmr.msra.gmra.mrb[8].mxu1 %v10203_v31  ;;  %v8763_v31 = vcombine.low %v506_v45, %v510_v22  ;;  %v550_v45 = vld [vmem:[%s10008_s6 + $0x9f0] sm:$0xff]  ;;  %v547_v22 = vld [vmem:[%s10008_s6 + $0x9d8] sm:$0xff] }
 0x2bb   : > { %7491 = vmatpush1.bf16.msra.mxu0 %v8747_v40  ;;  %7915 = vmatpush1.bf16.msra.mxu1 %v8749_v35  ;;  %v8787_v40 = vcombine.low %v530_v48, %v534_v27  ;;  %v8796_v35 = vcombine.high %v538_v33, %v542_v38  ;;  %v574_v48 = vld [vmem:[%s10008_s6 + $0xab0] sm:$0xff]  ;;  %v571_v27 = vld [vmem:[%s10008_s6 + $0xa98] sm:$0xff] }
 0x2bc   : > { %7492 = vmatprep.subr.bf16.mxu0 %v8756_v44  ;;  %7916 = vmatprep.subr.bf16.mxu1 %v8758_v6  ;;  %v8798_v44 = vcombine.high %v539_v39, %v543_v15  ;;  %v546_v6 = vld [vmem:[%s10008_s6 + $0x9d0] sm:$0xff]  ;;  %v579_v38 = vld [vmem:[%s10008_s6 + $0xad8] sm:$0xff] }
 0x2bd   : > { %7479 = vmatprep.mubr.bf16.mxu0 %v10214_v42  ;;  %7903 = vmatprep.mubr.bf16.mxu1 %v10214_v42  ;;  %v8771_v42 = vcombine.low %v514_v61, %v518_v3  ;;  %v558_v61 = vld [vmem:[%s10008_s6 + $0xa30] sm:$0xff]  ;;  %v555_v3 = vld [vmem:[%s10008_s6 + $0xa18] sm:$0xff]  ;;  %v8803_v34 = vcombine.low %v546_v6, %v550_v45 }
 0x2be   : > { %v582_v33 = vld [vmem:[%s10008_s6 + $0xaf0] sm:$0xff] }
 0x2bf   : > { %7493 = vmatpush1.bf16.msra.mxu0 %v8755_v63  ;;  %7917 = vmatpush1.bf16.msra.mxu1 %v8757_v0  ;;  %v8797_v63 = vcombine.low %v539_v39, %v543_v15  ;;  %v8804_v0 = vcombine.high %v546_v6, %v550_v45  ;;  %v583_v39 = vld [vmem:[%s10008_s6 + $0xaf8] sm:$0xff]  ;;  %v590_v6 = vld [vmem:[%s10008_s6 + $0xb30] sm:$0xff] }
 0x2c0   : > { %7494 = vmatprep.subr.bf16.mxu0 %v8764_v51  ;;  %7918 = vmatprep.subr.bf16.mxu1 %v8766_v55  ;;  %v8806_v51 = vcombine.high %v547_v22, %v551_v49  ;;  %v554_v55 = vld [vmem:[%s10008_s6 + $0xa10] sm:$0xff]  ;;  %v587_v45 = vld [vmem:[%s10008_s6 + $0xb18] sm:$0xff] }
 0x2c1   : > { %v8811_v21 = vcombine.low %v554_v55, %v558_v61 }
 0x2c2   : > { %7480 = vmatmul.mubr.bf16.gmra.mrb[12].mxu0 %v10226_v56  ;;  %7904 = vmatmul.mubr.bf16.gmra.mrb[12].mxu1 %v10226_v56  ;;  %v8779_v56 = vcombine.low %v522_v12, %v526_v19  ;;  %v566_v12 = vld [vmem:[%s10008_s6 + $0xa70] sm:$0xff]  ;;  %v563_v19 = vld [vmem:[%s10008_s6 + $0xa58] sm:$0xff] }
 0x2c3   : > { %7495 = vmatpush1.bf16.msra.mxu0 %v8763_v31  ;;  %7919 = vmatpush1.bf16.msra.mxu1 %v8765_v8  ;;  %v8805_v31 = vcombine.low %v547_v22, %v551_v49  ;;  %v8812_v8 = vcombine.high %v554_v55, %v558_v61  ;;  %v591_v22 = vld [vmem:[%s10008_s6 + $0xb38] sm:$0xff]  ;;  %v598_v55 = vld [vmem:[%s10008_s6 + $0xb70] sm:$0xff] }
 0x2c4   : > { %7496 = vmatprep.subr.bf16.mxu0 %v8772_v57  ;;  %7920 = vmatprep.subr.bf16.mxu1 %v8774_v59  ;;  %v8814_v57 = vcombine.high %v555_v3, %v559_v4  ;;  %v562_v59 = vld [vmem:[%s10008_s6 + $0xa50] sm:$0xff]  ;;  %v595_v61 = vld [vmem:[%s10008_s6 + $0xb58] sm:$0xff] }
 0x2c5   : > { %7522 = vmatprep.mubr.bf16.mxu0 %v10242_v2  ;;  %7946 = vmatprep.mubr.bf16.mxu1 %v10242_v2  ;;  %v8789_v2 = vcombine.low %v531_v16, %v535_v17  ;;  %v575_v16 = vld [vmem:[%s10008_s6 + $0xab8] sm:$0xff]  ;;  %v8819_v17 = vcombine.low %v562_v59, %v566_v12 }
 0x2c7   : > { %7497 = vmatpush1.bf16.msra.mxu0 %v8771_v42  ;;  %7921 = vmatpush1.bf16.msra.mxu1 %v8773_v24  ;;  %v8813_v42 = vcombine.low %v555_v3, %v559_v4  ;;  %v8820_v24 = vcombine.high %v562_v59, %v566_v12  ;;  %v599_v3 = vld [vmem:[%s10008_s6 + $0xb78] sm:$0xff]  ;;  %v606_v59 = vld [vmem:[%s10008_s6 + $0xbb0] sm:$0xff] }
 0x2c8   : > { %7498 = vmatprep.subr.bf16.mxu0 %v8780_v43  ;;  %7922 = vmatprep.subr.bf16.mxu1 %v8782_v25  ;;  %v8822_v43 = vcombine.high %v563_v19, %v567_v20  ;;  %v570_v25 = vld [vmem:[%s10008_s6 + $0xa90] sm:$0xff]  ;;  %v603_v12 = vld [vmem:[%s10008_s6 + $0xb98] sm:$0xff] }
 0x2c9   : > { %v8827_v15 = vcombine.low %v570_v25, %v574_v48 }
 0x2cb   : > { %7499 = vmatpush1.bf16.msra.mxu0 %v8779_v56  ;;  %7923 = vmatpush1.bf16.msra.mxu1 %v8781_v28  ;;  %v8821_v56 = vcombine.low %v563_v19, %v567_v20  ;;  %v8828_v28 = vcombine.high %v570_v25, %v574_v48  ;;  %v607_v19 = vld [vmem:[%s10008_s6 + $0xbb8] sm:$0xff]  ;;  %v614_v25 = vld [vmem:[%s10008_s6 + $0xbf0] sm:$0xff] }
 0x2cc   : > { %7500 = vmatprep.subr.bf16.mxu0 %v8788_v32  ;;  %7924 = vmatprep.subr.bf16.mxu1 %v8790_v58  ;;  %v8830_v32 = vcombine.high %v571_v27, %v575_v16  ;;  %v578_v58 = vld [vmem:[%s10008_s6 + $0xad0] sm:$0xff]  ;;  %v611_v48 = vld [vmem:[%s10008_s6 + $0xbd8] sm:$0xff] }
 0x2cd   : > { %v8835_v49 = vcombine.low %v578_v58, %v582_v33 }
 0x2cf   : > { %7501 = vmatpush1.bf16.msra.mxu0 %v8787_v40  ;;  %7925 = vmatpush1.bf16.msra.mxu1 %v8789_v2  ;;  %v8829_v40 = vcombine.low %v571_v27, %v575_v16  ;;  %v8836_v2 = vcombine.high %v578_v58, %v582_v33  ;;  %v615_v27 = vld [vmem:[%s10008_s6 + $0xbf8] sm:$0xff]  ;;  %v622_v58 = vld [vmem:[%s10008_s6 + $0xc30] sm:$0xff] }
 0x2d0   : > { %7502 = vmatprep.subr.bf16.mxu0 %v8796_v35  ;;  %7926 = vmatprep.subr.bf16.mxu1 %v8798_v44  ;;  %v8838_v35 = vcombine.high %v579_v38, %v583_v39  ;;  %v586_v44 = vld [vmem:[%s10008_s6 + $0xb10] sm:$0xff]  ;;  %v619_v33 = vld [vmem:[%s10008_s6 + $0xc18] sm:$0xff] }
 0x2d1   : > { %v8843_v4 = vcombine.low %v586_v44, %v590_v6 }
 0x2d3   : > { %7503 = vmatpush1.bf16.msra.mxu0 %v8795_v23  ;;  %7927 = vmatpush1.bf16.msra.mxu1 %v8797_v63  ;;  %v8837_v23 = vcombine.low %v579_v38, %v583_v39  ;;  %v8844_v63 = vcombine.high %v586_v44, %v590_v6  ;;  %v623_v38 = vld [vmem:[%s10008_s6 + $0xc38] sm:$0xff]  ;;  %v630_v44 = vld [vmem:[%s10008_s6 + $0xc70] sm:$0xff] }
 0x2d4   : > { %7504 = vmatprep.subr.bf16.mxu0 %v8804_v0  ;;  %7928 = vmatprep.subr.bf16.mxu1 %v8806_v51  ;;  %v8846_v0 = vcombine.high %v587_v45, %v591_v22  ;;  %v594_v51 = vld [vmem:[%s10008_s6 + $0xb50] sm:$0xff]  ;;  %v627_v6 = vld [vmem:[%s10008_s6 + $0xc58] sm:$0xff] }
 0x2d5   : > { %v8851_v20 = vcombine.low %v594_v51, %v598_v55 }
 0x2d7   : > { %7505 = vmatpush1.bf16.msra.mxu0 %v8803_v34  ;;  %7929 = vmatpush1.bf16.msra.mxu1 %v8805_v31  ;;  %v8845_v34 = vcombine.low %v587_v45, %v591_v22  ;;  %v8852_v31 = vcombine.high %v594_v51, %v598_v55  ;;  %v631_v45 = vld [vmem:[%s10008_s6 + $0xc78] sm:$0xff]  ;;  %v638_v51 = vld [vmem:[%s10008_s6 + $0xcb0] sm:$0xff] }
 0x2d8   : > { %7506 = vmatprep.subr.bf16.mxu0 %v8812_v8  ;;  %7930 = vmatprep.subr.bf16.mxu1 %v8814_v57  ;;  %v8854_v8 = vcombine.high %v595_v61, %v599_v3  ;;  %v602_v57 = vld [vmem:[%s10008_s6 + $0xb90] sm:$0xff]  ;;  %v635_v55 = vld [vmem:[%s10008_s6 + $0xc98] sm:$0xff] }
 0x2d9   : > { %v8859_v16 = vcombine.low %v602_v57, %v606_v59 }
 0x2db   : > { %7507 = vmatpush1.bf16.msra.mxu0 %v8811_v21  ;;  %7931 = vmatpush1.bf16.msra.mxu1 %v8813_v42  ;;  %v8853_v21 = vcombine.low %v595_v61, %v599_v3  ;;  %v8860_v42 = vcombine.high %v602_v57, %v606_v59  ;;  %v639_v61 = vld [vmem:[%s10008_s6 + $0xcb8] sm:$0xff]  ;;  %v646_v57 = vld [vmem:[%s10008_s6 + $0xcf0] sm:$0xff] }
 0x2dc   : > { %7508 = vmatprep.subr.bf16.mxu0 %v8820_v24  ;;  %7932 = vmatprep.subr.bf16.mxu1 %v8822_v43  ;;  %v8862_v24 = vcombine.high %v603_v12, %v607_v19  ;;  %v610_v43 = vld [vmem:[%s10008_s6 + $0xbd0] sm:$0xff]  ;;  %v643_v59 = vld [vmem:[%s10008_s6 + $0xcd8] sm:$0xff] }
 0x2dd   : > { %v8867_v39 = vcombine.low %v610_v43, %v614_v25 }
 0x2df   : > { %7509 = vmatpush1.bf16.msra.mxu0 %v8819_v17  ;;  %7933 = vmatpush1.bf16.msra.mxu1 %v8821_v56  ;;  %v8861_v17 = vcombine.low %v603_v12, %v607_v19  ;;  %v8868_v56 = vcombine.high %v610_v43, %v614_v25  ;;  %v647_v12 = vld [vmem:[%s10008_s6 + $0xcf8] sm:$0xff]  ;;  %v8893_v19 = vcombine.low %v635_v55, %v639_v61 }
 0x2e0   : > { %7510 = vmatprep.subr.bf16.mxu0 %v8828_v28  ;;  %7934 = vmatprep.subr.bf16.mxu1 %v8830_v32  ;;  %v8870_v28 = vcombine.high %v611_v48, %v615_v27  ;;  %v618_v32 = vld [vmem:[%s10008_s6 + $0xc10] sm:$0xff]  ;;  %v651_v43 = vld [vmem:[%s10008_s6 + $0xd18] sm:$0xff] }
 0x2e1   : > { %v8875_v22 = vcombine.low %v618_v32, %v622_v58  ;;  %v655_v25 = vld [vmem:[%s10008_s6 + $0xd38] sm:$0xff] }
 0x2e3   : > { %7511 = vmatpush1.bf16.msra.mxu0 %v8827_v15  ;;  %7935 = vmatpush1.bf16.msra.mxu1 %v8829_v40  ;;  %v8869_v15 = vcombine.low %v611_v48, %v615_v27  ;;  %v8876_v40 = vcombine.high %v618_v32, %v622_v58  ;;  %v8901_v48 = vcombine.low %v643_v59, %v647_v12  ;;  %v663_v32 = vld [vmem:[%s10008_s6 + $0xd78] sm:$0xff] }
 0x2e4   : > { %7512 = vmatprep.subr.bf16.mxu0 %v8836_v2  ;;  %7936 = vmatprep.subr.bf16.mxu1 %v8838_v35  ;;  %v8878_v2 = vcombine.high %v619_v33, %v623_v38  ;;  %v626_v35 = vld [vmem:[%s10008_s6 + $0xc50] sm:$0xff]  ;;  %v8909_v58 = vcombine.low %v651_v43, %v655_v25 }
 0x2e5   : > { %v8883_v3 = vcombine.low %v626_v35, %v630_v44 }
 0x2e7   : > { %7513 = vmatpush1.bf16.msra.mxu0 %v8835_v49  ;;  %7937 = vmatpush1.bf16.msra.mxu1 %v8837_v23  ;;  %v8877_v49 = vcombine.low %v619_v33, %v623_v38  ;;  %v8884_v23 = vcombine.high %v626_v35, %v630_v44 }
 0x2e8   : > { %7514 = vmatprep.subr.bf16.mxu0 %v8844_v63  ;;  %7938 = vmatprep.subr.bf16.mxu1 %v8846_v0  ;;  %v8886_v63 = vcombine.high %v627_v6, %v631_v45  ;;  %v634_v0 = vld [vmem:[%s10008_s6 + $0xc90] sm:$0xff] }
 0x2eb   : > { %7515 = vmatpush1.bf16.msra.mxu0 %v8843_v4  ;;  %7939 = vmatpush1.bf16.msra.mxu1 %v8845_v34  ;;  %v8885_v4 = vcombine.low %v627_v6, %v631_v45  ;;  %v8892_v34 = vcombine.high %v634_v0, %v638_v51 }
 0x2ec   : > { %7516 = vmatprep.subr.bf16.mxu0 %v8852_v31  ;;  %7940 = vmatprep.subr.bf16.mxu1 %v8854_v8  ;;  %v8894_v31 = vcombine.high %v635_v55, %v639_v61  ;;  %v642_v8 = vld [vmem:[%s10008_s6 + $0xcd0] sm:$0xff] }
 0x2ef   : > { %7517 = vmatpush1.bf16.msra.mxu0 %v8851_v20  ;;  %7941 = vmatpush1.bf16.msra.mxu1 %v8853_v21  ;;  %v8900_v20 = vcombine.high %v642_v8, %v646_v57  ;;  %v8902_v21 = vcombine.high %v643_v59, %v647_v12  ;;  %v682_v12 = vld [vmem:[%s10008_s6 + $0xe10] sm:$0xff] }
 0x2f0   : > { %7518 = vmatprep.subr.bf16.mxu0 %v8860_v42  ;;  %7942 = vmatprep.subr.bf16.mxu1 %v8862_v24  ;;  %v650_v42 = vld [vmem:[%s10008_s6 + $0xd10] sm:$0xff] }
 0x2f1   : > { %v654_v24 = vld [vmem:[%s10008_s6 + $0xd30] sm:$0xff] }
 0x2f2   : > { %v8908_v27 = vcombine.high %v650_v42, %v654_v24 }
 0x2f3   : > { %7519 = vmatpush1.bf16.msra.mxu0 %v8859_v16  ;;  %7943 = vmatpush1.bf16.msra.mxu1 %v8861_v17  ;;  %v8910_v16 = vcombine.high %v651_v43, %v655_v25  ;;  %v658_v17 = vld [vmem:[%s10008_s6 + $0xd50] sm:$0xff] }
 0x2f4   : > { %7520 = vmatprep.subr.bf16.mxu0 %v8868_v56  ;;  %7944 = vmatprep.subr.bf16.mxu1 %v8870_v28  ;;  %v662_v56 = vld [vmem:[%s10008_s6 + $0xd70] sm:$0xff]  ;;  %v659_v28 = vld [vmem:[%s10008_s6 + $0xd58] sm:$0xff] }
 0x2f5   : > { %v8916_v33 = vcombine.high %v658_v17, %v662_v56  ;;  %v8918_v38 = vcombine.high %v659_v28, %v663_v32  ;;  %v8915_v35 = vcombine.low %v658_v17, %v662_v56  ;;  %v691_v17 = vld [vmem:[%s10008_s6 + $0xe58] sm:$0xff] }
 0x2f6   : > { %v695_v56 = vld [vmem:[%s10008_s6 + $0xe78] sm:$0xff] }
 0x2f7   : > { %7521 = vmatpush1.bf16.msra.mxu0 %v8867_v39  ;;  %7945 = vmatpush1.bf16.msra.mxu1 %v8869_v15  ;;  %v666_v39 = vld [vmem:[%s10008_s6 + $0xd90] sm:$0xff] }
 0x2f8   : > { %7543 = vmatprep.subr.bf16.mxu0 %v8876_v40  ;;  %7967 = vmatprep.subr.bf16.mxu1 %v8878_v2  ;;  %v670_v15 = vld [vmem:[%s10008_s6 + $0xdb0] sm:$0xff]  ;;  %v667_v40 = vld [vmem:[%s10008_s6 + $0xd98] sm:$0xff] }
 0x2f9   : > { %v671_v2 = vld [vmem:[%s10008_s6 + $0xdb8] sm:$0xff]  ;;  %v8924_v44 = vcombine.high %v666_v39, %v670_v15 }
 0x2fa   : > { %7523 = vmatmul.mubr.bf16.vlgmr.msra.gmra.mrb[8].mxu0 %v10303_v1  ;;  %7947 = vmatmul.mubr.bf16.vlgmr.msra.gmra.mrb[8].mxu1 %v10303_v1  ;;  %v8891_v1 = vcombine.low %v634_v0, %v638_v51  ;;  %v8926_v45 = vcombine.high %v667_v40, %v671_v2  ;;  %v675_v0 = vld [vmem:[%s10008_s6 + $0xdd8] sm:$0xff] }
 0x2fb   : > { %7544 = vmatpush1.bf16.msra.mxu0 %v8875_v22  ;;  %7968 = vmatpush1.bf16.msra.mxu1 %v8877_v49  ;;  %v674_v22 = vld [vmem:[%s10008_s6 + $0xdd0] sm:$0xff]  ;;  %v679_v51 = vld [vmem:[%s10008_s6 + $0xdf8] sm:$0xff] }
 0x2fc   : > { %7545 = vmatprep.subr.bf16.mxu0 %v8884_v23  ;;  %7969 = vmatprep.subr.bf16.mxu1 %v8886_v63  ;;  %v678_v49 = vld [vmem:[%s10008_s6 + $0xdf0] sm:$0xff]  ;;  %v8934_v59 = vcombine.high %v675_v0, %v679_v51 }
 0x2fd   : > { %7532 = vmatprep.mubr.bf16.mxu0 %v10314_v10  ;;  %7956 = vmatprep.mubr.bf16.mxu1 %v10314_v10  ;;  %v8899_v10 = vcombine.low %v642_v8, %v646_v57  ;;  %v8932_v8 = vcombine.high %v674_v22, %v678_v49 }
 0x2ff   : > { %7546 = vmatpush1.bf16.msra.mxu0 %v8883_v3  ;;  %7970 = vmatpush1.bf16.msra.mxu1 %v8885_v4  ;;  %v8923_v3 = vcombine.low %v666_v39, %v670_v15 }
 0x300   : > { %7547 = vmatprep.subr.bf16.mxu0 %v8892_v34  ;;  %7971 = vmatprep.subr.bf16.mxu1 %v8894_v31  ;;  %v8925_v31 = vcombine.low %v667_v40, %v671_v2  ;;  %v8950_v40 = vcombine.high %v691_v17, %v695_v56  ;;  %v698_v2 = vld [vmem:[%s10008_s6 + $0xe90] sm:$0xff] }
 0x302   : > { %7533 = vmatmul.mubr.bf16.gmra.mrb[12].mxu0 %v10326_v53  ;;  %7957 = vmatmul.mubr.bf16.gmra.mrb[12].mxu1 %v10326_v53  ;;  %v8907_v53 = vcombine.low %v650_v42, %v654_v24  ;;  %v8933_v42 = vcombine.low %v675_v0, %v679_v51  ;;  %v707_v0 = vld [vmem:[%s10008_s6 + $0xed8] sm:$0xff] }
 0x303   : > { %7548 = vmatpush1.bf16.msra.mxu0 %v8891_v1  ;;  %7972 = vmatpush1.bf16.msra.mxu1 %v8893_v19  ;;  %v686_v1 = vld [vmem:[%s10008_s6 + $0xe30] sm:$0xff]  ;;  %v683_v19 = vld [vmem:[%s10008_s6 + $0xe18] sm:$0xff] }
 0x304   : > { %7549 = vmatprep.subr.bf16.mxu0 %v8900_v20  ;;  %7973 = vmatprep.subr.bf16.mxu1 %v8902_v21  ;;  %v687_v20 = vld [vmem:[%s10008_s6 + $0xe38] sm:$0xff]  ;;  %v8931_v21 = vcombine.low %v674_v22, %v678_v49  ;;  %v8940_v24 = vcombine.high %v682_v12, %v686_v1 }
 0x305   : > { %7575 = vmatprep.mubr.bf16.mxu0 %v10342_v30  ;;  %7999 = vmatprep.mubr.bf16.mxu1 %v10342_v30  ;;  %v8917_v30 = vcombine.low %v659_v28, %v663_v32  ;;  %v8942_v25 = vcombine.high %v683_v19, %v687_v20  ;;  %v711_v51 = vld [vmem:[%s10008_s6 + $0xef8] sm:$0xff] }
 0x307   : > { %7550 = vmatpush1.bf16.msra.mxu0 %v8899_v10  ;;  %7974 = vmatpush1.bf16.msra.mxu1 %v8901_v48  ;;  %v690_v10 = vld [vmem:[%s10008_s6 + $0xe50] sm:$0xff] }
 0x308   : > { %7551 = vmatprep.subr.bf16.mxu0 %v8908_v27  ;;  %7975 = vmatprep.subr.bf16.mxu1 %v8910_v16  ;;  %v694_v48 = vld [vmem:[%s10008_s6 + $0xe70] sm:$0xff] }
 0x309   : > { %v8948_v39 = vcombine.high %v690_v10, %v694_v48 }
 0x30b   : > { %7552 = vmatpush1.bf16.msra.mxu0 %v8907_v53  ;;  %7976 = vmatpush1.bf16.msra.mxu1 %v8909_v58  ;;  %v8939_v53 = vcombine.low %v682_v12, %v686_v1  ;;  %v8965_v12 = vcombine.low %v707_v0, %v711_v51 }
 0x30c   : > { %7553 = vmatprep.subr.bf16.mxu0 %v8916_v33  ;;  %7977 = vmatprep.subr.bf16.mxu1 %v8918_v38  ;;  %v8941_v38 = vcombine.low %v683_v19, %v687_v20  ;;  %v722_v20 = vld [vmem:[%s10008_s6 + $0xf50] sm:$0xff] }
 0x30d   : > { %v6941_v6 = vpop.f32.mrb[0].mxu0  ;;  %v7365_v23 = vpop.f32.mrb[0].mxu1 }
 0x30e   : > { %8232 = vst [vmem:[%s11063_s27] sm:$0xff] %v6941_v6  ;;  %v6943_v63 = vpop.f32.mrb[1].mxu0  ;;  %8234 = vst [vmem:[%s11063_s27 + $0x10] sm:$0xff] %v7365_v23  ;;  %v7367_v55 = vpop.f32.mrb[1].mxu1  ;;  %v8947_v6 = vcombine.low %v690_v10, %v694_v48  ;;  %v706_v23 = vld [vmem:[%s10008_s6 + $0xed0] sm:$0xff] }
 0x30f   : > { %8233 = vst [vmem:[%s11063_s27 + $0x8] sm:$0xff] %v6943_v63  ;;  %v6945_v61 = vpop.f32.mrb[2].mxu0  ;;  %7554 = vmatpush1.bf16.msra.mxu0 %v8915_v35  ;;  %8235 = vst [vmem:[%s11063_s27 + $0x18] sm:$0xff] %v7367_v55  ;;  %v7369_v4 = vpop.f32.mrb[2].mxu1  ;;  %7978 = vmatpush1.bf16.msra.mxu1 %v8917_v30  ;;  %v702_v35 = vld [vmem:[%s10008_s6 + $0xeb0] sm:$0xff]  ;;  %v699_v30 = vld [vmem:[%s10008_s6 + $0xe98] sm:$0xff] }
 0x310   : > { %8240 = vst [vmem:[%s11063_s27 + $0x40] sm:$0xff] %v6945_v61  ;;  %v6947_v34 = vpop.f32.mrb[3].mxu0  ;;  %7555 = vmatprep.subr.bf16.mxu0 %v8924_v44  ;;  %8242 = vst [vmem:[%s11063_s27 + $0x50] sm:$0xff] %v7369_v4  ;;  %v7371_v57 = vpop.f32.mrb[3].mxu1  ;;  %7979 = vmatprep.subr.bf16.mxu1 %v8926_v45  ;;  %v703_v44 = vld [vmem:[%s10008_s6 + $0xeb8] sm:$0xff]  ;;  %v8949_v45 = vcombine.low %v691_v17, %v695_v56  ;;  %v8956_v22 = vcombine.high %v698_v2, %v702_v35  ;;  %v710_v63 = vld [vmem:[%s10008_s6 + $0xef0] sm:$0xff] }
 0x311   : > { %8241 = vst [vmem:[%s11063_s27 + $0x48] sm:$0xff] %v6947_v34  ;;  %8243 = vst [vmem:[%s11063_s27 + $0x58] sm:$0xff] %v7371_v57  ;;  %v8958_v49 = vcombine.high %v699_v30, %v703_v44  ;;  %v8955_v55 = vcombine.low %v698_v2, %v702_v35  ;;  %v8957_v61 = vcombine.low %v699_v30, %v703_v44  ;;  %v714_v34 = vld [vmem:[%s10008_s6 + $0xf10] sm:$0xff]  ;;  %v719_v57 = vld [vmem:[%s10008_s6 + $0xf38] sm:$0xff] }
 0x312   : > { %v8966_v4 = vcombine.high %v707_v0, %v711_v51  ;;  %v731_v17 = vld [vmem:[%s10008_s6 + $0xf98] sm:$0xff]  ;;  %v746_v44 = vld [vmem:[%s10008_s6 + $0x1010] sm:$0xff] }
 0x313   : > { %7556 = vmatpush1.bf16.msra.mxu0 %v8923_v3  ;;  %7980 = vmatpush1.bf16.msra.mxu1 %v8925_v31  ;;  %v8964_v3 = vcombine.high %v706_v23, %v710_v63  ;;  %v718_v31 = vld [vmem:[%s10008_s6 + $0xf30] sm:$0xff]  ;;  %v735_v56 = vld [vmem:[%s10008_s6 + $0xfb8] sm:$0xff] }
 0x314   : > { %7557 = vmatprep.subr.bf16.mxu0 %v8932_v8  ;;  %7981 = vmatprep.subr.bf16.mxu1 %v8934_v59  ;;  %v715_v8 = vld [vmem:[%s10008_s6 + $0xf18] sm:$0xff]  ;;  %v8963_v59 = vcombine.low %v706_v23, %v710_v63  ;;  %v8972_v1 = vcombine.high %v714_v34, %v718_v31  ;;  %v8989_v2 = vcombine.low %v731_v17, %v735_v56  ;;  %v754_v51 = vld [vmem:[%s10008_s6 + $0x1050] sm:$0xff] }
 0x315   : > { %v6951_v43 = vpop.f32.mrb[4].mxu0  ;;  %v7375_v27 = vpop.f32.mrb[4].mxu1  ;;  %v8974_v19 = vcombine.high %v715_v8, %v719_v57 }
 0x316   : > { %8248 = vst [vmem:[%s11063_s27 + $0x80] sm:$0xff] %v6951_v43  ;;  %v6953_v16 = vpop.f32.mrb[5].mxu0  ;;  %8250 = vst [vmem:[%s11063_s27 + $0x90] sm:$0xff] %v7375_v27  ;;  %v7377_v28 = vpop.f32.mrb[5].mxu1  ;;  %v8971_v43 = vcombine.low %v714_v34, %v718_v31  ;;  %v730_v27 = vld [vmem:[%s10008_s6 + $0xf90] sm:$0xff] }
 0x317   : > { %8249 = vst [vmem:[%s11063_s27 + $0x88] sm:$0xff] %v6953_v16  ;;  %v6955_v32 = vpop.f32.mrb[6].mxu0  ;;  %7558 = vmatpush1.bf16.msra.mxu0 %v8931_v21  ;;  %8251 = vst [vmem:[%s11063_s27 + $0x98] sm:$0xff] %v7377_v28  ;;  %v7379_v58 = vpop.f32.mrb[6].mxu1  ;;  %7982 = vmatpush1.bf16.msra.mxu1 %v8933_v42  ;;  %v726_v21 = vld [vmem:[%s10008_s6 + $0xf70] sm:$0xff]  ;;  %v723_v42 = vld [vmem:[%s10008_s6 + $0xf58] sm:$0xff] }
 0x318   : > { %8256 = vst [vmem:[%s11063_s27 + $0xc0] sm:$0xff] %v6955_v32  ;;  %v6957_v33 = vpop.f32.mrb[7].mxu0  ;;  %7559 = vmatprep.subr.bf16.mxu0 %v8940_v24  ;;  %8258 = vst [vmem:[%s11063_s27 + $0xd0] sm:$0xff] %v7379_v58  ;;  %v7381_v15 = vpop.f32.mrb[7].mxu1  ;;  %7983 = vmatprep.subr.bf16.mxu1 %v8942_v25  ;;  %v727_v24 = vld [vmem:[%s10008_s6 + $0xf78] sm:$0xff]  ;;  %v8973_v25 = vcombine.low %v715_v8, %v719_v57  ;;  %v8980_v10 = vcombine.high %v722_v20, %v726_v21  ;;  %v734_v16 = vld [vmem:[%s10008_s6 + $0xfb0] sm:$0xff] }
 0x319   : > { %8257 = vst [vmem:[%s11063_s27 + $0xc8] sm:$0xff] %v6957_v33  ;;  %8259 = vst [vmem:[%s11063_s27 + $0xd8] sm:$0xff] %v7381_v15  ;;  %v8982_v48 = vcombine.high %v723_v42, %v727_v24  ;;  %v8979_v28 = vcombine.low %v722_v20, %v726_v21  ;;  %v8981_v32 = vcombine.low %v723_v42, %v727_v24  ;;  %v738_v33 = vld [vmem:[%s10008_s6 + $0xfd0] sm:$0xff]  ;;  %v743_v15 = vld [vmem:[%s10008_s6 + $0xff8] sm:$0xff] }
 0x31a   : > { %v8990_v58 = vcombine.high %v731_v17, %v735_v56  ;;  %v762_v57 = vld [vmem:[%s10008_s6 + $0x1090] sm:$0xff] }
 0x31b   : > { %7560 = vmatpush1.bf16.msra.mxu0 %v8939_v53  ;;  %7984 = vmatpush1.bf16.msra.mxu1 %v8941_v38  ;;  %v8988_v53 = vcombine.high %v730_v27, %v734_v16  ;;  %v742_v38 = vld [vmem:[%s10008_s6 + $0xff0] sm:$0xff] }
 0x31c   : > { %7561 = vmatprep.subr.bf16.mxu0 %v8948_v39  ;;  %7985 = vmatprep.subr.bf16.mxu1 %v8950_v40  ;;  %v739_v39 = vld [vmem:[%s10008_s6 + $0xfd8] sm:$0xff]  ;;  %v8987_v40 = vcombine.low %v730_v27, %v734_v16  ;;  %v8996_v35 = vcombine.high %v738_v33, %v742_v38  ;;  %v770_v24 = vld [vmem:[%s10008_s6 + $0x10d0] sm:$0xff] }
 0x31d   : > { %v8998_v30 = vcombine.high %v739_v39, %v743_v15  ;;  %v8997_v23 = vcombine.low %v739_v39, %v743_v15  ;;  %v778_v17 = vld [vmem:[%s10008_s6 + $0x1110] sm:$0xff]  ;;  %v787_v15 = vld [vmem:[%s10008_s6 + $0x1158] sm:$0xff] }
 0x31e   : > { %v782_v56 = vld [vmem:[%s10008_s6 + $0x1130] sm:$0xff] }
 0x31f   : > { %7562 = vmatpush1.bf16.msra.mxu0 %v8947_v6  ;;  %7986 = vmatpush1.bf16.msra.mxu1 %v8949_v45  ;;  %v750_v6 = vld [vmem:[%s10008_s6 + $0x1030] sm:$0xff]  ;;  %v747_v45 = vld [vmem:[%s10008_s6 + $0x1018] sm:$0xff] }
 0x320   : > { %7563 = vmatprep.subr.bf16.mxu0 %v8956_v22  ;;  %7987 = vmatprep.subr.bf16.mxu1 %v8958_v49  ;;  %v751_v22 = vld [vmem:[%s10008_s6 + $0x1038] sm:$0xff]  ;;  %v8995_v49 = vcombine.low %v738_v33, %v742_v38  ;;  %v9004_v63 = vcombine.high %v746_v44, %v750_v6  ;;  %v786_v38 = vld [vmem:[%s10008_s6 + $0x1150] sm:$0xff] }
 0x321   : > { %v9006_v0 = vcombine.high %v747_v45, %v751_v22  ;;  %v9005_v34 = vcombine.low %v747_v45, %v751_v22  ;;  %v790_v39 = vld [vmem:[%s10008_s6 + $0x1170] sm:$0xff]  ;;  %v795_v45 = vld [vmem:[%s10008_s6 + $0x1198] sm:$0xff] }
 0x322   : > { %v799_v22 = vld [vmem:[%s10008_s6 + $0x11b8] sm:$0xff] }
 0x323   : > { %7564 = vmatpush1.bf16.msra.mxu0 %v8955_v55  ;;  %7988 = vmatpush1.bf16.msra.mxu1 %v8957_v61  ;;  %v758_v55 = vld [vmem:[%s10008_s6 + $0x1070] sm:$0xff]  ;;  %v755_v61 = vld [vmem:[%s10008_s6 + $0x1058] sm:$0xff] }
 0x324   : > { %7565 = vmatprep.subr.bf16.mxu0 %v8964_v3  ;;  %7989 = vmatprep.subr.bf16.mxu1 %v8966_v4  ;;  %v759_v3 = vld [vmem:[%s10008_s6 + $0x1078] sm:$0xff]  ;;  %v9003_v4 = vcombine.low %v746_v44, %v750_v6  ;;  %v9012_v31 = vcombine.high %v754_v51, %v758_v55  ;;  %v794_v44 = vld [vmem:[%s10008_s6 + $0x1190] sm:$0xff] }
 0x325   : > { %v9014_v8 = vcombine.high %v755_v61, %v759_v3  ;;  %v9013_v20 = vcombine.low %v755_v61, %v759_v3  ;;  %v798_v6 = vld [vmem:[%s10008_s6 + $0x11b0] sm:$0xff]  ;;  %v807_v61 = vld [vmem:[%s10008_s6 + $0x11f8] sm:$0xff] }
 0x326   : > { %v9051_v3 = vcombine.low %v794_v44, %v798_v6 }
 0x327   : > { %7566 = vmatpush1.bf16.msra.mxu0 %v8963_v59  ;;  %7990 = vmatpush1.bf16.msra.mxu1 %v8965_v12  ;;  %v766_v59 = vld [vmem:[%s10008_s6 + $0x10b0] sm:$0xff]  ;;  %v763_v12 = vld [vmem:[%s10008_s6 + $0x1098] sm:$0xff] }
 0x328   : > { %7567 = vmatprep.subr.bf16.mxu0 %v8972_v1  ;;  %7991 = vmatprep.subr.bf16.mxu1 %v8974_v19  ;;  %v767_v1 = vld [vmem:[%s10008_s6 + $0x10b8] sm:$0xff]  ;;  %v9011_v19 = vcombine.low %v754_v51, %v758_v55  ;;  %v9020_v21 = vcombine.high %v762_v57, %v766_v59  ;;  %v806_v51 = vld [vmem:[%s10008_s6 + $0x11f0] sm:$0xff] }
 0x329   : > { %v9022_v42 = vcombine.high %v763_v12, %v767_v1  ;;  %v803_v55 = vld [vmem:[%s10008_s6 + $0x11d8] sm:$0xff] }
 0x32b   : > { %7568 = vmatpush1.bf16.msra.mxu0 %v8971_v43  ;;  %7992 = vmatpush1.bf16.msra.mxu1 %v8973_v25  ;;  %v774_v43 = vld [vmem:[%s10008_s6 + $0x10f0] sm:$0xff]  ;;  %v771_v25 = vld [vmem:[%s10008_s6 + $0x10d8] sm:$0xff] }
 0x32c   : > { %7569 = vmatprep.subr.bf16.mxu0 %v8980_v10  ;;  %7993 = vmatprep.subr.bf16.mxu1 %v8982_v48  ;;  %v775_v10 = vld [vmem:[%s10008_s6 + $0x10f8] sm:$0xff]  ;;  %v9021_v48 = vcombine.low %v763_v12, %v767_v1  ;;  %v9028_v27 = vcombine.high %v770_v24, %v774_v43 }
 0x32d   : > { %v9030_v16 = vcombine.high %v771_v25, %v775_v10  ;;  %v815_v12 = vld [vmem:[%s10008_s6 + $0x1238] sm:$0xff] }
 0x32f   : > { %7570 = vmatpush1.bf16.msra.mxu0 %v8979_v28  ;;  %7994 = vmatpush1.bf16.msra.mxu1 %v8981_v32  ;;  %v779_v28 = vld [vmem:[%s10008_s6 + $0x1118] sm:$0xff] }
 0x330   : > { %7571 = vmatprep.subr.bf16.mxu0 %v8988_v53  ;;  %7995 = vmatprep.subr.bf16.mxu1 %v8990_v58  ;;  %v783_v32 = vld [vmem:[%s10008_s6 + $0x1138] sm:$0xff]  ;;  %v9029_v53 = vcombine.low %v771_v25, %v775_v10  ;;  %v9036_v58 = vcombine.high %v778_v17, %v782_v56 }
 0x331   : > { %v9038_v33 = vcombine.high %v779_v28, %v783_v32  ;;  %v823_v25 = vld [vmem:[%s10008_s6 + $0x1278] sm:$0xff] }
 0x333   : > { %7572 = vmatpush1.bf16.msra.mxu0 %v8987_v40  ;;  %7996 = vmatpush1.bf16.msra.mxu1 %v8989_v2  ;;  %v791_v40 = vld [vmem:[%s10008_s6 + $0x1178] sm:$0xff]  ;;  %v9037_v2 = vcombine.low %v779_v28, %v783_v32 }
 0x334   : > { %7573 = vmatprep.subr.bf16.mxu0 %v8996_v35  ;;  %7997 = vmatprep.subr.bf16.mxu1 %v8998_v30  ;;  %v9044_v35 = vcombine.high %v786_v38, %v790_v39  ;;  %v9046_v30 = vcombine.high %v787_v15, %v791_v40  ;;  %v831_v28 = vld [vmem:[%s10008_s6 + $0x12b8] sm:$0xff] }
 0x337   : > { %7574 = vmatpush1.bf16.msra.mxu0 %v8995_v49  ;;  %7998 = vmatpush1.bf16.msra.mxu1 %v8997_v23  ;;  %v9043_v49 = vcombine.low %v786_v38, %v790_v39  ;;  %v9052_v23 = vcombine.high %v794_v44, %v798_v6  ;;  %v838_v38 = vld [vmem:[%s10008_s6 + $0x12f0] sm:$0xff]  ;;  %v835_v39 = vld [vmem:[%s10008_s6 + $0x12d8] sm:$0xff] }
 0x338   : > { %7596 = vmatprep.subr.bf16.mxu0 %v9004_v63  ;;  %8020 = vmatprep.subr.bf16.mxu1 %v9006_v0  ;;  %v9054_v63 = vcombine.high %v795_v45, %v799_v22  ;;  %v802_v0 = vld [vmem:[%s10008_s6 + $0x11d0] sm:$0xff]  ;;  %v843_v6 = vld [vmem:[%s10008_s6 + $0x1318] sm:$0xff] }
 0x339   : > { %v9059_v1 = vcombine.low %v802_v0, %v806_v51  ;;  %v846_v44 = vld [vmem:[%s10008_s6 + $0x1330] sm:$0xff] }
 0x33a   : > { %7576 = vmatmul.mubr.bf16.vlgmr.msra.gmra.mrb[8].mxu0 %v10403_v36  ;;  %8000 = vmatmul.mubr.bf16.vlgmr.msra.gmra.mrb[8].mxu1 %v10403_v36  ;;  %v9019_v36 = vcombine.low %v762_v57, %v766_v59  ;;  %v814_v57 = vld [vmem:[%s10008_s6 + $0x1230] sm:$0xff]  ;;  %v811_v59 = vld [vmem:[%s10008_s6 + $0x1218] sm:$0xff] }
 0x33b   : > { %7597 = vmatpush1.bf16.msra.mxu0 %v9003_v4  ;;  %8021 = vmatpush1.bf16.msra.mxu1 %v9005_v34  ;;  %v9053_v4 = vcombine.low %v795_v45, %v799_v22  ;;  %v9060_v34 = vcombine.high %v802_v0, %v806_v51  ;;  %v847_v45 = vld [vmem:[%s10008_s6 + $0x1338] sm:$0xff]  ;;  %v854_v0 = vld [vmem:[%s10008_s6 + $0x1370] sm:$0xff] }
 0x33c   : > { %7598 = vmatprep.subr.bf16.mxu0 %v9012_v31  ;;  %8022 = vmatprep.subr.bf16.mxu1 %v9014_v8  ;;  %v9062_v31 = vcombine.high %v803_v55, %v807_v61  ;;  %v810_v8 = vld [vmem:[%s10008_s6 + $0x1210] sm:$0xff]  ;;  %v851_v51 = vld [vmem:[%s10008_s6 + $0x1358] sm:$0xff] }
 0x33d   : > { %7585 = vmatprep.mubr.bf16.mxu0 %v10414_v50  ;;  %8009 = vmatprep.mubr.bf16.mxu1 %v10414_v50  ;;  %v9027_v50 = vcombine.low %v770_v24, %v774_v43  ;;  %v822_v24 = vld [vmem:[%s10008_s6 + $0x1270] sm:$0xff]  ;;  %v819_v43 = vld [vmem:[%s10008_s6 + $0x1258] sm:$0xff]  ;;  %v9067_v10 = vcombine.low %v810_v8, %v814_v57 }
 0x33f   : > { %7599 = vmatpush1.bf16.msra.mxu0 %v9011_v19  ;;  %8023 = vmatpush1.bf16.msra.mxu1 %v9013_v20  ;;  %v9061_v19 = vcombine.low %v803_v55, %v807_v61  ;;  %v9068_v20 = vcombine.high %v810_v8, %v814_v57  ;;  %v855_v55 = vld [vmem:[%s10008_s6 + $0x1378] sm:$0xff]  ;;  %v862_v8 = vld [vmem:[%s10008_s6 + $0x13b0] sm:$0xff] }
 0x340   : > { %7600 = vmatprep.subr.bf16.mxu0 %v9020_v21  ;;  %8024 = vmatprep.subr.bf16.mxu1 %v9022_v42  ;;  %v9070_v21 = vcombine.high %v811_v59, %v815_v12  ;;  %v818_v42 = vld [vmem:[%s10008_s6 + $0x1250] sm:$0xff]  ;;  %v859_v57 = vld [vmem:[%s10008_s6 + $0x1398] sm:$0xff] }
 0x341   : > { %v9075_v32 = vcombine.low %v818_v42, %v822_v24 }
 0x342   : > { %7586 = vmatmul.mubr.bf16.gmra.mrb[12].mxu0 %v10426_v5  ;;  %8010 = vmatmul.mubr.bf16.gmra.mrb[12].mxu1 %v10426_v5  ;;  %v9035_v5 = vcombine.low %v778_v17, %v782_v56  ;;  %v830_v17 = vld [vmem:[%s10008_s6 + $0x12b0] sm:$0xff]  ;;  %v827_v56 = vld [vmem:[%s10008_s6 + $0x1298] sm:$0xff] }
 0x343   : > { %7601 = vmatpush1.bf16.msra.mxu0 %v9019_v36  ;;  %8025 = vmatpush1.bf16.msra.mxu1 %v9021_v48  ;;  %v9069_v36 = vcombine.low %v811_v59, %v815_v12  ;;  %v9076_v48 = vcombine.high %v818_v42, %v822_v24  ;;  %v863_v59 = vld [vmem:[%s10008_s6 + $0x13b8] sm:$0xff]  ;;  %v870_v42 = vld [vmem:[%s10008_s6 + $0x13f0] sm:$0xff] }
 0x344   : > { %7602 = vmatprep.subr.bf16.mxu0 %v9028_v27  ;;  %8026 = vmatprep.subr.bf16.mxu1 %v9030_v16  ;;  %v9078_v27 = vcombine.high %v819_v43, %v823_v25  ;;  %v826_v16 = vld [vmem:[%s10008_s6 + $0x1290] sm:$0xff]  ;;  %v867_v24 = vld [vmem:[%s10008_s6 + $0x13d8] sm:$0xff] }
 0x345   : > { %7628 = vmatprep.mubr.bf16.mxu0 %v10442_v13  ;;  %8052 = vmatprep.mubr.bf16.mxu1 %v10442_v13  ;;  %v9045_v13 = vcombine.low %v787_v15, %v791_v40  ;;  %v839_v15 = vld [vmem:[%s10008_s6 + $0x12f8] sm:$0xff]  ;;  %v9083_v40 = vcombine.low %v826_v16, %v830_v17 }
 0x347   : > { %7603 = vmatpush1.bf16.msra.mxu0 %v9027_v50  ;;  %8027 = vmatpush1.bf16.msra.mxu1 %v9029_v53  ;;  %v9077_v50 = vcombine.low %v819_v43, %v823_v25  ;;  %v9084_v53 = vcombine.high %v826_v16, %v830_v17  ;;  %v871_v43 = vld [vmem:[%s10008_s6 + $0x13f8] sm:$0xff]  ;;  %v878_v16 = vld [vmem:[%s10008_s6 + $0x1430] sm:$0xff] }
 0x348   : > { %7604 = vmatprep.subr.bf16.mxu0 %v9036_v58  ;;  %8028 = vmatprep.subr.bf16.mxu1 %v9038_v33  ;;  %v9086_v58 = vcombine.high %v827_v56, %v831_v28  ;;  %v834_v33 = vld [vmem:[%s10008_s6 + $0x12d0] sm:$0xff]  ;;  %v875_v17 = vld [vmem:[%s10008_s6 + $0x1418] sm:$0xff] }
 0x349   : > { %v9091_v22 = vcombine.low %v834_v33, %v838_v38 }
 0x34b   : > { %7605 = vmatpush1.bf16.msra.mxu0 %v9035_v5  ;;  %8029 = vmatpush1.bf16.msra.mxu1 %v9037_v2  ;;  %v9085_v5 = vcombine.low %v827_v56, %v831_v28  ;;  %v9092_v2 = vcombine.high %v834_v33, %v838_v38  ;;  %v879_v56 = vld [vmem:[%s10008_s6 + $0x1438] sm:$0xff]  ;;  %v886_v33 = vld [vmem:[%s10008_s6 + $0x1470] sm:$0xff] }
 0x34c   : > { %7606 = vmatprep.subr.bf16.mxu0 %v9044_v35  ;;  %8030 = vmatprep.subr.bf16.mxu1 %v9046_v30  ;;  %v9094_v35 = vcombine.high %v835_v39, %v839_v15  ;;  %v842_v30 = vld [vmem:[%s10008_s6 + $0x1310] sm:$0xff]  ;;  %v883_v38 = vld [vmem:[%s10008_s6 + $0x1458] sm:$0xff] }
 0x34d   : > { %v9099_v61 = vcombine.low %v842_v30, %v846_v44 }
 0x34f   : > { %7607 = vmatpush1.bf16.msra.mxu0 %v9043_v49  ;;  %8031 = vmatpush1.bf16.msra.mxu1 %v9045_v13  ;;  %v9093_v49 = vcombine.low %v835_v39, %v839_v15  ;;  %v9100_v13 = vcombine.high %v842_v30, %v846_v44  ;;  %v887_v39 = vld [vmem:[%s10008_s6 + $0x1478] sm:$0xff]  ;;  %v894_v30 = vld [vmem:[%s10008_s6 + $0x14b0] sm:$0xff] }
 0x350   : > { %7608 = vmatprep.subr.bf16.mxu0 %v9052_v23  ;;  %8032 = vmatprep.subr.bf16.mxu1 %v9054_v63  ;;  %v9102_v23 = vcombine.high %v843_v6, %v847_v45  ;;  %v850_v63 = vld [vmem:[%s10008_s6 + $0x1350] sm:$0xff]  ;;  %v891_v44 = vld [vmem:[%s10008_s6 + $0x1498] sm:$0xff] }
 0x351   : > { %v9107_v12 = vcombine.low %v850_v63, %v854_v0 }
 0x353   : > { %7609 = vmatpush1.bf16.msra.mxu0 %v9051_v3  ;;  %8033 = vmatpush1.bf16.msra.mxu1 %v9053_v4  ;;  %v9101_v3 = vcombine.low %v843_v6, %v847_v45  ;;  %v9108_v4 = vcombine.high %v850_v63, %v854_v0  ;;  %v895_v6 = vld [vmem:[%s10008_s6 + $0x14b8] sm:$0xff]  ;;  %v902_v63 = vld [vmem:[%s10008_s6 + $0x14f0] sm:$0xff] }
 0x354   : > { %7610 = vmatprep.subr.bf16.mxu0 %v9060_v34  ;;  %8034 = vmatprep.subr.bf16.mxu1 %v9062_v31  ;;  %v9110_v34 = vcombine.high %v851_v51, %v855_v55  ;;  %v858_v31 = vld [vmem:[%s10008_s6 + $0x1390] sm:$0xff]  ;;  %v899_v0 = vld [vmem:[%s10008_s6 + $0x14d8] sm:$0xff] }
 0x355   : > { %v9115_v25 = vcombine.low %v858_v31, %v862_v8 }
 0x357   : > { %7611 = vmatpush1.bf16.msra.mxu0 %v9059_v1  ;;  %8035 = vmatpush1.bf16.msra.mxu1 %v9061_v19  ;;  %v9109_v1 = vcombine.low %v851_v51, %v855_v55  ;;  %v9116_v19 = vcombine.high %v858_v31, %v862_v8  ;;  %v903_v51 = vld [vmem:[%s10008_s6 + $0x14f8] sm:$0xff]  ;;  %v9149_v55 = vcombine.low %v891_v44, %v895_v6 }
 0x358   : > { %7612 = vmatprep.subr.bf16.mxu0 %v9068_v20  ;;  %8036 = vmatprep.subr.bf16.mxu1 %v9070_v21  ;;  %v9118_v20 = vcombine.high %v859_v57, %v863_v59  ;;  %v866_v21 = vld [vmem:[%s10008_s6 + $0x13d0] sm:$0xff]  ;;  %v907_v31 = vld [vmem:[%s10008_s6 + $0x1518] sm:$0xff] }
 0x359   : > { %v9123_v28 = vcombine.low %v866_v21, %v870_v42  ;;  %v911_v8 = vld [vmem:[%s10008_s6 + $0x1538] sm:$0xff] }
 0x35b   : > { %7613 = vmatpush1.bf16.msra.mxu0 %v9067_v10  ;;  %8037 = vmatpush1.bf16.msra.mxu1 %v9069_v36  ;;  %v9117_v10 = vcombine.low %v859_v57, %v863_v59  ;;  %v9124_v36 = vcombine.high %v866_v21, %v870_v42  ;;  %v9157_v57 = vcombine.low %v899_v0, %v903_v51  ;;  %v919_v21 = vld [vmem:[%s10008_s6 + $0x1578] sm:$0xff] }
 0x35c   : > { %7614 = vmatprep.subr.bf16.mxu0 %v9076_v48  ;;  %8038 = vmatprep.subr.bf16.mxu1 %v9078_v27  ;;  %v9126_v48 = vcombine.high %v867_v24, %v871_v43  ;;  %v874_v27 = vld [vmem:[%s10008_s6 + $0x1410] sm:$0xff]  ;;  %v9165_v42 = vcombine.low %v907_v31, %v911_v8 }
 0x35d   : > { %v9131_v15 = vcombine.low %v874_v27, %v878_v16 }
 0x35f   : > { %7615 = vmatpush1.bf16.msra.mxu0 %v9075_v32  ;;  %8039 = vmatpush1.bf16.msra.mxu1 %v9077_v50  ;;  %v9125_v32 = vcombine.low %v867_v24, %v871_v43  ;;  %v9132_v50 = vcombine.high %v874_v27, %v878_v16 }
 0x360   : > { %7616 = vmatprep.subr.bf16.mxu0 %v9084_v53  ;;  %8040 = vmatprep.subr.bf16.mxu1 %v9086_v58  ;;  %v9134_v53 = vcombine.high %v875_v17, %v879_v56  ;;  %v882_v58 = vld [vmem:[%s10008_s6 + $0x1450] sm:$0xff] }
 0x361   : > { %v9139_v45 = vcombine.low %v882_v58, %v886_v33 }
 0x363   : > { %7617 = vmatpush1.bf16.msra.mxu0 %v9083_v40  ;;  %8041 = vmatpush1.bf16.msra.mxu1 %v9085_v5  ;;  %v9133_v40 = vcombine.low %v875_v17, %v879_v56  ;;  %v9140_v5 = vcombine.high %v882_v58, %v886_v33  ;;  %v930_v56 = vld [vmem:[%s10008_s6 + $0x15d0] sm:$0xff] }
 0x364   : > { %7618 = vmatprep.subr.bf16.mxu0 %v9092_v2  ;;  %8042 = vmatprep.subr.bf16.mxu1 %v9094_v35  ;;  %v9142_v2 = vcombine.high %v883_v38, %v887_v39  ;;  %v890_v35 = vld [vmem:[%s10008_s6 + $0x1490] sm:$0xff] }
 0x367   : > { %7619 = vmatpush1.bf16.msra.mxu0 %v9091_v22  ;;  %8043 = vmatpush1.bf16.msra.mxu1 %v9093_v49  ;;  %v9141_v22 = vcombine.low %v883_v38, %v887_v39  ;;  %v9148_v49 = vcombine.high %v890_v35, %v894_v30  ;;  %v938_v39 = vld [vmem:[%s10008_s6 + $0x1610] sm:$0xff] }
 0x368   : > { %7620 = vmatprep.subr.bf16.mxu0 %v9100_v13  ;;  %8044 = vmatprep.subr.bf16.mxu1 %v9102_v23  ;;  %v9150_v13 = vcombine.high %v891_v44, %v895_v6  ;;  %v898_v23 = vld [vmem:[%s10008_s6 + $0x14d0] sm:$0xff] }
 0x369   : > { %v946_v6 = vld [vmem:[%s10008_s6 + $0x1650] sm:$0xff] }
 0x36b   : > { %7621 = vmatpush1.bf16.msra.mxu0 %v9099_v61  ;;  %8045 = vmatpush1.bf16.msra.mxu1 %v9101_v3  ;;  %v9156_v61 = vcombine.high %v898_v23, %v902_v63  ;;  %v9158_v3 = vcombine.high %v899_v0, %v903_v51  ;;  %v954_v51 = vld [vmem:[%s10008_s6 + $0x1690] sm:$0xff] }
 0x36c   : > { %7622 = vmatprep.subr.bf16.mxu0 %v9108_v4  ;;  %8046 = vmatprep.subr.bf16.mxu1 %v9110_v34  ;;  %v906_v4 = vld [vmem:[%s10008_s6 + $0x1510] sm:$0xff] }
 0x36d   : > { %v910_v34 = vld [vmem:[%s10008_s6 + $0x1530] sm:$0xff] }
 0x36e   : > { %v9164_v59 = vcombine.high %v906_v4, %v910_v34 }
 0x36f   : > { %7623 = vmatpush1.bf16.msra.mxu0 %v9107_v12  ;;  %8047 = vmatpush1.bf16.msra.mxu1 %v9109_v1  ;;  %v9166_v12 = vcombine.high %v907_v31, %v911_v8  ;;  %v914_v1 = vld [vmem:[%s10008_s6 + $0x1550] sm:$0xff] }
 0x370   : > { %7624 = vmatprep.subr.bf16.mxu0 %v9116_v19  ;;  %8048 = vmatprep.subr.bf16.mxu1 %v9118_v20  ;;  %v918_v19 = vld [vmem:[%s10008_s6 + $0x1570] sm:$0xff]  ;;  %v915_v20 = vld [vmem:[%s10008_s6 + $0x1558] sm:$0xff] }
 0x371   : > { %v9172_v24 = vcombine.high %v914_v1, %v918_v19  ;;  %v9174_v43 = vcombine.high %v915_v20, %v919_v21  ;;  %v9171_v27 = vcombine.low %v914_v1, %v918_v19  ;;  %v962_v8 = vld [vmem:[%s10008_s6 + $0x16d0] sm:$0xff] }
 0x373   : > { %7625 = vmatpush1.bf16.msra.mxu0 %v9115_v25  ;;  %8049 = vmatpush1.bf16.msra.mxu1 %v9117_v10  ;;  %v922_v25 = vld [vmem:[%s10008_s6 + $0x1590] sm:$0xff] }
 0x374   : > { %7626 = vmatprep.subr.bf16.mxu0 %v9124_v36  ;;  %8050 = vmatprep.subr.bf16.mxu1 %v9126_v48  ;;  %v926_v10 = vld [vmem:[%s10008_s6 + $0x15b0] sm:$0xff]  ;;  %v923_v36 = vld [vmem:[%s10008_s6 + $0x1598] sm:$0xff] }
 0x375   : > { %v927_v48 = vld [vmem:[%s10008_s6 + $0x15b8] sm:$0xff]  ;;  %v9180_v16 = vcombine.high %v922_v25, %v926_v10 }
 0x376   : > { %v9182_v17 = vcombine.high %v923_v36, %v927_v48  ;;  %v9181_v58 = vcombine.low %v923_v36, %v927_v48  ;;  %v978_v48 = vld [vmem:[%s10008_s6 + $0x1750] sm:$0xff] }
 0x377   : > { %7627 = vmatpush1.bf16.msra.mxu0 %v9123_v28  ;;  %8051 = vmatpush1.bf16.msra.mxu1 %v9125_v32  ;;  %v934_v28 = vld [vmem:[%s10008_s6 + $0x15f0] sm:$0xff]  ;;  %v931_v32 = vld [vmem:[%s10008_s6 + $0x15d8] sm:$0xff] }
 0x378   : > { %7649 = vmatprep.subr.bf16.mxu0 %v9132_v50  ;;  %8073 = vmatprep.subr.bf16.mxu1 %v9134_v53  ;;  %v935_v50 = vld [vmem:[%s10008_s6 + $0x15f8] sm:$0xff]  ;;  %v9179_v53 = vcombine.low %v922_v25, %v926_v10  ;;  %v9188_v33 = vcombine.high %v930_v56, %v934_v28 }
 0x379   : > { %v9190_v38 = vcombine.high %v931_v32, %v935_v50 }
 0x37a   : > { %7629 = vmatmul.mubr.bf16.vlgmr.msra.gmra.mrb[8].mxu0 %v10503_v37  ;;  %8053 = vmatmul.mubr.bf16.vlgmr.msra.gmra.mrb[8].mxu1 %v10503_v37  ;;  %v9147_v37 = vcombine.low %v890_v35, %v894_v30  ;;  %v9189_v35 = vcombine.low %v931_v32, %v935_v50  ;;  %v986_v50 = vld [vmem:[%s10008_s6 + $0x1790] sm:$0xff] }
 0x37b   : > { %7650 = vmatpush1.bf16.msra.mxu0 %v9131_v15  ;;  %8074 = vmatpush1.bf16.msra.mxu1 %v9133_v40  ;;  %v942_v15 = vld [vmem:[%s10008_s6 + $0x1630] sm:$0xff]  ;;  %v939_v40 = vld [vmem:[%s10008_s6 + $0x1618] sm:$0xff] }
 0x37c   : > { %7651 = vmatprep.subr.bf16.mxu0 %v9140_v5  ;;  %8075 = vmatprep.subr.bf16.mxu1 %v9142_v2  ;;  %v943_v5 = vld [vmem:[%s10008_s6 + $0x1638] sm:$0xff]  ;;  %v9187_v2 = vcombine.low %v930_v56, %v934_v28  ;;  %v9196_v30 = vcombine.high %v938_v39, %v942_v15 }
 0x37d   : > { %7638 = vmatprep.mubr.bf16.mxu0 %v10514_v46  ;;  %8062 = vmatprep.mubr.bf16.mxu1 %v10514_v46  ;;  %v9155_v46 = vcombine.low %v898_v23, %v902_v63  ;;  %v9198_v44 = vcombine.high %v939_v40, %v943_v5  ;;  %v9197_v23 = vcombine.low %v939_v40, %v943_v5  ;;  %v994_v5 = vld [vmem:[%s10008_s6 + $0x17d0] sm:$0xff] }
 0x37f   : > { %7652 = vmatpush1.bf16.msra.mxu0 %v9139_v45  ;;  %8076 = vmatpush1.bf16.msra.mxu1 %v9141_v22  ;;  %v950_v45 = vld [vmem:[%s10008_s6 + $0x1670] sm:$0xff]  ;;  %v947_v22 = vld [vmem:[%s10008_s6 + $0x1658] sm:$0xff] }
 0x380   : > { %7653 = vmatprep.subr.bf16.mxu0 %v9148_v49  ;;  %8077 = vmatprep.subr.bf16.mxu1 %v9150_v13  ;;  %v951_v49 = vld [vmem:[%s10008_s6 + $0x1678] sm:$0xff]  ;;  %v9195_v13 = vcombine.low %v938_v39, %v942_v15  ;;  %v9204_v63 = vcombine.high %v946_v6, %v950_v45 }
 0x381   : > { %v9206_v0 = vcombine.high %v947_v22, %v951_v49 }
 0x382   : > { %7639 = vmatmul.mubr.bf16.gmra.mrb[12].mxu0 %v10526_v62  ;;  %8063 = vmatmul.mubr.bf16.gmra.mrb[12].mxu1 %v10526_v62  ;;  %v9163_v62 = vcombine.low %v906_v4, %v910_v34  ;;  %v9205_v4 = vcombine.low %v947_v22, %v951_v49  ;;  %v1002_v49 = vld [vmem:[%s10008_s6 + $0x1810] sm:$0xff] }
 0x383   : > { %7654 = vmatpush1.bf16.msra.mxu0 %v9147_v37  ;;  %8078 = vmatpush1.bf16.msra.mxu1 %v9149_v55  ;;  %v958_v37 = vld [vmem:[%s10008_s6 + $0x16b0] sm:$0xff]  ;;  %v955_v55 = vld [vmem:[%s10008_s6 + $0x1698] sm:$0xff] }
 0x384   : > { %7655 = vmatprep.subr.bf16.mxu0 %v9156_v61  ;;  %8079 = vmatprep.subr.bf16.mxu1 %v9158_v3  ;;  %v959_v61 = vld [vmem:[%s10008_s6 + $0x16b8] sm:$0xff]  ;;  %v9203_v3 = vcombine.low %v946_v6, %v950_v45  ;;  %v9212_v34 = vcombine.high %v954_v51, %v958_v37 }
 0x385   : > { %7681 = vmatprep.mubr.bf16.mxu0 %v10542_v11  ;;  %8105 = vmatprep.mubr.bf16.mxu1 %v10542_v11  ;;  %v9173_v11 = vcombine.low %v915_v20, %v919_v21  ;;  %v9214_v31 = vcombine.high %v955_v55, %v959_v61  ;;  %v9213_v1 = vcombine.low %v955_v55, %v959_v61  ;;  %v970_v21 = vld [vmem:[%s10008_s6 + $0x1710] sm:$0xff] }
 0x386   : > { %v1010_v61 = vld [vmem:[%s10008_s6 + $0x1850] sm:$0xff] }
 0x387   : > { %7656 = vmatpush1.bf16.msra.mxu0 %v9155_v46  ;;  %8080 = vmatpush1.bf16.msra.mxu1 %v9157_v57  ;;  %v966_v46 = vld [vmem:[%s10008_s6 + $0x16f0] sm:$0xff]  ;;  %v963_v57 = vld [vmem:[%s10008_s6 + $0x16d8] sm:$0xff] }
 0x388   : > { %7657 = vmatprep.subr.bf16.mxu0 %v9164_v59  ;;  %8081 = vmatprep.subr.bf16.mxu1 %v9166_v12  ;;  %v967_v59 = vld [vmem:[%s10008_s6 + $0x16f8] sm:$0xff]  ;;  %v9211_v12 = vcombine.low %v954_v51, %v958_v37  ;;  %v9220_v19 = vcombine.high %v962_v8, %v966_v46 }
 0x389   : > { %v9222_v20 = vcombine.high %v963_v57, %v967_v59  ;;  %v9221_v25 = vcombine.low %v963_v57, %v967_v59  ;;  %v1018_v59 = vld [vmem:[%s10008_s6 + $0x1890] sm:$0xff] }
 0x38b   : > { %7658 = vmatpush1.bf16.msra.mxu0 %v9163_v62  ;;  %8082 = vmatpush1.bf16.msra.mxu1 %v9165_v42  ;;  %v974_v62 = vld [vmem:[%s10008_s6 + $0x1730] sm:$0xff]  ;;  %v971_v42 = vld [vmem:[%s10008_s6 + $0x1718] sm:$0xff] }
 0x38c   : > { %7659 = vmatprep.subr.bf16.mxu0 %v9172_v24  ;;  %8083 = vmatprep.subr.bf16.mxu1 %v9174_v43  ;;  %v975_v24 = vld [vmem:[%s10008_s6 + $0x1738] sm:$0xff]  ;;  %v9219_v43 = vcombine.low %v962_v8, %v966_v46  ;;  %v9228_v10 = vcombine.high %v970_v21, %v974_v62 }
 0x38d   : > { %v9230_v36 = vcombine.high %v971_v42, %v975_v24  ;;  %v9229_v56 = vcombine.low %v971_v42, %v975_v24  ;;  %v1026_v24 = vld [vmem:[%s10008_s6 + $0x18d0] sm:$0xff] }
 0x38f   : > { %7660 = vmatpush1.bf16.msra.mxu0 %v9171_v27  ;;  %8084 = vmatpush1.bf16.msra.mxu1 %v9173_v11  ;;  %v982_v27 = vld [vmem:[%s10008_s6 + $0x1770] sm:$0xff]  ;;  %v979_v11 = vld [vmem:[%s10008_s6 + $0x1758] sm:$0xff] }
 0x390   : > { %7661 = vmatprep.subr.bf16.mxu0 %v9180_v16  ;;  %8085 = vmatprep.subr.bf16.mxu1 %v9182_v17  ;;  %v983_v16 = vld [vmem:[%s10008_s6 + $0x1778] sm:$0xff]  ;;  %v9227_v17 = vcombine.low %v970_v21, %v974_v62  ;;  %v9236_v28 = vcombine.high %v978_v48, %v982_v27 }
 0x391   : > { %v9238_v32 = vcombine.high %v979_v11, %v983_v16  ;;  %v9237_v39 = vcombine.low %v979_v11, %v983_v16  ;;  %v1034_v11 = vld [vmem:[%s10008_s6 + $0x1910] sm:$0xff] }
 0x392   : > { %v1038_v16 = vld [vmem:[%s10008_s6 + $0x1930] sm:$0xff] }
 0x393   : > { %7662 = vmatpush1.bf16.msra.mxu0 %v9179_v53  ;;  %8086 = vmatpush1.bf16.msra.mxu1 %v9181_v58  ;;  %v990_v53 = vld [vmem:[%s10008_s6 + $0x17b0] sm:$0xff]  ;;  %v987_v58 = vld [vmem:[%s10008_s6 + $0x1798] sm:$0xff] }
 0x394   : > { %7663 = vmatprep.subr.bf16.mxu0 %v9188_v33  ;;  %8087 = vmatprep.subr.bf16.mxu1 %v9190_v38  ;;  %v991_v33 = vld [vmem:[%s10008_s6 + $0x17b8] sm:$0xff]  ;;  %v9235_v38 = vcombine.low %v978_v48, %v982_v27  ;;  %v9244_v15 = vcombine.high %v986_v50, %v990_v53 }
 0x395   : > { %v9246_v40 = vcombine.high %v987_v58, %v991_v33  ;;  %v9245_v6 = vcombine.low %v987_v58, %v991_v33  ;;  %v1046_v58 = vld [vmem:[%s10008_s6 + $0x1970] sm:$0xff]  ;;  %v1043_v33 = vld [vmem:[%s10008_s6 + $0x1958] sm:$0xff] }
 0x397   : > { %7664 = vmatpush1.bf16.msra.mxu0 %v9187_v2  ;;  %8088 = vmatpush1.bf16.msra.mxu1 %v9189_v35  ;;  %v998_v2 = vld [vmem:[%s10008_s6 + $0x17f0] sm:$0xff]  ;;  %v995_v35 = vld [vmem:[%s10008_s6 + $0x17d8] sm:$0xff] }
 0x398   : > { %7665 = vmatprep.subr.bf16.mxu0 %v9196_v30  ;;  %8089 = vmatprep.subr.bf16.mxu1 %v9198_v44  ;;  %v999_v30 = vld [vmem:[%s10008_s6 + $0x17f8] sm:$0xff]  ;;  %v9243_v44 = vcombine.low %v986_v50, %v990_v53  ;;  %v9252_v45 = vcombine.high %v994_v5, %v998_v2  ;;  %v1042_v53 = vld [vmem:[%s10008_s6 + $0x1950] sm:$0xff] }
 0x399   : > { %v9254_v22 = vcombine.high %v995_v35, %v999_v30  ;;  %v9253_v51 = vcombine.low %v995_v35, %v999_v30  ;;  %v1051_v35 = vld [vmem:[%s10008_s6 + $0x1998] sm:$0xff] }
 0x39a   : > { %v1055_v30 = vld [vmem:[%s10008_s6 + $0x19b8] sm:$0xff] }
 0x39b   : > { %7666 = vmatpush1.bf16.msra.mxu0 %v9195_v13  ;;  %8090 = vmatpush1.bf16.msra.mxu1 %v9197_v23  ;;  %v1006_v13 = vld [vmem:[%s10008_s6 + $0x1830] sm:$0xff]  ;;  %v1003_v23 = vld [vmem:[%s10008_s6 + $0x1818] sm:$0xff] }
 0x39c   : > { %7667 = vmatprep.subr.bf16.mxu0 %v9204_v63  ;;  %8091 = vmatprep.subr.bf16.mxu1 %v9206_v0  ;;  %v1007_v63 = vld [vmem:[%s10008_s6 + $0x1838] sm:$0xff]  ;;  %v9251_v0 = vcombine.low %v994_v5, %v998_v2  ;;  %v9260_v37 = vcombine.high %v1002_v49, %v1006_v13  ;;  %v1050_v5 = vld [vmem:[%s10008_s6 + $0x1990] sm:$0xff] }
 0x39d   : > { %v9262_v55 = vcombine.high %v1003_v23, %v1007_v63  ;;  %v9261_v8 = vcombine.low %v1003_v23, %v1007_v63  ;;  %v1054_v2 = vld [vmem:[%s10008_s6 + $0x19b0] sm:$0xff]  ;;  %v1063_v23 = vld [vmem:[%s10008_s6 + $0x19f8] sm:$0xff] }
 0x39e   : > { %v9307_v63 = vcombine.low %v1050_v5, %v1054_v2 }
 0x39f   : > { %7668 = vmatpush1.bf16.msra.mxu0 %v9203_v3  ;;  %8092 = vmatpush1.bf16.msra.mxu1 %v9205_v4  ;;  %v1014_v3 = vld [vmem:[%s10008_s6 + $0x1870] sm:$0xff]  ;;  %v1011_v4 = vld [vmem:[%s10008_s6 + $0x1858] sm:$0xff] }
 0x3a0   : > { %7669 = vmatprep.subr.bf16.mxu0 %v9212_v34  ;;  %8093 = vmatprep.subr.bf16.mxu1 %v9214_v31  ;;  %v1015_v34 = vld [vmem:[%s10008_s6 + $0x1878] sm:$0xff]  ;;  %v9259_v31 = vcombine.low %v1002_v49, %v1006_v13  ;;  %v9268_v46 = vcombine.high %v1010_v61, %v1014_v3  ;;  %v1062_v49 = vld [vmem:[%s10008_s6 + $0x19f0] sm:$0xff] }
 0x3a1   : > { %v9270_v57 = vcombine.high %v1011_v4, %v1015_v34  ;;  %v9269_v21 = vcombine.low %v1011_v4, %v1015_v34  ;;  %v1059_v13 = vld [vmem:[%s10008_s6 + $0x19d8] sm:$0xff] }
 0x3a2   : > { %v1071_v4 = vld [vmem:[%s10008_s6 + $0x1a38] sm:$0xff] }
 0x3a3   : > { %7670 = vmatpush1.bf16.msra.mxu0 %v9211_v12  ;;  %8094 = vmatpush1.bf16.msra.mxu1 %v9213_v1  ;;  %v1022_v12 = vld [vmem:[%s10008_s6 + $0x18b0] sm:$0xff]  ;;  %v1019_v1 = vld [vmem:[%s10008_s6 + $0x1898] sm:$0xff] }
 0x3a4   : > { %7671 = vmatprep.subr.bf16.mxu0 %v9220_v19  ;;  %8095 = vmatprep.subr.bf16.mxu1 %v9222_v20  ;;  %v1023_v19 = vld [vmem:[%s10008_s6 + $0x18b8] sm:$0xff]  ;;  %v9267_v20 = vcombine.low %v1010_v61, %v1014_v3  ;;  %v9276_v62 = vcombine.high %v1018_v59, %v1022_v12  ;;  %v1070_v61 = vld [vmem:[%s10008_s6 + $0x1a30] sm:$0xff] }
 0x3a5   : > { %v9278_v42 = vcombine.high %v1019_v1, %v1023_v19  ;;  %v1067_v3 = vld [vmem:[%s10008_s6 + $0x1a18] sm:$0xff] }
 0x3a7   : > { %7672 = vmatpush1.bf16.msra.mxu0 %v9219_v43  ;;  %8096 = vmatpush1.bf16.msra.mxu1 %v9221_v25  ;;  %v1030_v43 = vld [vmem:[%s10008_s6 + $0x18f0] sm:$0xff]  ;;  %v1027_v25 = vld [vmem:[%s10008_s6 + $0x18d8] sm:$0xff] }
 0x3a8   : > { %7673 = vmatprep.subr.bf16.mxu0 %v9228_v10  ;;  %8097 = vmatprep.subr.bf16.mxu1 %v9230_v36  ;;  %v1031_v10 = vld [vmem:[%s10008_s6 + $0x18f8] sm:$0xff]  ;;  %v9277_v36 = vcombine.low %v1019_v1, %v1023_v19  ;;  %v9284_v48 = vcombine.high %v1026_v24, %v1030_v43 }
 0x3a9   : > { %v9286_v27 = vcombine.high %v1027_v25, %v1031_v10  ;;  %v1079_v1 = vld [vmem:[%s10008_s6 + $0x1a78] sm:$0xff] }
 0x3ab   : > { %7674 = vmatpush1.bf16.msra.mxu0 %v9227_v17  ;;  %8098 = vmatpush1.bf16.msra.mxu1 %v9229_v56  ;;  %v1035_v17 = vld [vmem:[%s10008_s6 + $0x1918] sm:$0xff] }
 0x3ac   : > { %7675 = vmatprep.subr.bf16.mxu0 %v9236_v28  ;;  %8099 = vmatprep.subr.bf16.mxu1 %v9238_v32  ;;  %v1039_v56 = vld [vmem:[%s10008_s6 + $0x1938] sm:$0xff]  ;;  %v9285_v28 = vcombine.low %v1027_v25, %v1031_v10  ;;  %v9292_v32 = vcombine.high %v1034_v11, %v1038_v16 }
 0x3ad   : > { %v9294_v50 = vcombine.high %v1035_v17, %v1039_v56  ;;  %v1087_v25 = vld [vmem:[%s10008_s6 + $0x1ab8] sm:$0xff] }
 0x3af   : > { %7676 = vmatpush1.bf16.msra.mxu0 %v9235_v38  ;;  %8100 = vmatpush1.bf16.msra.mxu1 %v9237_v39  ;;  %v1047_v38 = vld [vmem:[%s10008_s6 + $0x1978] sm:$0xff]  ;;  %v9293_v39 = vcombine.low %v1035_v17, %v1039_v56 }
 0x3b0   : > { %7677 = vmatprep.subr.bf16.mxu0 %v9244_v15  ;;  %8101 = vmatprep.subr.bf16.mxu1 %v9246_v40  ;;  %v9300_v15 = vcombine.high %v1042_v53, %v1046_v58  ;;  %v9302_v40 = vcombine.high %v1043_v33, %v1047_v38  ;;  %v1095_v17 = vld [vmem:[%s10008_s6 + $0x1af8] sm:$0xff] }
 0x3b3   : > { %7678 = vmatpush1.bf16.msra.mxu0 %v9243_v44  ;;  %8102 = vmatpush1.bf16.msra.mxu1 %v9245_v6  ;;  %v9299_v44 = vcombine.low %v1042_v53, %v1046_v58  ;;  %v9308_v6 = vcombine.high %v1050_v5, %v1054_v2  ;;  %v1102_v53 = vld [vmem:[%s10008_s6 + $0x1b30] sm:$0xff]  ;;  %v1099_v58 = vld [vmem:[%s10008_s6 + $0x1b18] sm:$0xff] }
 0x3b4   : > { %7679 = vmatprep.subr.bf16.mxu0 %v9252_v45  ;;  %8103 = vmatprep.subr.bf16.mxu1 %v9254_v22  ;;  %v9310_v45 = vcombine.high %v1051_v35, %v1055_v30  ;;  %v1058_v22 = vld [vmem:[%s10008_s6 + $0x19d0] sm:$0xff]  ;;  %v1107_v2 = vld [vmem:[%s10008_s6 + $0x1b58] sm:$0xff] }
 0x3b5   : > { %v9315_v34 = vcombine.low %v1058_v22, %v1062_v49  ;;  %v1110_v5 = vld [vmem:[%s10008_s6 + $0x1b70] sm:$0xff] }
 0x3b7   : > { %7680 = vmatpush1.bf16.msra.mxu0 %v9251_v0  ;;  %8104 = vmatpush1.bf16.msra.mxu1 %v9253_v51  ;;  %v9309_v0 = vcombine.low %v1051_v35, %v1055_v30  ;;  %v9316_v51 = vcombine.high %v1058_v22, %v1062_v49  ;;  %v1111_v35 = vld [vmem:[%s10008_s6 + $0x1b78] sm:$0xff]  ;;  %v1118_v22 = vld [vmem:[%s10008_s6 + $0x1bb0] sm:$0xff] }
 0x3b8   : > { %7702 = vmatprep.subr.bf16.mxu0 %v9260_v37  ;;  %8126 = vmatprep.subr.bf16.mxu1 %v9262_v55  ;;  %v9318_v37 = vcombine.high %v1059_v13, %v1063_v23  ;;  %v1066_v55 = vld [vmem:[%s10008_s6 + $0x1a10] sm:$0xff]  ;;  %v1115_v49 = vld [vmem:[%s10008_s6 + $0x1b98] sm:$0xff] }
 0x3b9   : > { %v9323_v19 = vcombine.low %v1066_v55, %v1070_v61 }
 0x3ba   : > { %7682 = vmatmul.mubr.bf16.vlgmr.msra.gmra.mrb[8].mxu0 %v10603_v7  ;;  %8106 = vmatmul.mubr.bf16.vlgmr.msra.gmra.mrb[8].mxu1 %v10603_v7  ;;  %v9275_v7 = vcombine.low %v1018_v59, %v1022_v12  ;;  %v1078_v59 = vld [vmem:[%s10008_s6 + $0x1a70] sm:$0xff]  ;;  %v1075_v12 = vld [vmem:[%s10008_s6 + $0x1a58] sm:$0xff] }
 0x3bb   : > { %7703 = vmatpush1.bf16.msra.mxu0 %v9259_v31  ;;  %8127 = vmatpush1.bf16.msra.mxu1 %v9261_v8  ;;  %v9317_v31 = vcombine.low %v1059_v13, %v1063_v23  ;;  %v9324_v8 = vcombine.high %v1066_v55, %v1070_v61  ;;  %v1119_v13 = vld [vmem:[%s10008_s6 + $0x1bb8] sm:$0xff]  ;;  %v1126_v55 = vld [vmem:[%s10008_s6 + $0x1bf0] sm:$0xff] }
 0x3bc   : > { %7704 = vmatprep.subr.bf16.mxu0 %v9268_v46  ;;  %8128 = vmatprep.subr.bf16.mxu1 %v9270_v57  ;;  %v9326_v46 = vcombine.high %v1067_v3, %v1071_v4  ;;  %v1074_v57 = vld [vmem:[%s10008_s6 + $0x1a50] sm:$0xff]  ;;  %v1123_v61 = vld [vmem:[%s10008_s6 + $0x1bd8] sm:$0xff] }
 0x3bd   : > { %7691 = vmatprep.mubr.bf16.mxu0 %v10614_v52  ;;  %8115 = vmatprep.mubr.bf16.mxu1 %v10614_v52  ;;  %v9283_v52 = vcombine.low %v1026_v24, %v1030_v43  ;;  %v1086_v24 = vld [vmem:[%s10008_s6 + $0x1ab0] sm:$0xff]  ;;  %v1083_v43 = vld [vmem:[%s10008_s6 + $0x1a98] sm:$0xff]  ;;  %v9331_v10 = vcombine.low %v1074_v57, %v1078_v59 }
 0x3bf   : > { %7705 = vmatpush1.bf16.msra.mxu0 %v9267_v20  ;;  %8129 = vmatpush1.bf16.msra.mxu1 %v9269_v21  ;;  %v9325_v20 = vcombine.low %v1067_v3, %v1071_v4  ;;  %v9332_v21 = vcombine.high %v1074_v57, %v1078_v59  ;;  %v1127_v3 = vld [vmem:[%s10008_s6 + $0x1bf8] sm:$0xff]  ;;  %v1134_v57 = vld [vmem:[%s10008_s6 + $0x1c30] sm:$0xff] }
 0x3c0   : > { %7706 = vmatprep.subr.bf16.mxu0 %v9276_v62  ;;  %8130 = vmatprep.subr.bf16.mxu1 %v9278_v42  ;;  %v9334_v62 = vcombine.high %v1075_v12, %v1079_v1  ;;  %v1082_v42 = vld [vmem:[%s10008_s6 + $0x1a90] sm:$0xff]  ;;  %v1131_v59 = vld [vmem:[%s10008_s6 + $0x1c18] sm:$0xff] }
 0x3c1   : > { %v9339_v56 = vcombine.low %v1082_v42, %v1086_v24 }
 0x3c2   : > { %7692 = vmatmul.mubr.bf16.gmra.mrb[12].mxu0 %v10626_v14  ;;  %8116 = vmatmul.mubr.bf16.gmra.mrb[12].mxu1 %v10626_v14  ;;  %v9291_v14 = vcombine.low %v1034_v11, %v1038_v16  ;;  %v1094_v11 = vld [vmem:[%s10008_s6 + $0x1af0] sm:$0xff]  ;;  %v1091_v16 = vld [vmem:[%s10008_s6 + $0x1ad8] sm:$0xff] }
 0x3c3   : > { %7707 = vmatpush1.bf16.msra.mxu0 %v9275_v7  ;;  %8131 = vmatpush1.bf16.msra.mxu1 %v9277_v36  ;;  %v9333_v7 = vcombine.low %v1075_v12, %v1079_v1  ;;  %v9340_v36 = vcombine.high %v1082_v42, %v1086_v24  ;;  %v1135_v12 = vld [vmem:[%s10008_s6 + $0x1c38] sm:$0xff]  ;;  %v1142_v42 = vld [vmem:[%s10008_s6 + $0x1c70] sm:$0xff] }
 0x3c4   : > { %7708 = vmatprep.subr.bf16.mxu0 %v9284_v48  ;;  %8132 = vmatprep.subr.bf16.mxu1 %v9286_v27  ;;  %v9342_v48 = vcombine.high %v1083_v43, %v1087_v25  ;;  %v1090_v27 = vld [vmem:[%s10008_s6 + $0x1ad0] sm:$0xff]  ;;  %v1139_v24 = vld [vmem:[%s10008_s6 + $0x1c58] sm:$0xff] }
 0x3c5   : > { %7734 = vmatprep.mubr.bf16.mxu0 %v10642_v26  ;;  %8158 = vmatprep.mubr.bf16.mxu1 %v10642_v26  ;;  %v9301_v26 = vcombine.low %v1043_v33, %v1047_v38  ;;  %v1103_v33 = vld [vmem:[%s10008_s6 + $0x1b38] sm:$0xff]  ;;  %v9347_v38 = vcombine.low %v1090_v27, %v1094_v11 }
 0x3c7   : > { %7709 = vmatpush1.bf16.msra.mxu0 %v9283_v52  ;;  %8133 = vmatpush1.bf16.msra.mxu1 %v9285_v28  ;;  %v9341_v52 = vcombine.low %v1083_v43, %v1087_v25  ;;  %v9348_v28 = vcombine.high %v1090_v27, %v1094_v11  ;;  %v1143_v43 = vld [vmem:[%s10008_s6 + $0x1c78] sm:$0xff]  ;;  %v1150_v27 = vld [vmem:[%s10008_s6 + $0x1cb0] sm:$0xff] }
 0x3c8   : > { %7710 = vmatprep.subr.bf16.mxu0 %v9292_v32  ;;  %8134 = vmatprep.subr.bf16.mxu1 %v9294_v50  ;;  %v9350_v32 = vcombine.high %v1091_v16, %v1095_v17  ;;  %v1098_v50 = vld [vmem:[%s10008_s6 + $0x1b10] sm:$0xff]  ;;  %v1147_v11 = vld [vmem:[%s10008_s6 + $0x1c98] sm:$0xff] }
 0x3c9   : > { %v9355_v30 = vcombine.low %v1098_v50, %v1102_v53 }
 0x3cb   : > { %7711 = vmatpush1.bf16.msra.mxu0 %v9291_v14  ;;  %8135 = vmatpush1.bf16.msra.mxu1 %v9293_v39  ;;  %v9349_v14 = vcombine.low %v1091_v16, %v1095_v17  ;;  %v9356_v39 = vcombine.high %v1098_v50, %v1102_v53  ;;  %v1151_v16 = vld [vmem:[%s10008_s6 + $0x1cb8] sm:$0xff]  ;;  %v1158_v50 = vld [vmem:[%s10008_s6 + $0x1cf0] sm:$0xff] }
 0x3cc   : > { %7712 = vmatprep.subr.bf16.mxu0 %v9300_v15  ;;  %8136 = vmatprep.subr.bf16.mxu1 %v9302_v40  ;;  %v9358_v15 = vcombine.high %v1099_v58, %v1103_v33  ;;  %v1106_v40 = vld [vmem:[%s10008_s6 + $0x1b50] sm:$0xff]  ;;  %v1155_v53 = vld [vmem:[%s10008_s6 + $0x1cd8] sm:$0xff] }
 0x3cd   : > { %v9363_v23 = vcombine.low %v1106_v40, %v1110_v5 }
 0x3cf   : > { %7713 = vmatpush1.bf16.msra.mxu0 %v9299_v44  ;;  %8137 = vmatpush1.bf16.msra.mxu1 %v9301_v26  ;;  %v9357_v44 = vcombine.low %v1099_v58, %v1103_v33  ;;  %v9364_v26 = vcombine.high %v1106_v40, %v1110_v5  ;;  %v1159_v58 = vld [vmem:[%s10008_s6 + $0x1cf8] sm:$0xff]  ;;  %v9405_v33 = vcombine.low %v1147_v11, %v1151_v16 }
 0x3d0   : > { %7714 = vmatprep.subr.bf16.mxu0 %v9308_v6  ;;  %8138 = vmatprep.subr.bf16.mxu1 %v9310_v45  ;;  %v9366_v6 = vcombine.high %v1107_v2, %v1111_v35  ;;  %v1114_v45 = vld [vmem:[%s10008_s6 + $0x1b90] sm:$0xff]  ;;  %v1163_v40 = vld [vmem:[%s10008_s6 + $0x1d18] sm:$0xff] }
 0x3d1   : > { %v9371_v4 = vcombine.low %v1114_v45, %v1118_v22  ;;  %v1167_v5 = vld [vmem:[%s10008_s6 + $0x1d38] sm:$0xff] }
 0x3d3   : > { %7715 = vmatpush1.bf16.msra.mxu0 %v9307_v63  ;;  %8139 = vmatpush1.bf16.msra.mxu1 %v9309_v0  ;;  %v9365_v63 = vcombine.low %v1107_v2, %v1111_v35  ;;  %v9372_v0 = vcombine.high %v1114_v45, %v1118_v22  ;;  %v9413_v2 = vcombine.low %v1155_v53, %v1159_v58  ;;  %v1175_v45 = vld [vmem:[%s10008_s6 + $0x1d78] sm:$0xff] }
 0x3d4   : > { %7716 = vmatprep.subr.bf16.mxu0 %v9316_v51  ;;  %8140 = vmatprep.subr.bf16.mxu1 %v9318_v37  ;;  %v9374_v51 = vcombine.high %v1115_v49, %v1119_v13  ;;  %v1122_v37 = vld [vmem:[%s10008_s6 + $0x1bd0] sm:$0xff]  ;;  %v9421_v22 = vcombine.low %v1163_v40, %v1167_v5 }
 0x3d5   : > { %v9379_v1 = vcombine.low %v1122_v37, %v1126_v55 }
 0x3d7   : > { %7717 = vmatpush1.bf16.msra.mxu0 %v9315_v34  ;;  %8141 = vmatpush1.bf16.msra.mxu1 %v9317_v31  ;;  %v9373_v34 = vcombine.low %v1115_v49, %v1119_v13  ;;  %v9380_v31 = vcombine.high %v1122_v37, %v1126_v55 }
 0x3d8   : > { %7718 = vmatprep.subr.bf16.mxu0 %v9324_v8  ;;  %8142 = vmatprep.subr.bf16.mxu1 %v9326_v46  ;;  %v9382_v8 = vcombine.high %v1123_v61, %v1127_v3  ;;  %v1130_v46 = vld [vmem:[%s10008_s6 + $0x1c10] sm:$0xff] }
 0x3d9   : > { %v9387_v25 = vcombine.low %v1130_v46, %v1134_v57 }
 0x3db   : > { %7719 = vmatpush1.bf16.msra.mxu0 %v9323_v19  ;;  %8143 = vmatpush1.bf16.msra.mxu1 %v9325_v20  ;;  %v9381_v19 = vcombine.low %v1123_v61, %v1127_v3  ;;  %v9388_v20 = vcombine.high %v1130_v46, %v1134_v57  ;;  %v1186_v3 = vld [vmem:[%s10008_s6 + $0x1dd0] sm:$0xff] }
 0x3dc   : > { %7720 = vmatprep.subr.bf16.mxu0 %v9332_v21  ;;  %8144 = vmatprep.subr.bf16.mxu1 %v9334_v62  ;;  %v9390_v21 = vcombine.high %v1131_v59, %v1135_v12  ;;  %v1138_v62 = vld [vmem:[%s10008_s6 + $0x1c50] sm:$0xff] }
 0x3dd   : > { %v9395_v17 = vcombine.low %v1138_v62, %v1142_v42 }
 0x3df   : > { %7721 = vmatpush1.bf16.msra.mxu0 %v9331_v10  ;;  %8145 = vmatpush1.bf16.msra.mxu1 %v9333_v7  ;;  %v9389_v10 = vcombine.low %v1131_v59, %v1135_v12  ;;  %v9396_v7 = vcombine.high %v1138_v62, %v1142_v42  ;;  %v1194_v12 = vld [vmem:[%s10008_s6 + $0x1e10] sm:$0xff] }
 0x3e0   : > { %7722 = vmatprep.subr.bf16.mxu0 %v9340_v36  ;;  %8146 = vmatprep.subr.bf16.mxu1 %v9342_v48  ;;  %v9398_v36 = vcombine.high %v1139_v24, %v1143_v43  ;;  %v1146_v48 = vld [vmem:[%s10008_s6 + $0x1c90] sm:$0xff] }
 0x3e3   : > { %7723 = vmatpush1.bf16.msra.mxu0 %v9339_v56  ;;  %8147 = vmatpush1.bf16.msra.mxu1 %v9341_v52  ;;  %v9397_v56 = vcombine.low %v1139_v24, %v1143_v43  ;;  %v9404_v52 = vcombine.high %v1146_v48, %v1150_v27  ;;  %v1202_v43 = vld [vmem:[%s10008_s6 + $0x1e50] sm:$0xff] }
 0x3e4   : > { %7724 = vmatprep.subr.bf16.mxu0 %v9348_v28  ;;  %8148 = vmatprep.subr.bf16.mxu1 %v9350_v32  ;;  %v9406_v28 = vcombine.high %v1147_v11, %v1151_v16  ;;  %v1154_v32 = vld [vmem:[%s10008_s6 + $0x1cd0] sm:$0xff] }
 0x3e5   : > { %v1210_v16 = vld [vmem:[%s10008_s6 + $0x1e90] sm:$0xff] }
 0x3e7   : > { %7725 = vmatpush1.bf16.msra.mxu0 %v9347_v38  ;;  %8149 = vmatpush1.bf16.msra.mxu1 %v9349_v14  ;;  %v9412_v38 = vcombine.high %v1154_v32, %v1158_v50  ;;  %v9414_v14 = vcombine.high %v1155_v53, %v1159_v58  ;;  %v1218_v58 = vld [vmem:[%s10008_s6 + $0x1ed0] sm:$0xff] }
 0x3e8   : > { %7726 = vmatprep.subr.bf16.mxu0 %v9356_v39  ;;  %8150 = vmatprep.subr.bf16.mxu1 %v9358_v15  ;;  %v1162_v39 = vld [vmem:[%s10008_s6 + $0x1d10] sm:$0xff] }
 0x3e9   : > { %v1166_v15 = vld [vmem:[%s10008_s6 + $0x1d30] sm:$0xff] }
 0x3ea   : > { %v9420_v35 = vcombine.high %v1162_v39, %v1166_v15 }
 0x3eb   : > { %7727 = vmatpush1.bf16.msra.mxu0 %v9355_v30  ;;  %8151 = vmatpush1.bf16.msra.mxu1 %v9357_v44  ;;  %v9422_v30 = vcombine.high %v1163_v40, %v1167_v5  ;;  %v1170_v44 = vld [vmem:[%s10008_s6 + $0x1d50] sm:$0xff] }
 0x3ec   : > { %7728 = vmatprep.subr.bf16.mxu0 %v9364_v26  ;;  %8152 = vmatprep.subr.bf16.mxu1 %v9366_v6  ;;  %v1174_v26 = vld [vmem:[%s10008_s6 + $0x1d70] sm:$0xff]  ;;  %v1171_v6 = vld [vmem:[%s10008_s6 + $0x1d58] sm:$0xff] }
 0x3ed   : > { %v9428_v49 = vcombine.high %v1170_v44, %v1174_v26  ;;  %v9430_v13 = vcombine.high %v1171_v6, %v1175_v45  ;;  %v9427_v37 = vcombine.low %v1170_v44, %v1174_v26  ;;  %v1226_v5 = vld [vmem:[%s10008_s6 + $0x1f10] sm:$0xff] }
 0x3ef   : > { %7729 = vmatpush1.bf16.msra.mxu0 %v9363_v23  ;;  %8153 = vmatpush1.bf16.msra.mxu1 %v9365_v63  ;;  %v1178_v23 = vld [vmem:[%s10008_s6 + $0x1d90] sm:$0xff] }
 0x3f0   : > { %7730 = vmatprep.subr.bf16.mxu0 %v9372_v0  ;;  %8154 = vmatprep.subr.bf16.mxu1 %v9374_v51  ;;  %v1182_v63 = vld [vmem:[%s10008_s6 + $0x1db0] sm:$0xff]  ;;  %v1179_v0 = vld [vmem:[%s10008_s6 + $0x1d98] sm:$0xff] }
 0x3f1   : > { %v1183_v51 = vld [vmem:[%s10008_s6 + $0x1db8] sm:$0xff]  ;;  %v9436_v55 = vcombine.high %v1178_v23, %v1182_v63 }
 0x3f2   : > { %v9438_v61 = vcombine.high %v1179_v0, %v1183_v51  ;;  %v9437_v46 = vcombine.low %v1179_v0, %v1183_v51  ;;  %v1242_v51 = vld [vmem:[%s10008_s6 + $0x1f90] sm:$0xff] }
 0x3f3   : > { %7731 = vmatpush1.bf16.msra.mxu0 %v9371_v4  ;;  %8155 = vmatpush1.bf16.msra.mxu1 %v9373_v34  ;;  %v1190_v4 = vld [vmem:[%s10008_s6 + $0x1df0] sm:$0xff]  ;;  %v1187_v34 = vld [vmem:[%s10008_s6 + $0x1dd8] sm:$0xff] }
 0x3f4   : > { %7732 = vmatprep.subr.bf16.mxu0 %v9380_v31  ;;  %8156 = vmatprep.subr.bf16.mxu1 %v9382_v8  ;;  %v1191_v31 = vld [vmem:[%s10008_s6 + $0x1df8] sm:$0xff]  ;;  %v9435_v8 = vcombine.low %v1178_v23, %v1182_v63  ;;  %v9444_v57 = vcombine.high %v1186_v3, %v1190_v4 }
 0x3f5   : > { %v9446_v59 = vcombine.high %v1187_v34, %v1191_v31  ;;  %v9445_v62 = vcombine.low %v1187_v34, %v1191_v31  ;;  %v1250_v31 = vld [vmem:[%s10008_s6 + $0x1fd0] sm:$0xff] }
 0x3f7   : > { %7733 = vmatpush1.bf16.msra.mxu0 %v9379_v1  ;;  %8157 = vmatpush1.bf16.msra.mxu1 %v9381_v19  ;;  %v1198_v1 = vld [vmem:[%s10008_s6 + $0x1e30] sm:$0xff]  ;;  %v1195_v19 = vld [vmem:[%s10008_s6 + $0x1e18] sm:$0xff] }
 0x3f8   : > { %7755 = vmatprep.subr.bf16.mxu0 %v9388_v20  ;;  %8179 = vmatprep.subr.bf16.mxu1 %v9390_v21  ;;  %v1199_v20 = vld [vmem:[%s10008_s6 + $0x1e38] sm:$0xff]  ;;  %v9443_v21 = vcombine.low %v1186_v3, %v1190_v4  ;;  %v9452_v42 = vcombine.high %v1194_v12, %v1198_v1 }
 0x3f9   : > { %v9454_v24 = vcombine.high %v1195_v19, %v1199_v20 }
 0x3fa   : > { %7735 = vmatmul.mubr.bf16.vlgmr.msra.gmra.mrb[8].mxu0 %v10703_v18  ;;  %8159 = vmatmul.mubr.bf16.vlgmr.msra.gmra.mrb[8].mxu1 %v10703_v18  ;;  %v9403_v18 = vcombine.low %v1146_v48, %v1150_v27  ;;  %v9453_v48 = vcombine.low %v1195_v19, %v1199_v20 }
 0x3fb   : > { %7756 = vmatpush1.bf16.msra.mxu0 %v9387_v25  ;;  %8180 = vmatpush1.bf16.msra.mxu1 %v9389_v10  ;;  %v1206_v25 = vld [vmem:[%s10008_s6 + $0x1e70] sm:$0xff]  ;;  %v1203_v10 = vld [vmem:[%s10008_s6 + $0x1e58] sm:$0xff] }
 0x3fc   : > { %7757 = vmatprep.subr.bf16.mxu0 %v9396_v7  ;;  %8181 = vmatprep.subr.bf16.mxu1 %v9398_v36  ;;  %v1207_v7 = vld [vmem:[%s10008_s6 + $0x1e78] sm:$0xff]  ;;  %v9451_v36 = vcombine.low %v1194_v12, %v1198_v1  ;;  %v9460_v27 = vcombine.high %v1202_v43, %v1206_v25 }
 0x3fd   : > { %7744 = vmatprep.mubr.bf16.mxu0 %v10714_v29  ;;  %8168 = vmatprep.mubr.bf16.mxu1 %v10714_v29  ;;  %v9411_v29 = vcombine.low %v1154_v32, %v1158_v50  ;;  %v9462_v11 = vcombine.high %v1203_v10, %v1207_v7  ;;  %v9461_v32 = vcombine.low %v1203_v10, %v1207_v7 }
 0x3ff   : > { %7758 = vmatpush1.bf16.msra.mxu0 %v9395_v17  ;;  %8182 = vmatpush1.bf16.msra.mxu1 %v9397_v56  ;;  %v1214_v17 = vld [vmem:[%s10008_s6 + $0x1eb0] sm:$0xff]  ;;  %v1211_v56 = vld [vmem:[%s10008_s6 + $0x1e98] sm:$0xff] }
 0x400   : > { %7759 = vmatprep.subr.bf16.mxu0 %v9404_v52  ;;  %8183 = vmatprep.subr.bf16.mxu1 %v9406_v28  ;;  %v1215_v52 = vld [vmem:[%s10008_s6 + $0x1eb8] sm:$0xff]  ;;  %v9459_v28 = vcombine.low %v1202_v43, %v1206_v25  ;;  %v9468_v50 = vcombine.high %v1210_v16, %v1214_v17 }
 0x401   : > { %v9470_v53 = vcombine.high %v1211_v56, %v1215_v52 }
 0x402   : > { %7745 = vmatmul.mubr.bf16.gmra.mrb[12].mxu0 %v10726_v47  ;;  %8169 = vmatmul.mubr.bf16.gmra.mrb[12].mxu1 %v10726_v47  ;;  %v9419_v47 = vcombine.low %v1162_v39, %v1166_v15  ;;  %v9469_v39 = vcombine.low %v1211_v56, %v1215_v52  ;;  %v8289_v56 = vld [vmem:[%s11063_s27] sm:$0xff] (%p11523_p8)  ;;  %v8291_v52 = vld [vmem:[%s11063_s27 + $0x8] sm:$0xff] (%p11523_p8) }
 0x403   : > { %7760 = vmatpush1.bf16.msra.mxu0 %v9403_v18  ;;  %8184 = vmatpush1.bf16.msra.mxu1 %v9405_v33  ;;  %v1222_v18 = vld [vmem:[%s10008_s6 + $0x1ef0] sm:$0xff]  ;;  %v1219_v33 = vld [vmem:[%s10008_s6 + $0x1ed8] sm:$0xff] }
 0x404   : > { %7761 = vmatprep.subr.bf16.mxu0 %v9412_v38  ;;  %8185 = vmatprep.subr.bf16.mxu1 %v9414_v14  ;;  %v1223_v38 = vld [vmem:[%s10008_s6 + $0x1ef8] sm:$0xff]  ;;  %v9467_v14 = vcombine.low %v1210_v16, %v1214_v17  ;;  %v9476_v15 = vcombine.high %v1218_v58, %v1222_v18 }
 0x405   : > { %7787 = vmatprep.mubr.bf16.mxu0 %v10742_v60  ;;  %8211 = vmatprep.mubr.bf16.mxu1 %v10742_v60  ;;  %v9429_v60 = vcombine.low %v1171_v6, %v1175_v45  ;;  %v9478_v40 = vcombine.high %v1219_v33, %v1223_v38  ;;  %v9477_v44 = vcombine.low %v1219_v33, %v1223_v38  ;;  %v1234_v45 = vld [vmem:[%s10008_s6 + $0x1f50] sm:$0xff]  ;;  %v8305_v33 = vld [vmem:[%s11063_s27 + $0x40] sm:$0xff] (%p11523_p8)  ;;  %v8307_v38 = vld [vmem:[%s11063_s27 + $0x48] sm:$0xff] (%p11523_p8) }
 0x407   : > { %7762 = vmatpush1.bf16.msra.mxu0 %v9411_v29  ;;  %8186 = vmatpush1.bf16.msra.mxu1 %v9413_v2  ;;  %v1230_v29 = vld [vmem:[%s10008_s6 + $0x1f30] sm:$0xff]  ;;  %v1227_v2 = vld [vmem:[%s10008_s6 + $0x1f18] sm:$0xff] }
 0x408   : > { %7763 = vmatprep.subr.bf16.mxu0 %v9420_v35  ;;  %8187 = vmatprep.subr.bf16.mxu1 %v9422_v30  ;;  %v1231_v35 = vld [vmem:[%s10008_s6 + $0x1f38] sm:$0xff]  ;;  %v9475_v30 = vcombine.low %v1218_v58, %v1222_v18  ;;  %v9484_v26 = vcombine.high %v1226_v5, %v1230_v29 }
 0x409   : > { %v9486_v6 = vcombine.high %v1227_v2, %v1231_v35  ;;  %v9485_v23 = vcombine.low %v1227_v2, %v1231_v35  ;;  %v8321_v2 = vld [vmem:[%s11063_s27 + $0x80] sm:$0xff] (%p11523_p8)  ;;  %v8323_v35 = vld [vmem:[%s11063_s27 + $0x88] sm:$0xff] (%p11523_p8) }
 0x40b   : > { %7764 = vmatpush1.bf16.msra.mxu0 %v9419_v47  ;;  %8188 = vmatpush1.bf16.msra.mxu1 %v9421_v22  ;;  %v1238_v47 = vld [vmem:[%s10008_s6 + $0x1f70] sm:$0xff]  ;;  %v1235_v22 = vld [vmem:[%s10008_s6 + $0x1f58] sm:$0xff] }
 0x40c   : > { %7765 = vmatprep.subr.bf16.mxu0 %v9428_v49  ;;  %8189 = vmatprep.subr.bf16.mxu1 %v9430_v13  ;;  %v1239_v49 = vld [vmem:[%s10008_s6 + $0x1f78] sm:$0xff]  ;;  %v9483_v13 = vcombine.low %v1226_v5, %v1230_v29  ;;  %v9492_v63 = vcombine.high %v1234_v45, %v1238_v47 }
 0x40d   : > { %v9494_v0 = vcombine.high %v1235_v22, %v1239_v49  ;;  %v9493_v3 = vcombine.low %v1235_v22, %v1239_v49  ;;  %v8337_v22 = vld [vmem:[%s11063_s27 + $0xc0] sm:$0xff] (%p11523_p8)  ;;  %v8339_v49 = vld [vmem:[%s11063_s27 + $0xc8] sm:$0xff] (%p11523_p8) }
 0x40f   : > { %7766 = vmatpush1.bf16.msra.mxu0 %v9427_v37  ;;  %8190 = vmatpush1.bf16.msra.mxu1 %v9429_v60  ;;  %v1246_v37 = vld [vmem:[%s10008_s6 + $0x1fb0] sm:$0xff]  ;;  %v1243_v60 = vld [vmem:[%s10008_s6 + $0x1f98] sm:$0xff] }
 0x410   : > { %7767 = vmatprep.subr.bf16.mxu0 %v9436_v55  ;;  %8191 = vmatprep.subr.bf16.mxu1 %v9438_v61  ;;  %v1247_v55 = vld [vmem:[%s10008_s6 + $0x1fb8] sm:$0xff]  ;;  %v9491_v61 = vcombine.low %v1234_v45, %v1238_v47  ;;  %v9500_v4 = vcombine.high %v1242_v51, %v1246_v37 }
 0x411   : > { %v9502_v34 = vcombine.high %v1243_v60, %v1247_v55  ;;  %v9501_v12 = vcombine.low %v1243_v60, %v1247_v55 }
 0x413   : > { %7768 = vmatpush1.bf16.msra.mxu0 %v9435_v8  ;;  %8192 = vmatpush1.bf16.msra.mxu1 %v9437_v46  ;;  %v1254_v8 = vld [vmem:[%s10008_s6 + $0x1ff0] sm:$0xff]  ;;  %v1251_v46 = vld [vmem:[%s10008_s6 + $0x1fd8] sm:$0xff] }
 0x414   : > { %7769 = vmatprep.subr.bf16.mxu0 %v9444_v57  ;;  %8193 = vmatprep.subr.bf16.mxu1 %v9446_v59  ;;  %v1255_v57 = vld [vmem:[%s10008_s6 + $0x1ff8] sm:$0xff]  ;;  %v9499_v59 = vcombine.low %v1242_v51, %v1246_v37  ;;  %v9508_v1 = vcombine.high %v1250_v31, %v1254_v8  ;;  %v9507_v20 = vcombine.low %v1250_v31, %v1254_v8  ;;  %s9517_s6 = sshll.u32 (%p11523_p8), %s9872_s12, 6 }
 0x415   : > { %v9510_v19 = vcombine.high %v1251_v46, %v1255_v57  ;;  %s11434_s24 = scalar_lea.vmem (%p11523_p8), %s11517_s2, %s9517_s6 }
 0x416   : > { %8290 = vst [vmem:[%s11434_s24] sm:$0xff] (%p11523_p8), %v8289_v56  ;;  %8292 = vst [vmem:[%s11434_s24 + $0x8] sm:$0xff] (%p11523_p8), %v8291_v52 }
 0x417   : > { %7770 = vmatpush1.bf16.msra.mxu0 %v9443_v21  ;;  %8194 = vmatpush1.bf16.msra.mxu1 %v9445_v62  ;;  %v9509_v21 = vcombine.low %v1251_v46, %v1255_v57  ;;  %8306 = vst [vmem:[%s11434_s24 + $0x80] sm:$0xff] (%p11523_p8), %v8305_v33  ;;  %8308 = vst [vmem:[%s11434_s24 + $0x88] sm:$0xff] (%p11523_p8), %v8307_v38 }
 0x418   : > { %7771 = vmatprep.subr.bf16.mxu0 %v9452_v42  ;;  %8195 = vmatprep.subr.bf16.mxu1 %v9454_v24  ;;  %8322 = vst [vmem:[%s11434_s24 + $0x100] sm:$0xff] (%p11523_p8), %v8321_v2  ;;  %8324 = vst [vmem:[%s11434_s24 + $0x108] sm:$0xff] (%p11523_p8), %v8323_v35 }
 0x419   : > { %8338 = vst [vmem:[%s11434_s24 + $0x180] sm:$0xff] (%p11523_p8), %v8337_v22  ;;  %8340 = vst [vmem:[%s11434_s24 + $0x188] sm:$0xff] (%p11523_p8), %v8339_v49 }
 0x41b   : > { %7772 = vmatpush1.bf16.msra.mxu0 %v9451_v36  ;;  %8196 = vmatpush1.bf16.msra.mxu1 %v9453_v48 }
 0x41c   : > { %7773 = vmatprep.subr.bf16.mxu0 %v9460_v27  ;;  %8197 = vmatprep.subr.bf16.mxu1 %v9462_v11 }
 0x41f   : > { %7774 = vmatpush1.bf16.msra.mxu0 %v9459_v28  ;;  %8198 = vmatpush1.bf16.msra.mxu1 %v9461_v32  ;;  %v8293_v28 = vld [vmem:[%s11063_s27 + $0x10] sm:$0xff] (%p11523_p8)  ;;  %v8295_v32 = vld [vmem:[%s11063_s27 + $0x18] sm:$0xff] (%p11523_p8) }
 0x420   : > { %7775 = vmatprep.subr.bf16.mxu0 %v9468_v50  ;;  %8199 = vmatprep.subr.bf16.mxu1 %v9470_v53  ;;  %8294 = vst [vmem:[%s11434_s24 + $0x10] sm:$0xff] (%p11523_p8), %v8293_v28  ;;  %8296 = vst [vmem:[%s11434_s24 + $0x18] sm:$0xff] (%p11523_p8), %v8295_v32 }
 0x423   : > { %7776 = vmatpush1.bf16.msra.mxu0 %v9467_v14  ;;  %8200 = vmatpush1.bf16.msra.mxu1 %v9469_v39  ;;  %v8309_v14 = vld [vmem:[%s11063_s27 + $0x50] sm:$0xff] (%p11523_p8)  ;;  %v8311_v39 = vld [vmem:[%s11063_s27 + $0x58] sm:$0xff] (%p11523_p8) }
 0x424   : > { %7777 = vmatprep.subr.bf16.mxu0 %v9476_v15  ;;  %8201 = vmatprep.subr.bf16.mxu1 %v9478_v40  ;;  %8310 = vst [vmem:[%s11434_s24 + $0x90] sm:$0xff] (%p11523_p8), %v8309_v14  ;;  %8312 = vst [vmem:[%s11434_s24 + $0x98] sm:$0xff] (%p11523_p8), %v8311_v39 }
 0x427   : > { %7778 = vmatpush1.bf16.msra.mxu0 %v9475_v30  ;;  %8202 = vmatpush1.bf16.msra.mxu1 %v9477_v44  ;;  %v8325_v30 = vld [vmem:[%s11063_s27 + $0x90] sm:$0xff] (%p11523_p8)  ;;  %v8327_v44 = vld [vmem:[%s11063_s27 + $0x98] sm:$0xff] (%p11523_p8) }
 0x428   : > { %7779 = vmatprep.subr.bf16.mxu0 %v9484_v26  ;;  %8203 = vmatprep.subr.bf16.mxu1 %v9486_v6  ;;  %8326 = vst [vmem:[%s11434_s24 + $0x110] sm:$0xff] (%p11523_p8), %v8325_v30  ;;  %8328 = vst [vmem:[%s11434_s24 + $0x118] sm:$0xff] (%p11523_p8), %v8327_v44 }
 0x42b   : > { %7780 = vmatpush1.bf16.msra.mxu0 %v9483_v13  ;;  %8204 = vmatpush1.bf16.msra.mxu1 %v9485_v23  ;;  %v8341_v13 = vld [vmem:[%s11063_s27 + $0xd0] sm:$0xff] (%p11523_p8)  ;;  %v8343_v23 = vld [vmem:[%s11063_s27 + $0xd8] sm:$0xff] (%p11523_p8) }
 0x42c   : > { %7781 = vmatprep.subr.bf16.mxu0 %v9492_v63  ;;  %8205 = vmatprep.subr.bf16.mxu1 %v9494_v0  ;;  %8342 = vst [vmem:[%s11434_s24 + $0x190] sm:$0xff] (%p11523_p8), %v8341_v13  ;;  %8344 = vst [vmem:[%s11434_s24 + $0x198] sm:$0xff] (%p11523_p8), %v8343_v23 }
 0x42f   : > { %7782 = vmatpush1.bf16.msra.mxu0 %v9491_v61  ;;  %8206 = vmatpush1.bf16.msra.mxu1 %v9493_v3 }
 0x430   : > { %7783 = vmatprep.subr.bf16.mxu0 %v9500_v4  ;;  %8207 = vmatprep.subr.bf16.mxu1 %v9502_v34 }
 0x433   : > { %7784 = vmatpush1.bf16.msra.mxu0 %v9499_v59  ;;  %8208 = vmatpush1.bf16.msra.mxu1 %v9501_v12 }
 0x434   : > { %7785 = vmatprep.subr.bf16.mxu0 %v9508_v1  ;;  %8209 = vmatprep.subr.bf16.mxu1 %v9510_v19 }
 0x437   : > { %7786 = vmatpush1.bf16.msra.mxu0 %v9507_v20  ;;  %8210 = vmatpush1.bf16.msra.mxu1 %v9509_v21 }
 0x43a   : > { %7788 = vmatmul.mubr.bf16.vlgmr.msra.gmra.mrb[8].mxu0 %v10803_v9  ;;  %8212 = vmatmul.mubr.bf16.vlgmr.msra.gmra.mrb[8].mxu1 %v10803_v9 }
 0x43b   : > { %7797 = vmatprep.mubr.bf16.mxu0 %v10812_v54  ;;  %8221 = vmatprep.mubr.bf16.mxu1 %v10812_v54 }
 0x442   : > { %7798 = vmatmul.mubr.bf16.gmra.mrb[12].mxu0 %v10824_v41  ;;  %8222 = vmatmul.mubr.bf16.gmra.mrb[12].mxu1 %v10824_v41 }
 0x50d   : > { %v7789_v62 = vpop.f32.mrb[8].mxu0  ;;  %v8213_v42 = vpop.f32.mrb[8].mxu1 }
 0x50e   : > { %8236 = vst [vmem:[%s11063_s27 + $0x20] sm:$0xff] %v7789_v62  ;;  %v7791_v24 = vpop.f32.mrb[9].mxu0  ;;  %8238 = vst [vmem:[%s11063_s27 + $0x30] sm:$0xff] %v8213_v42  ;;  %v8215_v9 = vpop.f32.mrb[9].mxu1 }
 0x50f   : > { %8237 = vst [vmem:[%s11063_s27 + $0x28] sm:$0xff] %v7791_v24  ;;  %v7793_v43 = vpop.f32.mrb[10].mxu0  ;;  %8239 = vst [vmem:[%s11063_s27 + $0x38] sm:$0xff] %v8215_v9  ;;  %v8217_v54 = vpop.f32.mrb[10].mxu1 }
 0x510   : > { %8244 = vst [vmem:[%s11063_s27 + $0x60] sm:$0xff] %v7793_v43  ;;  %v7795_v25 = vpop.f32.mrb[11].mxu0  ;;  %8246 = vst [vmem:[%s11063_s27 + $0x70] sm:$0xff] %v8217_v54  ;;  %v8219_v41 = vpop.f32.mrb[11].mxu1 }
 0x511   : > { %8245 = vst [vmem:[%s11063_s27 + $0x68] sm:$0xff] %v7795_v25  ;;  %8247 = vst [vmem:[%s11063_s27 + $0x78] sm:$0xff] %v8219_v41 }
 0x513   : > { %8270 = sbr.rel (!%p11523_p8) target bundleno = 1314 (0x522), region = 36 }
 0x515   : > { %v7799_v10 = vpop.f32.mrb[12].mxu0  ;;  %v8223_v7 = vpop.f32.mrb[12].mxu1  ;;  %v8297_v50 = vld [vmem:[%s11063_s27 + $0x20] sm:$0xff] (%p11523_p8)  ;;  %v8301_v58 = vld [vmem:[%s11063_s27 + $0x30] sm:$0xff] (%p11523_p8) }
 0x516   : > { %8252 = vst [vmem:[%s11063_s27 + $0xa0] sm:$0xff] %v7799_v10  ;;  %v7801_v36 = vpop.f32.mrb[13].mxu0  ;;  %8254 = vst [vmem:[%s11063_s27 + $0xb0] sm:$0xff] %v8223_v7  ;;  %v8225_v48 = vpop.f32.mrb[13].mxu1  ;;  %v8299_v53 = vld [vmem:[%s11063_s27 + $0x28] sm:$0xff] (%p11523_p8)  ;;  %v8303_v18 = vld [vmem:[%s11063_s27 + $0x38] sm:$0xff] (%p11523_p8) }
 0x517   : > { %8253 = vst [vmem:[%s11063_s27 + $0xa8] sm:$0xff] %v7801_v36  ;;  %v7803_v27 = vpop.f32.mrb[14].mxu0  ;;  %8255 = vst [vmem:[%s11063_s27 + $0xb8] sm:$0xff] %v8225_v48  ;;  %v8227_v11 = vpop.f32.mrb[14].mxu1  ;;  %v8313_v15 = vld [vmem:[%s11063_s27 + $0x60] sm:$0xff] (%p11523_p8)  ;;  %v8317_v5 = vld [vmem:[%s11063_s27 + $0x70] sm:$0xff] (%p11523_p8) }
 0x518   : > { %8260 = vst [vmem:[%s11063_s27 + $0xe0] sm:$0xff] %v7803_v27  ;;  %v7805_v16 = vpop.f32.mrb[15].mxu0  ;;  %8262 = vst [vmem:[%s11063_s27 + $0xf0] sm:$0xff] %v8227_v11  ;;  %v8229_v17 = vpop.f32.mrb[15].mxu1  ;;  %v8315_v40 = vld [vmem:[%s11063_s27 + $0x68] sm:$0xff] (%p11523_p8)  ;;  %v8319_v29 = vld [vmem:[%s11063_s27 + $0x78] sm:$0xff] (%p11523_p8) }
 0x519   : > { %8261 = vst [vmem:[%s11063_s27 + $0xe8] sm:$0xff] %v7805_v16  ;;  %8263 = vst [vmem:[%s11063_s27 + $0xf8] sm:$0xff] %v8229_v17 }
 0x51a   : > { %8298 = vst [vmem:[%s11434_s24 + $0x20] sm:$0xff] %v8297_v50  ;;  %8300 = vst [vmem:[%s11434_s24 + $0x28] sm:$0xff] %v8299_v53 }
 0x51b   : > { %8302 = vst [vmem:[%s11434_s24 + $0x30] sm:$0xff] %v8301_v58  ;;  %8304 = vst [vmem:[%s11434_s24 + $0x38] sm:$0xff] %v8303_v18 }
 0x51c   : > { %8314 = vst [vmem:[%s11434_s24 + $0xa0] sm:$0xff] %v8313_v15  ;;  %8316 = vst [vmem:[%s11434_s24 + $0xa8] sm:$0xff] %v8315_v40 }
 0x51d   : > { %8318 = vst [vmem:[%s11434_s24 + $0xb0] sm:$0xff] %v8317_v5  ;;  %8320 = vst [vmem:[%s11434_s24 + $0xb8] sm:$0xff] %v8319_v29  ;;  %v8329_v26 = vld [vmem:[%s11063_s27 + $0xa0] sm:$0xff]  ;;  %v8333_v45 = vld [vmem:[%s11063_s27 + $0xb0] sm:$0xff] }
 0x51e   : > { %8330 = vst [vmem:[%s11434_s24 + $0x120] sm:$0xff] %v8329_v26  ;;  %v8331_v6 = vld [vmem:[%s11063_s27 + $0xa8] sm:$0xff]  ;;  %v8335_v47 = vld [vmem:[%s11063_s27 + $0xb8] sm:$0xff]  ;;  %8334 = vst [vmem:[%s11434_s24 + $0x130] sm:$0xff] %v8333_v45 }
 0x51f   : > { %8332 = vst [vmem:[%s11434_s24 + $0x128] sm:$0xff] %v8331_v6  ;;  %8336 = vst [vmem:[%s11434_s24 + $0x138] sm:$0xff] %v8335_v47  ;;  %v8345_v63 = vld [vmem:[%s11063_s27 + $0xe0] sm:$0xff]  ;;  %v8349_v51 = vld [vmem:[%s11063_s27 + $0xf0] sm:$0xff] }
 0x520   : > { %v8347_v0 = vld [vmem:[%s11063_s27 + $0xe8] sm:$0xff]  ;;  %8346 = vst [vmem:[%s11434_s24 + $0x1a0] sm:$0xff] %v8345_v63  ;;  %v8351_v37 = vld [vmem:[%s11063_s27 + $0xf8] sm:$0xff]  ;;  %8350 = vst [vmem:[%s11434_s24 + $0x1b0] sm:$0xff] %v8349_v51 }
 0x521   : > { %8348 = vst [vmem:[%s11434_s24 + $0x1a8] sm:$0xff] %v8347_v0  ;;  %8352 = vst [vmem:[%s11434_s24 + $0x1b8] sm:$0xff] %v8351_v37 }
 0x522 PF: > { %s15_s14 = sadd.s32 1, %s9880_s14   ;;  %s11524_s9 = smov %s9864_s10 }
 0x523   : > { %p12_p9 = scmp.ge.s32.totalorder %s15_s14, 4   ;;  %s11525_s10 = smov %s9868_s11 }
 0x524   : > { %s11526_s11 = smov %s9949_s21  ;;  %s11527_s12 = smov %s9876_s13 }
 0x525   : > { %s11528_s13 = smov %s11530_s16  ;;  %14 = sbr.rel (!%p12_p9) target bundleno = 4 (0x4), region = 94 }
 0x52c   :  { %8368 = vsyncpa [#allocation3], 1 }
 0x52d   :  { %8370 = vsyncpa [#allocation3 + $0x1], 1 }

</bundles_post_ra>
